<compile_context>
chip_gen: v7x
topology: tpu7x:2x2x1
jax: 0.10.0
libtpu: 0.0.40
codegen_flags: <defaults>
</compile_context>

<pallas_src>
import functools

import jax
import jax.numpy as jnp
import numpy as np
from jax.experimental import pallas as pl
from jax.experimental.pallas import tpu as pltpu


# ---------------------------------------------------------------------------
# Pass 1: batched routing gate + expert mixing (single invocation for the batch)
# ---------------------------------------------------------------------------
def _routing_mix_kernel(pooled_ref,
                        rw1_ref, rb1_ref, rw2_ref, rb2_ref, rw3_ref, rb3_ref,
                        experts_ref, mixed_ref, *, n_taps, chunk):
    """pooled_ref: (B, Cin) global-avg-pooled input
       experts_ref: (E, K*K*Cin*Coutp) experts, flattened row-major (tap, cin, cout)
       mixed_ref:   (B, K*K*Cin*Coutp) bf16 routing-mixed per-sample conv weights
    """
    p = pooled_ref[...]                                                          # (B, Cin)
    h = jnp.maximum(
        jnp.dot(p, rw1_ref[...], preferred_element_type=jnp.float32) + rb1_ref[...], 0.0)
    z = jnp.dot(h, rw2_ref[...], preferred_element_type=jnp.float32) + rb2_ref[...]
    s = pl.reciprocal(1.0 + jnp.exp(-z), approx=True)                            # sigmoid (EUP)
    logits = (jnp.dot(s, rw3_ref[...], preferred_element_type=jnp.float32)
              + rb3_ref[...])                                                    # (B, E)
    m = jnp.max(logits, axis=-1, keepdims=True)
    e = jnp.exp(logits - m)
    rweights = e * pl.reciprocal(jnp.sum(e, axis=-1, keepdims=True), approx=True)  # softmax

    # Expert mixing on the MXU: (B, E) @ (E, Cin*Coutp) per tap.
    # Chunked per tap to bound live vregs; column offsets are lane-tile aligned.
    for t in range(n_taps):
        sl = slice(t * chunk, (t + 1) * chunk)
        w_t = jnp.dot(rweights, experts_ref[:, sl], preferred_element_type=jnp.float32)
        mixed_ref[:, sl] = w_t.astype(mixed_ref.dtype)


# ---------------------------------------------------------------------------
# Pass 2: per-sample fused im2col conv (one MXU matmul) + channel attention
# ---------------------------------------------------------------------------
def _cond_conv_kernel(x_ref, w_ref, cw1_ref, cb1_ref, cw2_ref, cb2_ref, out_ref,
                      *, K, stride, H_out, W_out):
    """x_ref:   (1, Hp, Wp, Cin)        pre-padded NHWC sample (f32)
       w_ref:   (1, K*K*Cin, Coutp)     routing-mixed weights (bf16)
       c*_ref:  channel-attention 1x1-conv params (Cout padded to Coutp)
       out_ref: (1, H_out, W_out, Coutp) f32 (lane-dense, Coutp % 128 == 0)
    """
    Cin = x_ref.shape[3]
    Cop = w_ref.shape[2]
    HW = H_out * W_out

    # Build the im2col patch matrix once: (HW, K*K*Cin), column r = (ky*K+kx)*Cin + cin,
    # matching the row ordering of w_ref.
    cols = []
    for ky in range(K):
        for kx in range(K):
            if stride == 1:
                patch = x_ref[0, ky:ky + H_out, kx:kx + W_out, :]
            else:
                patch = x_ref[0, pl.ds(ky, H_out, stride), pl.ds(kx, W_out, stride), :]
            cols.append(patch.reshape(HW, Cin))
    # Only the MXU operands are bf16 (elementwise path stays f32 -> also fine on v5e).
    pm = jnp.concatenate(cols, axis=-1).astype(jnp.bfloat16)                     # (HW, K*K*Cin)

    # Single fused conv matmul: contraction K*K*Cin, f32 accumulate, value accumulator
    # (no per-tap acc_ref round-trips).
    acc = jnp.dot(pm, w_ref[0], preferred_element_type=jnp.float32)              # (HW, Cop)

    # Channel attention (squeeze-excite on the conv output). Padded channels are zero
    # everywhere (zero weight rows/cols), so they stay zero in the output.
    pooled_o = jnp.mean(acc, axis=0, keepdims=True)                              # (1, Cop)
    h2 = jnp.maximum(
        jnp.dot(pooled_o, cw1_ref[...], preferred_element_type=jnp.float32) + cb1_ref[...], 0.0)
    z = jnp.dot(h2, cw2_ref[...], preferred_element_type=jnp.float32) + cb2_ref[...]
    att = pl.reciprocal(1.0 + jnp.exp(-z), approx=True)                          # sigmoid (EUP)

    out_ref[0] = (acc * att).reshape(H_out, W_out, Cop).astype(out_ref.dtype)


# ---------------------------------------------------------------------------
# Wrapper
# ---------------------------------------------------------------------------
def enhanced_cond_conv2d(x_nchw, params, *, kernel_size=3, stride=1, padding=1):
    experts = params['experts']                      # (E, Cout, Cin, K, K) PyTorch layout
    E, Cout, Cin, K, _ = experts.shape
    assert K == kernel_size
    B, C, H, W = x_nchw.shape
    assert C == Cin

    H_out = (H + 2 * padding - K) // stride + 1
    W_out = (W + 2 * padding - K) // stride + 1
    Hp, Wp = H + 2 * padding, W + 2 * padding

    LANES = 128
    Cop = ((Cout + LANES - 1) // LANES) * LANES      # lane-dense padded Cout
    KK = K * K
    chunk = Cin * Cop

    # --- layout glue (NCHW -> NHWC, global avg pool for the gate, halo pad) ---
    x_nhwc = jnp.transpose(x_nchw, (0, 2, 3, 1))
    pooled = jnp.mean(x_nhwc, axis=(1, 2))                                       # (B, Cin)
    # TODO(synk): for large H,W handle the conv halo in-kernel instead of materializing
    # a padded HBM copy of x.
    x_pad = jnp.pad(x_nhwc, ((0, 0), (padding, padding), (padding, padding), (0, 0)))

    # experts -> (E, K*K*Cin*Coutp), row index ((ky*K+kx)*Cin + cin)*Coutp + cout
    experts_t = jnp.transpose(experts, (0, 3, 4, 2, 1))                          # (E,K,K,Cin,Cout)
    experts_t = jnp.pad(experts_t, ((0, 0),) * 4 + ((0, Cop - Cout),))
    experts_flat = experts_t.reshape(E, KK * Cin * Cop)

    # channel-attention params padded to Coutp (zero pad keeps semantics exact)
    cw1 = jnp.pad(params['c_w1'], ((0, Cop - Cout), (0, 0)))
    cb1 = params['c_b1']
    cw2 = jnp.pad(params['c_w2'], ((0, 0), (0, Cop - Cout)))
    cb2 = jnp.pad(params['c_b2'], ((0, 0), (0, Cop - Cout)))

    def _full(a):
        zeros = (0,) * a.ndim
        return pl.BlockSpec(a.shape, lambda i: zeros)

    # ---- pass 1: routing gate + expert mixing, whole batch in one invocation ----
    routing_inputs = (pooled, params['r_w1'], params['r_b1'], params['r_w2'],
                      params['r_b2'], params['r_w3'], params['r_b3'], experts_flat)
    mixed_flat = pl.pallas_call(
        functools.partial(_routing_mix_kernel, n_taps=KK, chunk=chunk),
        out_shape=jax.ShapeDtypeStruct((B, KK * Cin * Cop), jnp.bfloat16),
        grid_spec=pltpu.PrefetchScalarGridSpec(
            num_scalar_prefetch=0,
            grid=(1,),
            in_specs=[_full(a) for a in routing_inputs],
            out_specs=pl.BlockSpec((B, KK * Cin * Cop), lambda i: (0, 0)),
        ),
        compiler_params=pltpu.CompilerParams(dimension_semantics=("arbitrary",)),
    )(*routing_inputs)

    mixed_w = mixed_flat.reshape(B, KK * Cin, Cop)   # row-major reshape: free metadata change

    # ---- pass 2: per-sample conv + channel attention ----
    # NOTE: at realistic channel counts, add a Cout grid axis (tile mixed_w over Coutp) and
    # set vmem_limit_bytes so the weights fit v7x's 64 MiB VMEM.
    kernel = functools.partial(_cond_conv_kernel, K=K, stride=stride,
                               H_out=H_out, W_out=W_out)
    out_padded = pl.pallas_call(
        kernel,
        out_shape=jax.ShapeDtypeStruct((B, H_out, W_out, Cop), jnp.float32),
        grid_spec=pltpu.PrefetchScalarGridSpec(
            num_scalar_prefetch=0,
            grid=(B,),
            in_specs=[
                pl.BlockSpec((1, Hp, Wp, Cin), lambda b: (b, 0, 0, 0)),
                pl.BlockSpec((1, KK * Cin, Cop), lambda b: (b, 0, 0)),
                _full(cw1), _full(cb1), _full(cw2), _full(cb2),
            ],
            out_specs=pl.BlockSpec((1, H_out, W_out, Cop), lambda b: (b, 0, 0, 0)),
        ),
        compiler_params=pltpu.CompilerParams(dimension_semantics=("parallel",)),
    )(x_pad, mixed_w, cw1, cb1, cw2, cb2)

    out_nhwc = out_padded[..., :Cout]                # drop the lane padding
    return jnp.transpose(out_nhwc, (0, 3, 1, 2))     # back to NCHW


# ---------------------------------------------------------------------------
# Pure-JAX reference (intended CondConv semantics), NCHW
# ---------------------------------------------------------------------------
def ref_forward(x, params, *, stride=1, padding=1):
    experts = params['experts']
    E, Cout, Cin, K, _ = experts.shape
    B = x.shape[0]

    pooled = x.mean(axis=(2, 3))                                                 # (B, Cin)
    h = jax.nn.relu(pooled @ params['r_w1'] + params['r_b1'])
    s = jax.nn.sigmoid(h @ params['r_w2'] + params['r_b2'])
    logits = s @ params['r_w3'] + params['r_b3']
    rw = jax.nn.softmax(logits, axis=-1)                                         # (B, E)

    comb = jnp.einsum('be,eoikl->boikl', rw, experts)                            # (B,Cout,Cin,K,K)
    outs = []
    for b in range(B):
        outs.append(jax.lax.conv_general_dilated(
            x[b:b + 1], comb[b],
            window_strides=(stride, stride),
            padding=[(padding, padding), (padding, padding)],
            dimension_numbers=('NCHW', 'OIHW', 'NCHW'),
            precision=jax.lax.Precision.HIGHEST))
    out = jnp.concatenate(outs, axis=0)                                          # (B,Cout,H',W')

    po = out.mean(axis=(2, 3))
    h2 = jax.nn.relu(po @ params['c_w1'] + params['c_b1'])
    att = jax.nn.sigmoid(h2 @ params['c_w2'] + params['c_b2'])
    return out * att[:, :, None, None]


if __name__ == "__main__":
    B, Cin, H, W = 2, 32, 16, 16
    Cout, K, stride, padding = 32, 3, 1, 1
    E, red = 8, 16
    hid_in, hid_out = Cin // red, Cout // red

    key = jax.random.PRNGKey(0)
    ks = jax.random.split(key, 13)
    params = {
        'experts': 0.1 * jax.random.normal(ks[0], (E, Cout, Cin, K, K), jnp.float32),
        'r_w1': 0.1 * jax.random.normal(ks[1], (Cin, hid_in), jnp.float32),
        'r_b1': 0.1 * jax.random.normal(ks[2], (1, hid_in), jnp.float32),
        'r_w2': 0.1 * jax.random.normal(ks[3], (hid_in, Cin), jnp.float32),
        'r_b2': 0.1 * jax.random.normal(ks[4], (1, Cin), jnp.float32),
        'r_w3': 0.1 * jax.random.normal(ks[5], (Cin, E), jnp.float32),
        'r_b3': 0.1 * jax.random.normal(ks[6], (1, E), jnp.float32),
        'c_w1': 0.1 * jax.random.normal(ks[7], (Cout, hid_out), jnp.float32),
        'c_b1': 0.1 * jax.random.normal(ks[8], (1, hid_out), jnp.float32),
        'c_w2': 0.1 * jax.random.normal(ks[9], (hid_out, Cout), jnp.float32),
        'c_b2': 0.1 * jax.random.normal(ks[10], (1, Cout), jnp.float32),
    }
    x = jax.random.normal(ks[11], (B, Cin, H, W), jnp.float32)

    out = enhanced_cond_conv2d(x, params, kernel_size=K, stride=stride, padding=padding)
    out = jax.block_until_ready(out)

    ref = ref_forward(x, params, stride=stride, padding=padding)
    np.testing.assert_allclose(np.asarray(out), np.asarray(ref), rtol=5e-2, atol=5e-2)
    print("KERNEL_OK")
</pallas_src>

<mosaic_0001>
module attributes {stable_mosaic.version = 11 : i64} {
  func.func @_routing_mix_kernel(%arg0: i32, %arg1: memref<2x32xf32, #tpu.memory_space<vmem>>, %arg2: memref<32x2xf32, #tpu.memory_space<vmem>>, %arg3: memref<1x2xf32, #tpu.memory_space<vmem>>, %arg4: memref<2x32xf32, #tpu.memory_space<vmem>>, %arg5: memref<1x32xf32, #tpu.memory_space<vmem>>, %arg6: memref<32x8xf32, #tpu.memory_space<vmem>>, %arg7: memref<1x8xf32, #tpu.memory_space<vmem>>, %arg8: memref<8x36864xf32, #tpu.memory_space<vmem>>, %arg9: memref<2x36864xbf16, #tpu.memory_space<vmem>>) attributes {dimension_semantics = [#tpu.dimension_semantics<arbitrary>], iteration_bounds = array<i64: 1>, scalar_prefetch = 0 : i64, scratch_operands = 0 : i64, tpu.core_type = #tpu.core_type<tc>, window_params = [{pipeline_mode = #tpu.pipeline_mode<synchronous>, transform_indices = @transform_0, window_bounds = array<i64: 2, 32>}, {pipeline_mode = #tpu.pipeline_mode<synchronous>, transform_indices = @transform_1, window_bounds = array<i64: 32, 2>}, {pipeline_mode = #tpu.pipeline_mode<synchronous>, transform_indices = @transform_2, window_bounds = array<i64: 1, 2>}, {pipeline_mode = #tpu.pipeline_mode<synchronous>, transform_indices = @transform_3, window_bounds = array<i64: 2, 32>}, {pipeline_mode = #tpu.pipeline_mode<synchronous>, transform_indices = @transform_4, window_bounds = array<i64: 1, 32>}, {pipeline_mode = #tpu.pipeline_mode<synchronous>, transform_indices = @transform_5, window_bounds = array<i64: 32, 8>}, {pipeline_mode = #tpu.pipeline_mode<synchronous>, transform_indices = @transform_6, window_bounds = array<i64: 1, 8>}, {pipeline_mode = #tpu.pipeline_mode<synchronous>, transform_indices = @transform_7, window_bounds = array<i64: 8, 36864>}, {pipeline_mode = #tpu.pipeline_mode<synchronous>, transform_indices = @transform_8, window_bounds = array<i64: 2, 36864>}]} {
    %c0 = arith.constant 0 : index
    %c0_0 = arith.constant 0 : index
    %0 = vector.load %arg1[%c0, %c0_0] : memref<2x32xf32, #tpu.memory_space<vmem>>, vector<2x32xf32>
    %c0_1 = arith.constant 0 : index
    %c0_2 = arith.constant 0 : index
    %1 = vector.load %arg2[%c0_1, %c0_2] : memref<32x2xf32, #tpu.memory_space<vmem>>, vector<32x2xf32>
    %cst = arith.constant dense<0.000000e+00> : vector<2x2xf32>
    %2 = tpu.matmul %0, %1, %cst {dimension_numbers = #tpu.dot_dimension_numbers<[1], [0], [0], [1], [0, 0, 1, 1], [], []>} : vector<2x32xf32>, vector<32x2xf32>, vector<2x2xf32> -> vector<2x2xf32>
    %c0_3 = arith.constant 0 : index
    %c0_4 = arith.constant 0 : index
    %3 = vector.load %arg3[%c0_3, %c0_4] : memref<1x2xf32, #tpu.memory_space<vmem>>, vector<1x2xf32>
    %4 = vector.broadcast %3 : vector<1x2xf32> to vector<2x2xf32>
    %5 = arith.addf %2, %4 : vector<2x2xf32>
    %cst_5 = arith.constant 0.000000e+00 : f32
    %6 = vector.broadcast %cst_5 : f32 to vector<2x2xf32>
    %7 = arith.maximumf %5, %6 : vector<2x2xf32>
    %c0_6 = arith.constant 0 : index
    %c0_7 = arith.constant 0 : index
    %8 = vector.load %arg4[%c0_6, %c0_7] : memref<2x32xf32, #tpu.memory_space<vmem>>, vector<2x32xf32>
    %cst_8 = arith.constant dense<0.000000e+00> : vector<2x32xf32>
    %9 = tpu.matmul %7, %8, %cst_8 {dimension_numbers = #tpu.dot_dimension_numbers<[1], [0], [0], [1], [0, 0, 1, 1], [], []>} : vector<2x2xf32>, vector<2x32xf32>, vector<2x32xf32> -> vector<2x32xf32>
    %c0_9 = arith.constant 0 : index
    %c0_10 = arith.constant 0 : index
    %10 = vector.load %arg5[%c0_9, %c0_10] : memref<1x32xf32, #tpu.memory_space<vmem>>, vector<1x32xf32>
    %11 = vector.broadcast %10 : vector<1x32xf32> to vector<2x32xf32>
    %12 = arith.addf %9, %11 : vector<2x32xf32>
    %cst_11 = arith.constant 0.000000e+00 : f32
    %13 = vector.broadcast %cst_11 : f32 to vector<2x32xf32>
    %14 = arith.subf %13, %12 : vector<2x32xf32>
    %15 = math.exp %14 : vector<2x32xf32>
    %cst_12 = arith.constant 1.000000e+00 : f32
    %16 = vector.broadcast %cst_12 : f32 to vector<2x32xf32>
    %17 = arith.addf %16, %15 : vector<2x32xf32>
    %18 = tpu.reciprocal %17 {approx = true} : vector<2x32xf32> -> vector<2x32xf32>
    %c0_13 = arith.constant 0 : index
    %c0_14 = arith.constant 0 : index
    %19 = vector.load %arg6[%c0_13, %c0_14] : memref<32x8xf32, #tpu.memory_space<vmem>>, vector<32x8xf32>
    %cst_15 = arith.constant dense<0.000000e+00> : vector<2x8xf32>
    %20 = tpu.matmul %18, %19, %cst_15 {dimension_numbers = #tpu.dot_dimension_numbers<[1], [0], [0], [1], [0, 0, 1, 1], [], []>} : vector<2x32xf32>, vector<32x8xf32>, vector<2x8xf32> -> vector<2x8xf32>
    %c0_16 = arith.constant 0 : index
    %c0_17 = arith.constant 0 : index
    %21 = vector.load %arg7[%c0_16, %c0_17] : memref<1x8xf32, #tpu.memory_space<vmem>>, vector<1x8xf32>
    %22 = vector.broadcast %21 : vector<1x8xf32> to vector<2x8xf32>
    %23 = arith.addf %20, %22 : vector<2x8xf32>
    %cst_18 = arith.constant dense<0xFF800000> : vector<2xf32>
    %24 = vector.multi_reduction <maximumf>, %23, %cst_18 [1] : vector<2x8xf32> to vector<2xf32>
    %25 = vector.shape_cast %24 : vector<2xf32> to vector<2x1xf32>
    %26 = vector.broadcast %25 : vector<2x1xf32> to vector<2x8xf32>
    %27 = arith.subf %23, %26 : vector<2x8xf32>
    %28 = math.exp %27 : vector<2x8xf32>
    %cst_19 = arith.constant dense<0.000000e+00> : vector<2xf32>
    %29 = vector.multi_reduction <add>, %28, %cst_19 [1] : vector<2x8xf32> to vector<2xf32>
    %30 = vector.shape_cast %29 : vector<2xf32> to vector<2x1xf32>
    %31 = tpu.reciprocal %30 {approx = true} : vector<2x1xf32> -> vector<2x1xf32>
    %32 = vector.broadcast %31 : vector<2x1xf32> to vector<2x8xf32>
    %33 = arith.mulf %28, %32 : vector<2x8xf32>
    %c0_20 = arith.constant 0 : index
    %c0_21 = arith.constant 0 : index
    %34 = vector.load %arg8[%c0_20, %c0_21] : memref<8x36864xf32, #tpu.memory_space<vmem>>, vector<8x4096xf32>
    %cst_22 = arith.constant dense<0.000000e+00> : vector<2x4096xf32>
    %35 = tpu.matmul %33, %34, %cst_22 {dimension_numbers = #tpu.dot_dimension_numbers<[1], [0], [0], [1], [0, 0, 1, 1], [], []>} : vector<2x8xf32>, vector<8x4096xf32>, vector<2x4096xf32> -> vector<2x4096xf32>
    %36 = arith.truncf %35 : vector<2x4096xf32> to vector<2x4096xbf16>
    %c0_23 = arith.constant 0 : index
    %c0_24 = arith.constant 0 : index
    %37 = vector.load %arg9[%c0_23, %c0_24] : memref<2x36864xbf16, #tpu.memory_space<vmem>>, vector<2x4096xbf16>
    tpu.vector_store %arg9[%c0_23, %c0_24], %36 {strides = array<i32>} : memref<2x36864xbf16, #tpu.memory_space<vmem>>, vector<2x4096xbf16>,
    %c0_25 = arith.constant 0 : index
    %c4096 = arith.constant 4096 : index
    %38 = vector.load %arg8[%c0_25, %c4096] : memref<8x36864xf32, #tpu.memory_space<vmem>>, vector<8x4096xf32>
    %cst_26 = arith.constant dense<0.000000e+00> : vector<2x4096xf32>
    %39 = tpu.matmul %33, %38, %cst_26 {dimension_numbers = #tpu.dot_dimension_numbers<[1], [0], [0], [1], [0, 0, 1, 1], [], []>} : vector<2x8xf32>, vector<8x4096xf32>, vector<2x4096xf32> -> vector<2x4096xf32>
    %40 = arith.truncf %39 : vector<2x4096xf32> to vector<2x4096xbf16>
    %c0_27 = arith.constant 0 : index
    %c4096_28 = arith.constant 4096 : index
    %41 = vector.load %arg9[%c0_27, %c4096_28] : memref<2x36864xbf16, #tpu.memory_space<vmem>>, vector<2x4096xbf16>
    tpu.vector_store %arg9[%c0_27, %c4096_28], %40 {strides = array<i32>} : memref<2x36864xbf16, #tpu.memory_space<vmem>>, vector<2x4096xbf16>,
    %c0_29 = arith.constant 0 : index
    %c8192 = arith.constant 8192 : index
    %42 = vector.load %arg8[%c0_29, %c8192] : memref<8x36864xf32, #tpu.memory_space<vmem>>, vector<8x4096xf32>
    %cst_30 = arith.constant dense<0.000000e+00> : vector<2x4096xf32>
    %43 = tpu.matmul %33, %42, %cst_30 {dimension_numbers = #tpu.dot_dimension_numbers<[1], [0], [0], [1], [0, 0, 1, 1], [], []>} : vector<2x8xf32>, vector<8x4096xf32>, vector<2x4096xf32> -> vector<2x4096xf32>
    %44 = arith.truncf %43 : vector<2x4096xf32> to vector<2x4096xbf16>
    %c0_31 = arith.constant 0 : index
    %c8192_32 = arith.constant 8192 : index
    %45 = vector.load %arg9[%c0_31, %c8192_32] : memref<2x36864xbf16, #tpu.memory_space<vmem>>, vector<2x4096xbf16>
    tpu.vector_store %arg9[%c0_31, %c8192_32], %44 {strides = array<i32>} : memref<2x36864xbf16, #tpu.memory_space<vmem>>, vector<2x4096xbf16>,
    %c0_33 = arith.constant 0 : index
    %c12288 = arith.constant 12288 : index
    %46 = vector.load %arg8[%c0_33, %c12288] : memref<8x36864xf32, #tpu.memory_space<vmem>>, vector<8x4096xf32>
    %cst_34 = arith.constant dense<0.000000e+00> : vector<2x4096xf32>
    %47 = tpu.matmul %33, %46, %cst_34 {dimension_numbers = #tpu.dot_dimension_numbers<[1], [0], [0], [1], [0, 0, 1, 1], [], []>} : vector<2x8xf32>, vector<8x4096xf32>, vector<2x4096xf32> -> vector<2x4096xf32>
    %48 = arith.truncf %47 : vector<2x4096xf32> to vector<2x4096xbf16>
    %c0_35 = arith.constant 0 : index
    %c12288_36 = arith.constant 12288 : index
    %49 = vector.load %arg9[%c0_35, %c12288_36] : memref<2x36864xbf16, #tpu.memory_space<vmem>>, vector<2x4096xbf16>
    tpu.vector_store %arg9[%c0_35, %c12288_36], %48 {strides = array<i32>} : memref<2x36864xbf16, #tpu.memory_space<vmem>>, vector<2x4096xbf16>,
    %c0_37 = arith.constant 0 : index
    %c16384 = arith.constant 16384 : index
    %50 = vector.load %arg8[%c0_37, %c16384] : memref<8x36864xf32, #tpu.memory_space<vmem>>, vector<8x4096xf32>
    %cst_38 = arith.constant dense<0.000000e+00> : vector<2x4096xf32>
    %51 = tpu.matmul %33, %50, %cst_38 {dimension_numbers = #tpu.dot_dimension_numbers<[1], [0], [0], [1], [0, 0, 1, 1], [], []>} : vector<2x8xf32>, vector<8x4096xf32>, vector<2x4096xf32> -> vector<2x4096xf32>
    %52 = arith.truncf %51 : vector<2x4096xf32> to vector<2x4096xbf16>
    %c0_39 = arith.constant 0 : index
    %c16384_40 = arith.constant 16384 : index
    %53 = vector.load %arg9[%c0_39, %c16384_40] : memref<2x36864xbf16, #tpu.memory_space<vmem>>, vector<2x4096xbf16>
    tpu.vector_store %arg9[%c0_39, %c16384_40], %52 {strides = array<i32>} : memref<2x36864xbf16, #tpu.memory_space<vmem>>, vector<2x4096xbf16>,
    %c0_41 = arith.constant 0 : index
    %c20480 = arith.constant 20480 : index
    %54 = vector.load %arg8[%c0_41, %c20480] : memref<8x36864xf32, #tpu.memory_space<vmem>>, vector<8x4096xf32>
    %cst_42 = arith.constant dense<0.000000e+00> : vector<2x4096xf32>
    %55 = tpu.matmul %33, %54, %cst_42 {dimension_numbers = #tpu.dot_dimension_numbers<[1], [0], [0], [1], [0, 0, 1, 1], [], []>} : vector<2x8xf32>, vector<8x4096xf32>, vector<2x4096xf32> -> vector<2x4096xf32>
    %56 = arith.truncf %55 : vector<2x4096xf32> to vector<2x4096xbf16>
    %c0_43 = arith.constant 0 : index
    %c20480_44 = arith.constant 20480 : index
    %57 = vector.load %arg9[%c0_43, %c20480_44] : memref<2x36864xbf16, #tpu.memory_space<vmem>>, vector<2x4096xbf16>
    tpu.vector_store %arg9[%c0_43, %c20480_44], %56 {strides = array<i32>} : memref<2x36864xbf16, #tpu.memory_space<vmem>>, vector<2x4096xbf16>,
    %c0_45 = arith.constant 0 : index
    %c24576 = arith.constant 24576 : index
    %58 = vector.load %arg8[%c0_45, %c24576] : memref<8x36864xf32, #tpu.memory_space<vmem>>, vector<8x4096xf32>
    %cst_46 = arith.constant dense<0.000000e+00> : vector<2x4096xf32>
    %59 = tpu.matmul %33, %58, %cst_46 {dimension_numbers = #tpu.dot_dimension_numbers<[1], [0], [0], [1], [0, 0, 1, 1], [], []>} : vector<2x8xf32>, vector<8x4096xf32>, vector<2x4096xf32> -> vector<2x4096xf32>
    %60 = arith.truncf %59 : vector<2x4096xf32> to vector<2x4096xbf16>
    %c0_47 = arith.constant 0 : index
    %c24576_48 = arith.constant 24576 : index
    %61 = vector.load %arg9[%c0_47, %c24576_48] : memref<2x36864xbf16, #tpu.memory_space<vmem>>, vector<2x4096xbf16>
    tpu.vector_store %arg9[%c0_47, %c24576_48], %60 {strides = array<i32>} : memref<2x36864xbf16, #tpu.memory_space<vmem>>, vector<2x4096xbf16>,
    %c0_49 = arith.constant 0 : index
    %c28672 = arith.constant 28672 : index
    %62 = vector.load %arg8[%c0_49, %c28672] : memref<8x36864xf32, #tpu.memory_space<vmem>>, vector<8x4096xf32>
    %cst_50 = arith.constant dense<0.000000e+00> : vector<2x4096xf32>
    %63 = tpu.matmul %33, %62, %cst_50 {dimension_numbers = #tpu.dot_dimension_numbers<[1], [0], [0], [1], [0, 0, 1, 1], [], []>} : vector<2x8xf32>, vector<8x4096xf32>, vector<2x4096xf32> -> vector<2x4096xf32>
    %64 = arith.truncf %63 : vector<2x4096xf32> to vector<2x4096xbf16>
    %c0_51 = arith.constant 0 : index
    %c28672_52 = arith.constant 28672 : index
    %65 = vector.load %arg9[%c0_51, %c28672_52] : memref<2x36864xbf16, #tpu.memory_space<vmem>>, vector<2x4096xbf16>
    tpu.vector_store %arg9[%c0_51, %c28672_52], %64 {strides = array<i32>} : memref<2x36864xbf16, #tpu.memory_space<vmem>>, vector<2x4096xbf16>,
    %c0_53 = arith.constant 0 : index
    %c32768 = arith.constant 32768 : index
    %66 = vector.load %arg8[%c0_53, %c32768] : memref<8x36864xf32, #tpu.memory_space<vmem>>, vector<8x4096xf32>
    %cst_54 = arith.constant dense<0.000000e+00> : vector<2x4096xf32>
    %67 = tpu.matmul %33, %66, %cst_54 {dimension_numbers = #tpu.dot_dimension_numbers<[1], [0], [0], [1], [0, 0, 1, 1], [], []>} : vector<2x8xf32>, vector<8x4096xf32>, vector<2x4096xf32> -> vector<2x4096xf32>
    %68 = arith.truncf %67 : vector<2x4096xf32> to vector<2x4096xbf16>
    %c0_55 = arith.constant 0 : index
    %c32768_56 = arith.constant 32768 : index
    %69 = vector.load %arg9[%c0_55, %c32768_56] : memref<2x36864xbf16, #tpu.memory_space<vmem>>, vector<2x4096xbf16>
    tpu.vector_store %arg9[%c0_55, %c32768_56], %68 {strides = array<i32>} : memref<2x36864xbf16, #tpu.memory_space<vmem>>, vector<2x4096xbf16>,
    return
  }
  func.func @transform_0(%arg0: i32) -> (i32, i32) {
    %c0_i32 = arith.constant 0 : i32
    %c0_i32_0 = arith.constant 0 : i32
    %c0_i32_1 = arith.constant 0 : i32
    return %c0_i32, %c0_i32_0 : i32, i32
  }
  func.func @transform_1(%arg0: i32) -> (i32, i32) {
    %c0_i32 = arith.constant 0 : i32
    %c0_i32_0 = arith.constant 0 : i32
    %c0_i32_1 = arith.constant 0 : i32
    return %c0_i32, %c0_i32_0 : i32, i32
  }
  func.func @transform_2(%arg0: i32) -> (i32, i32) {
    %c0_i32 = arith.constant 0 : i32
    %c0_i32_0 = arith.constant 0 : i32
    %c0_i32_1 = arith.constant 0 : i32
    return %c0_i32, %c0_i32_0 : i32, i32
  }
  func.func @transform_3(%arg0: i32) -> (i32, i32) {
    %c0_i32 = arith.constant 0 : i32
    %c0_i32_0 = arith.constant 0 : i32
    %c0_i32_1 = arith.constant 0 : i32
    return %c0_i32, %c0_i32_0 : i32, i32
  }
  func.func @transform_4(%arg0: i32) -> (i32, i32) {
    %c0_i32 = arith.constant 0 : i32
    %c0_i32_0 = arith.constant 0 : i32
    %c0_i32_1 = arith.constant 0 : i32
    return %c0_i32, %c0_i32_0 : i32, i32
  }
  func.func @transform_5(%arg0: i32) -> (i32, i32) {
    %c0_i32 = arith.constant 0 : i32
    %c0_i32_0 = arith.constant 0 : i32
    %c0_i32_1 = arith.constant 0 : i32
    return %c0_i32, %c0_i32_0 : i32, i32
  }
  func.func @transform_6(%arg0: i32) -> (i32, i32) {
    %c0_i32 = arith.constant 0 : i32
    %c0_i32_0 = arith.constant 0 : i32
    %c0_i32_1 = arith.constant 0 : i32
    return %c0_i32, %c0_i32_0 : i32, i32
  }
  func.func @transform_7(%arg0: i32) -> (i32, i32) {
    %c0_i32 = arith.constant 0 : i32
    %c0_i32_0 = arith.constant 0 : i32
    %c0_i32_1 = arith.constant 0 : i32
    return %c0_i32, %c0_i32_0 : i32, i32
  }
  func.func @transform_8(%arg0: i32) -> (i32, i32) {
    %c0_i32 = arith.constant 0 : i32
    %c0_i32_0 = arith.constant 0 : i32
    %c0_i32_1 = arith.constant 0 : i32
    return %c0_i32, %c0_i32_0 : i32, i32
  }
}

</mosaic_0001>

<bundles_post_ra>
// kernel: tpu_custom_call.1
= control target key start
LH: loop header
LB: loop body
LE: loop exit
PB: predicated region body
PF: predicated region fallthrough
CT: control target
= control target key end

     0   :  { %13 = vsyncpa [#allocation3], 0  ;;  %s14674_s0 = inlined_call_operand.hbm [shape: f32[2,32], index: 0, kind: input, shape index: {}]   ;;  %s14675_s1 = inlined_call_operand.vmem [shape: f32[32,2], index: 1, kind: input, shape index: {}]   ;;  %s14676_s2 = inlined_call_operand.hbm [shape: f32[1,2], index: 2, kind: input, shape index: {}]   ;;  %s14677_s3 = inlined_call_operand.hbm [shape: f32[2,32], index: 3, kind: input, shape index: {}]   ;;  %s14678_s4 = inlined_call_operand.hbm [shape: f32[1,32], index: 4, kind: input, shape index: {}]   ;;  %s14679_s5 = inlined_call_operand.vmem [shape: f32[32,8], index: 5, kind: input, shape index: {}]   ;;  %s14680_s6 = inlined_call_operand.hbm [shape: f32[1,8], index: 6, kind: input, shape index: {}]   ;;  %s14681_s7 = inlined_call_operand.hbm [shape: f32[8,36864], index: 7, kind: input, shape index: {}]   ;;  %s14682_s8 = inlined_call_operand.hbm [shape: bf16[2,36864], index: 8, kind: output, shape index: {}]  }
   0x1   :  { %14 = vsyncpa [#allocation6], 0 }
   0x2   :  { %15 = vsyncpa [#allocation9], 0 }
   0x3   :  { %16 = vsyncpa [#allocation12], 0 }
   0x4   :  { %17 = vsyncpa [#allocation4], 0  ;;  %s13849_s27 = smov [#allocation5]   ;;  %s13850_s29 = smov [#allocation8]  }
   0x5   :  { %s36_s28 = sshll.u32 %s13849_s27, 4  ;;  %s56_s30 = sshll.u32 %s13850_s29, 4  ;;  %s37_s28 = int_to_ptr.vmem [resolvable:$true] %s36_s28  ;;  %s57_s30 = int_to_ptr.vmem [resolvable:$true] %s56_s30 }
   0x6   :  { %s13685_s11 = scalar_lea.hbm %s14676_s2, 16 }
   0x7   :  { %p13686_p0 = scmp.ne.s32.totalorder %s14676_s2, %s13685_s11  ;;  %p13689_p1 = scmp.lt.u32.totalorder %s13685_s11, %s14676_s2 }
   0x9   :  { %p13691_p2 = pnand %p13689_p1, %p13686_p0 }
   0xb   :  { %13694 = shalt.err (!%p13691_p2)
}
   0xc   :  { %s13695_s16 = scalar_lea.vmem %s37_s28, 16  ;;  %s13699_s17 = scalar_lea.vmem %s37_s28, 32 }
   0xd   :  { %p13696_p3 = scmp.ne.s32.totalorder %s37_s28, %s13695_s16  ;;  %p13700_p4 = scmp.lt.s32.totalorder %s37_s28, %s37_s28 }
   0xe   :  { %p13701_p5 = scmp.lt.s32.totalorder %s13699_s17, %s13695_s16 }
  0x10   :  { %p13702_p6 = por %p13701_p5, %p13700_p4 }
  0x12   :  { %p13703_p7 = pnand %p13702_p6, %p13696_p3 }
  0x14   :  { %13706 = shalt.err (!%p13703_p7)
}
  0x15   :  { %39 = dma.hbm_to_vmem [thread:$0]  %s14676_s2, 16, %s37_s28, [#allocation6]  }
  0x16   :  { %s13707_s22 = scalar_lea.hbm %s14678_s4, 16 }
  0x17   :  { %p13708_p8 = scmp.ne.s32.totalorder %s14678_s4, %s13707_s22  ;;  %p13711_p9 = scmp.lt.u32.totalorder %s13707_s22, %s14678_s4 }
  0x19   :  { %p13713_p10 = pnand %p13711_p9, %p13708_p8 }
  0x1b   :  { %13716 = shalt.err (!%p13713_p10)
}
  0x1c   :  { %s13717_s27 = scalar_lea.vmem %s57_s30, 16  ;;  %s13721_s29 = scalar_lea.vmem %s57_s30, 32 }
  0x1d   :  { %p13718_p11 = scmp.ne.s32.totalorder %s57_s30, %s13717_s27  ;;  %p13722_p12 = scmp.lt.s32.totalorder %s57_s30, %s57_s30 }
  0x1e   :  { %p13723_p13 = scmp.lt.s32.totalorder %s13721_s29, %s13717_s27 }
  0x20   :  { %p13724_p0 = por %p13723_p13, %p13722_p12 }
  0x22   :  { %p13725_p1 = pnand %p13724_p0, %p13718_p11 }
  0x24   :  { %13728 = shalt.err (!%p13725_p1)
}
  0x25   :  { %59 = dma.hbm_to_vmem [thread:$0]  %s14678_s4, 16, %s57_s30, [#allocation9]  }
  0x26   :  { %s13851_s9 = smov [#allocation2]   ;;  %s13852_s11 = smov [#allocation7]  }
  0x27   :  { %s24_s10 = sshll.u32 %s13851_s9, 4  ;;  %s46_s12 = sshll.u32 %s13852_s11, 4  ;;  %s25_s10 = int_to_ptr.vmem [resolvable:$true] %s24_s10  ;;  %s47_s12 = int_to_ptr.vmem [resolvable:$true] %s46_s12 }
  0x28   :  { %s13729_s15 = scalar_lea.hbm %s14674_s0, 32 }
  0x29   :  { %p13730_p2 = scmp.ne.s32.totalorder %s14674_s0, %s13729_s15  ;;  %p13733_p3 = scmp.lt.u32.totalorder %s13729_s15, %s14674_s0 }
  0x2b   :  { %p13735_p4 = pnand %p13733_p3, %p13730_p2 }
  0x2d   :  { %13738 = shalt.err (!%p13735_p4)
}
  0x2e   :  { %s13739_s4 = scalar_lea.vmem %s25_s10, 32  ;;  %p13744_p6 = scmp.lt.s32.totalorder %s25_s10, %s25_s10 }
  0x2f   :  { %p13740_p5 = scmp.ne.s32.totalorder %s25_s10, %s13739_s4  ;;  %p13745_p7 = scmp.lt.s32.totalorder %s13739_s4, %s13739_s4 }
  0x31   :  { %p13746_p8 = por %p13745_p7, %p13744_p6 }
  0x33   :  { %p13747_p9 = pnand %p13746_p8, %p13740_p5 }
  0x35   :  { %13750 = shalt.err (!%p13747_p9)
}
  0x36   :  { %27 = dma.hbm_to_vmem [thread:$0]  %s14674_s0, 32, %s25_s10, [#allocation3]  }
  0x37   :  { %s13751_s23 = scalar_lea.hbm %s14677_s3, 32 }
  0x38   :  { %p13752_p10 = scmp.ne.s32.totalorder %s14677_s3, %s13751_s23  ;;  %p13755_p11 = scmp.lt.u32.totalorder %s13751_s23, %s14677_s3 }
  0x3a   :  { %p13757_p12 = pnand %p13755_p11, %p13752_p10 }
  0x3c   :  { %13760 = shalt.err (!%p13757_p12)
}
  0x3d   :  { %s13761_s29 = scalar_lea.vmem %s47_s12, 32  ;;  %p13766_p0 = scmp.lt.s32.totalorder %s47_s12, %s47_s12 }
  0x3e   :  { %p13762_p13 = scmp.ne.s32.totalorder %s47_s12, %s13761_s29  ;;  %p13767_p1 = scmp.lt.s32.totalorder %s13761_s29, %s13761_s29 }
  0x40   :  { %p13768_p2 = por %p13767_p1, %p13766_p0 }
  0x42   :  { %p13769_p3 = pnand %p13768_p2, %p13762_p13 }
  0x44   :  { %13772 = shalt.err (!%p13769_p3)
}
  0x45   :  { %49 = dma.hbm_to_vmem [thread:$0]  %s14677_s3, 32, %s47_s12, [#allocation6]  }
  0x46   :  { %s13853_s28 = smov [#allocation10]   ;;  %s13854_s10 = smov [#allocation11]  }
  0x47   :  { %s68_s9 = sshll.u32 %s13853_s28, 4  ;;  %s78_s11 = sshll.u32 %s13854_s10, 4  ;;  %s69_s9 = int_to_ptr.vmem [resolvable:$true] %s68_s9  ;;  %s79_s11 = int_to_ptr.vmem [resolvable:$true] %s78_s11 }
  0x48   :  { %s13773_s15 = scalar_lea.hbm %s14680_s6, 16 }
  0x49   :  { %p13774_p4 = scmp.ne.s32.totalorder %s14680_s6, %s13773_s15  ;;  %p13777_p5 = scmp.lt.u32.totalorder %s13773_s15, %s14680_s6 }
  0x4b   :  { %p13779_p6 = pnand %p13777_p5, %p13774_p4 }
  0x4d   :  { %13782 = shalt.err (!%p13779_p6)
}
  0x4e   :  { %s13783_s3 = scalar_lea.vmem %s69_s9, 16  ;;  %s13787_s12 = scalar_lea.vmem %s69_s9, 32 }
  0x4f   :  { %p13784_p7 = scmp.ne.s32.totalorder %s69_s9, %s13783_s3  ;;  %p13788_p8 = scmp.lt.s32.totalorder %s69_s9, %s69_s9 }
  0x50   :  { %p13789_p9 = scmp.lt.s32.totalorder %s13787_s12, %s13783_s3 }
  0x52   :  { %p13790_p10 = por %p13789_p9, %p13788_p8 }
  0x54   :  { %p13791_p11 = pnand %p13790_p10, %p13784_p7 }
  0x56   :  { %13794 = shalt.err (!%p13791_p11)
}
  0x57   :  { %71 = dma.hbm_to_vmem [thread:$0]  %s14680_s6, 16, %s69_s9, [#allocation9]  }
  0x58   :  { %s13795_s22 = scalar_lea.hbm %s14681_s7, 36864 }
  0x59   :  { %p13796_p12 = scmp.ne.s32.totalorder %s14681_s7, %s13795_s22  ;;  %p13799_p13 = scmp.lt.u32.totalorder %s13795_s22, %s14681_s7 }
  0x5b   :  { %p13801_p0 = pnand %p13799_p13, %p13796_p12 }
  0x5d   :  { %13804 = shalt.err (!%p13801_p0)
}
  0x5e   :  { %s13805_s27 = scalar_lea.vmem %s79_s11, 36864  ;;  %p13810_p2 = scmp.lt.s32.totalorder %s79_s11, %s79_s11 }
  0x5f   :  { %p13806_p1 = scmp.ne.s32.totalorder %s79_s11, %s13805_s27  ;;  %p13811_p3 = scmp.lt.s32.totalorder %s13805_s27, %s13805_s27 }
  0x61   :  { %p13812_p4 = por %p13811_p3, %p13810_p2 }
  0x63   :  { %p13813_p5 = pnand %p13812_p4, %p13806_p1 }
  0x65   :  { %13816 = shalt.err (!%p13813_p5)
}
  0x66   :  { %81 = dma.hbm_to_vmem [thread:$0]  %s14681_s7, 36864, %s79_s11, [#allocation12]  }
  0x67   :  { %13839 = dma.done.wait [#allocation3], 32  }
  0x68   :  { %13840 = vsyncadd [#allocation3], 4294967264 }
  0x69   :  { %13841 = dma.done.wait [#allocation6], 48  }
  0x6a   :  { %13842 = vsyncadd [#allocation6], 4294967248 }
  0x6b   :  { %13843 = dma.done.wait [#allocation9], 32  }
  0x6c   :  { %13844 = vsyncadd [#allocation9], 4294967264 }
  0x6d   :  { %13845 = dma.done.wait [#allocation12], 36864  }
  0x6e   :  { %13846 = vsyncadd [#allocation12], 4294930432  ;;  %v13855_v0 = vmov 0.0|0.0   ;;  %vm13856_vm0 = vmmov 0   ;;  %v13857_v1 = vmov 0.0   ;;  %v101_v2 = vld [vmem:[%s14675_s1] sm:$0xff] }
  0x6f   :  { %13654 = vmatprep.subr.bf16.mxu0 %v13855_v0  ;;  %13635 = vmatprep.mubr.msk.f32.mxu0 %vm13856_vm0, %v13857_v1  ;;  %v102_v3 = vld [vmem:[%s14675_s1 + $0x8] sm:$0xff]  ;;  %v103_v4 = vld [vmem:[%s14675_s1 + $0x10] sm:$0xff]  ;;  %v104_v6 = vld [vmem:[%s14675_s1 + $0x18] sm:$0xff]  ;;  %vm112_vm1 = vcmask 261120   ;;  %vm199_vm2 = vcmask 1041408   ;;  %vm195_vm3 = vcmask 15360  }
  0x70   :  { %13638 = vmatprep.subr.mxu1 %v13857_v1  ;;  %13640 = vmatprep.mubr.msk.f32.mxu1 %vm13856_vm0, %v13857_v1  ;;  %v13655_v5 = vpack.c.bf16 %v102_v3, %v101_v2  ;;  %v13658_v7 = vpack.c.bf16 %v104_v6, %v103_v4  ;;  %v100_v8 = vld [vmem:[#allocation2] sm:$0x3]  ;;  %v187_v9 = vld [vmem:[#allocation7] sm:$0x3]  ;;  %v13320_v10 = vld [vmem:[#allocation5] ss:$0 sm:$0xff] }
  0x71   :  { %13639 = vmatpush3.msk.msra.mxu1 %vm199_vm2, %v187_v9  ;;  %v278_v15 = vld [vmem:[%s14679_s5] sm:$0xff]  ;;  %v279_v16 = vld [vmem:[%s14679_s5 + $0x8] sm:$0xff]  ;;  %v280_v17 = vld [vmem:[%s14679_s5 + $0x10] sm:$0xff]  ;;  %vm362_vm4 = vcmask 58368   ;;  %vm406_vm5 = vcmask 64512  }
  0x72   :  { %13656 = vmatpush3.bf16.msra.mxu0 %v13655_v5  ;;  %13660 = vmatprep.subr.bf16.mxu1 %v13855_v0  ;;  %v13661_v18 = vpack.c.bf16 %v279_v16, %v278_v15  ;;  %v281_v19 = vld [vmem:[%s14679_s5 + $0x18] sm:$0xff]  ;;  %v13322_v21 = vld [vmem:[#allocation8] ss:$0 sm:$0xff]  ;;  %v13325_v30 = vld [vmem:[#allocation10] ss:$0 sm:$0xff]  ;;  %s13859_s5 = smov [#allocation13]  }
  0x73   :  { %13657 = vmatprep.subr.bf16.mxu0 %v13855_v0  ;;  %v13664_v20 = vpack.c.bf16 %v281_v19, %v280_v17  ;;  %v375_v40 = vld [vmem:[#allocation11 + $0x8] sm:$0xff]  ;;  %v377_v41 = vld [vmem:[#allocation11 + $0x18] sm:$0xff]  ;;  %v374_v42 = vld [vmem:[#allocation11] sm:$0xff]  ;;  %s13308_s12 = sshll.u32 %s13859_s5, 4  ;;  %s13309_s12 = int_to_ptr.vmem [resolvable:$true] %s13308_s12 }
  0x74   :  { %v376_v43 = vld [vmem:[#allocation11 + $0x10] sm:$0xff]  ;;  %v379_v44 = vld [vmem:[#allocation11 + $0x28] sm:$0xff]  ;;  %v381_v45 = vld [vmem:[#allocation11 + $0x38] sm:$0xff]  ;;  %s13817_s4 = scalar_lea.vmem %s13309_s12, 4608  ;;  %p13822_p7 = scmp.lt.s32.totalorder %s13309_s12, %s13309_s12 }
  0x75   :  { %v378_v49 = vld [vmem:[#allocation11 + $0x20] sm:$0xff]  ;;  %v380_v50 = vld [vmem:[#allocation11 + $0x30] sm:$0xff]  ;;  %v383_v51 = vld [vmem:[#allocation11 + $0x48] sm:$0xff]  ;;  %p13818_p6 = scmp.ne.s32.totalorder %s13309_s12, %s13817_s4  ;;  %p13823_p8 = scmp.lt.s32.totalorder %s13817_s4, %s13817_s4 }
  0x76   :  { %13659 = vmatpush3.bf16.msra.mxu0 %v13658_v7  ;;  %v385_v52 = vld [vmem:[#allocation11 + $0x58] sm:$0xff]  ;;  %v382_v53 = vld [vmem:[#allocation11 + $0x40] sm:$0xff]  ;;  %v384_v54 = vld [vmem:[#allocation11 + $0x50] sm:$0xff] }
  0x77   :  { %410 = vmatprep.subr.mxu0 %v375_v40  ;;  %v387_v55 = vld [vmem:[#allocation11 + $0x68] sm:$0xff]  ;;  %v389_v56 = vld [vmem:[#allocation11 + $0x78] sm:$0xff]  ;;  %v386_v57 = vld [vmem:[#allocation11 + $0x60] sm:$0xff]  ;;  %p13824_p9 = por %p13823_p8, %p13822_p7 }
  0x78   :  { %v388_v58 = vld [vmem:[#allocation11 + $0x70] sm:$0xff]  ;;  %v391_v59 = vld [vmem:[#allocation11 + $0x88] sm:$0xff]  ;;  %v393_v60 = vld [vmem:[#allocation11 + $0x98] sm:$0xff] }
  0x79   :  { %13636 = vmatmul.mubr.msk.f32.vlgmr.msra.gmra.mrb[0].mxu0 %vm112_vm1, %v100_v8  ;;  %v390_v61 = vld [vmem:[#allocation11 + $0x80] sm:$0xff]  ;;  %v392_v62 = vld [vmem:[#allocation11 + $0x90] sm:$0xff]  ;;  %v395_v63 = vld [vmem:[#allocation11 + $0xa8] sm:$0xff]  ;;  %p13825_p10 = pnand %p13824_p9, %p13818_p6 }
  0x7a   :  { %474 = vmatprep.mubr.f32.mxu0 %v13857_v1  ;;  %411 = vmatpush1.msra.mxu0 %v374_v42  ;;  %v394_v2 = vld [vmem:[#allocation11 + $0xa0] sm:$0xff]  ;;  %v396_v3 = vld [vmem:[#allocation11 + $0xb0] sm:$0xff]  ;;  %v399_v4 = vld [vmem:[#allocation11 + $0xc8] sm:$0xff] }
  0x7b   :  { %552 = vmatprep.subr.mxu0 %v379_v44  ;;  %v401_v5 = vld [vmem:[#allocation11 + $0xd8] sm:$0xff]  ;;  %v398_v6 = vld [vmem:[#allocation11 + $0xc0] sm:$0xff]  ;;  %v400_v7 = vld [vmem:[#allocation11 + $0xd0] sm:$0xff] }
  0x7c   :  { %v403_v8 = vld [vmem:[#allocation11 + $0xe8] sm:$0xff]  ;;  %v405_v9 = vld [vmem:[#allocation11 + $0xf8] sm:$0xff]  ;;  %v1816_v15 = vld [vmem:[#allocation11 + $0x110] sm:$0xff] }
  0x7d   :  { %v1819_v16 = vld [vmem:[#allocation11 + $0x128] sm:$0xff]  ;;  %v1821_v17 = vld [vmem:[#allocation11 + $0x138] sm:$0xff]  ;;  %v1820_v19 = vld [vmem:[#allocation11 + $0x130] sm:$0xff] }
  0x7e   :  { %v1843_v40 = vld [vmem:[#allocation11 + $0x1e8] sm:$0xff]  ;;  %v1842_v42 = vld [vmem:[#allocation11 + $0x1e0] sm:$0xff] }
  0x7f   :  { %v3251_v44 = vld [vmem:[#allocation11 + $0x208] sm:$0xff] }
 0x14c   :  { %v182_v11 = vpop.f32.mrb[0].mxu0 }
 0x14d   :  { %v183_v12 = vadd.f32 %v13320_v10, %v182_v11  ;;  %v13637_v13 = vpop.f32.mrb[1].mxu0  ;;  %v402_v10 = vld [vmem:[#allocation11 + $0xe0] sm:$0xff]  ;;  %v404_v11 = vld [vmem:[#allocation11 + $0xf0] sm:$0xff] }
 0x14e   :  { %v1817_v13 = vld [vmem:[#allocation11 + $0x118] sm:$0xff] }
 0x14f   :  { %v186_v14 = vmax.f32 %v183_v12, 0.0  ;;  %v1815_v12 = vld [vmem:[#allocation11 + $0x108] sm:$0xff] }
 0x151   :  { %13641 = vmatmul.mubr.msk.f32.vlgmr.msra.gmra.mrb[0].mxu1 %vm195_vm3, %v186_v14  ;;  %v1814_v14 = vld [vmem:[#allocation11 + $0x100] sm:$0xff] }
 0x152   :  { %13651 = vmatprep.mubr.msk.f32.mxu1 %vm13856_vm0, %v13857_v1  ;;  %13662 = vmatpush3.bf16.msra.mxu1 %v13661_v18  ;;  %v1818_v18 = vld [vmem:[#allocation11 + $0x120] sm:$0xff] }
 0x153   :  { %13663 = vmatprep.subr.bf16.mxu1 %v13855_v0  ;;  %v397_v0 = vld [vmem:[#allocation11 + $0xb8] sm:$0xff] }
 0x156   :  { %13665 = vmatpush3.bf16.msra.mxu1 %v13664_v20  ;;  %v1823_v20 = vld [vmem:[#allocation11 + $0x148] sm:$0xff] }
 0x157   :  { %481 = vmatprep.subr.mxu1 %v377_v41  ;;  %v1845_v41 = vld [vmem:[#allocation11 + $0x1f8] sm:$0xff] }
 0x224   :  { %v269_v22 = vpop.f32.mrb[0].mxu1 }
 0x225   :  { %v270_v23 = vadd.f32 %v13322_v21, %v269_v22  ;;  %v13642_v24 = vpop.f32.mrb[1].mxu1  ;;  %v1825_v21 = vld [vmem:[#allocation11 + $0x158] sm:$0xff]  ;;  %v1822_v22 = vld [vmem:[#allocation11 + $0x140] sm:$0xff] }
 0x226   :  { %v1827_v24 = vld [vmem:[#allocation11 + $0x168] sm:$0xff] }
 0x227   :  { %v273_v25 = vsub.f32 0.0, %v270_v23  ;;  %v1824_v23 = vld [vmem:[#allocation11 + $0x150] sm:$0xff] }
 0x229   :  { %v274_v26 = vmul.f32 1.442695, %v273_v25  ;;  %v1829_v25 = vld [vmem:[#allocation11 + $0x178] sm:$0xff] }
 0x22b   :  { %13677 = vpow2.f32 %v274_v26  ;;  %v1826_v26 = vld [vmem:[#allocation11 + $0x160] sm:$0xff] }
 0x235   :  { %v13678_v27 = vpop.eup %13677 }
 0x236   :  { %v276_v28 = vadd.f32 1.0, %v13678_v27  ;;  %v1828_v27 = vld [vmem:[#allocation11 + $0x170] sm:$0xff] }
 0x238   :  { %13679 = vrcp.f32 %v276_v28  ;;  %v1831_v28 = vld [vmem:[#allocation11 + $0x188] sm:$0xff] }
 0x242   :  { %v13680_v29 = vpop.eup %13679 }
 0x243   :  { %13652 = vmatmul.mubr.msk.f32.vlgmr.msra.gmra.mrb[2].mxu1 %vm112_vm1, %v13680_v29  ;;  %v1833_v29 = vld [vmem:[#allocation11 + $0x198] sm:$0xff] }
 0x244   :  { %545 = vmatprep.mubr.f32.mxu1 %v13857_v1  ;;  %482 = vmatpush1.msra.mxu1 %v376_v43  ;;  %v1844_v43 = vld [vmem:[#allocation11 + $0x1f0] sm:$0xff] }
 0x245   :  { %623 = vmatprep.subr.mxu1 %v381_v45  ;;  %v3253_v45 = vld [vmem:[#allocation11 + $0x218] sm:$0xff] }
 0x316   :  { %v358_v31 = vpop.f32.mrb[2].mxu1 }
 0x317   :  { %v359_v32 = vadd.f32 %v13325_v30, %v358_v31  ;;  %v13653_v33 = vpop.f32.mrb[3].mxu1  ;;  %v1830_v30 = vld [vmem:[#allocation11 + $0x180] sm:$0xff]  ;;  %v1832_v31 = vld [vmem:[#allocation11 + $0x190] sm:$0xff] }
 0x318   :  { %v1837_v33 = vld [vmem:[#allocation11 + $0x1b8] sm:$0xff] }
 0x319   :  { %v363_v34 = vsel %vm362_vm4, %v359_v32, -inf }
 0x31a   :  { %364 = vmax.xlane.f32.xlu0 %v363_v34  ;;  %v1834_v34 = vld [vmem:[#allocation11 + $0x1a0] sm:$0xff] }
 0x3a7   :  { %v365_v35 = vpop.xlane.xlu0 %364 }
 0x3a8   :  { %v366_v36 = vsub.f32 %v359_v32, %v365_v35  ;;  %v1835_v32 = vld [vmem:[#allocation11 + $0x1a8] sm:$0xff]  ;;  %v1836_v35 = vld [vmem:[#allocation11 + $0x1b0] sm:$0xff] }
 0x3aa   :  { %v367_v37 = vmul.f32 1.442695, %v366_v36  ;;  %v1839_v36 = vld [vmem:[#allocation11 + $0x1c8] sm:$0xff] }
 0x3ac   :  { %13681 = vpow2.f32 %v367_v37  ;;  %v1841_v37 = vld [vmem:[#allocation11 + $0x1d8] sm:$0xff] }
 0x3b6   :  { %v13682_v38 = vpop.eup %13681 }
 0x3b7   :  { %v369_v39 = vsel %vm362_vm4, %v13682_v38, 0.0 }
 0x3b8   :  { %370 = vadd.xlane.f32.xlu0 %v369_v39  ;;  %v1840_v39 = vld [vmem:[#allocation11 + $0x1d0] sm:$0xff] }
 0x445   :  { %v371_v46 = vpop.xlane.xlu0 %370 }
 0x446   :  { %13683 = vrcp.f32 %v371_v46  ;;  %v3250_v46 = vld [vmem:[#allocation11 + $0x200] sm:$0xff] }
 0x450   :  { %v13684_v47 = vpop.eup %13683 }
 0x451   :  { %v14012_v48 = vmul.f32 %v13684_v47, %v13682_v38  ;;  %v1838_v38 = vld [vmem:[#allocation11 + $0x1c0] sm:$0xff]  ;;  %v3252_v47 = vld [vmem:[#allocation11 + $0x210] sm:$0xff] }
 0x453   :  { %13327 = vmatmul.mubr.msk.f32.vlgmr.msra.gmra.mrb[2].mxu0 %vm406_vm5, %v14012_v48  ;;  %13328 = vmatmul.mubr.msk.f32.vlgmr.msra.gmra.mrb[4].mxu1 %vm406_vm5, %v14012_v48 }
 0x454   :  { %553 = vmatpush1.msra.mxu0 %v378_v49  ;;  %624 = vmatpush1.msra.mxu1 %v380_v50  ;;  %v3255_v49 = vld [vmem:[#allocation11 + $0x228] sm:$0xff]  ;;  %v3257_v50 = vld [vmem:[#allocation11 + $0x238] sm:$0xff] }
 0x455   :  { %616 = vmatprep.mubr.f32.mxu0 %v13857_v1  ;;  %687 = vmatprep.mubr.f32.mxu1 %v13857_v1 }
 0x456   :  { %694 = vmatprep.subr.mxu0 %v383_v51  ;;  %765 = vmatprep.subr.mxu1 %v385_v52  ;;  %v3254_v51 = vld [vmem:[#allocation11 + $0x220] sm:$0xff]  ;;  %v3256_v52 = vld [vmem:[#allocation11 + $0x230] sm:$0xff] }
 0x457   :  { %13329 = vmatmul.mubr.msk.f32.vlgmr.msra.gmra.mrb[4].mxu0 %vm406_vm5, %v14012_v48  ;;  %13330 = vmatmul.mubr.msk.f32.vlgmr.msra.gmra.mrb[6].mxu1 %vm406_vm5, %v14012_v48 }
 0x458   :  { %695 = vmatpush1.msra.mxu0 %v382_v53  ;;  %766 = vmatpush1.msra.mxu1 %v384_v54  ;;  %v3259_v53 = vld [vmem:[#allocation11 + $0x248] sm:$0xff]  ;;  %v3261_v54 = vld [vmem:[#allocation11 + $0x258] sm:$0xff] }
 0x459   :  { %758 = vmatprep.mubr.f32.mxu0 %v13857_v1  ;;  %829 = vmatprep.mubr.f32.mxu1 %v13857_v1 }
 0x45a   :  { %836 = vmatprep.subr.mxu0 %v387_v55  ;;  %907 = vmatprep.subr.mxu1 %v389_v56  ;;  %v3258_v55 = vld [vmem:[#allocation11 + $0x240] sm:$0xff]  ;;  %v3260_v56 = vld [vmem:[#allocation11 + $0x250] sm:$0xff] }
 0x45b   :  { %13331 = vmatmul.mubr.msk.f32.vlgmr.msra.gmra.mrb[6].mxu0 %vm406_vm5, %v14012_v48  ;;  %13332 = vmatmul.mubr.msk.f32.vlgmr.msra.gmra.mrb[8].mxu1 %vm406_vm5, %v14012_v48 }
 0x45c   :  { %837 = vmatpush1.msra.mxu0 %v386_v57  ;;  %908 = vmatpush1.msra.mxu1 %v388_v58  ;;  %v3263_v57 = vld [vmem:[#allocation11 + $0x268] sm:$0xff]  ;;  %v3265_v58 = vld [vmem:[#allocation11 + $0x278] sm:$0xff] }
 0x45d   :  { %900 = vmatprep.mubr.f32.mxu0 %v13857_v1  ;;  %971 = vmatprep.mubr.f32.mxu1 %v13857_v1 }
 0x45e   :  { %978 = vmatprep.subr.mxu0 %v391_v59  ;;  %1049 = vmatprep.subr.mxu1 %v393_v60  ;;  %v3262_v59 = vld [vmem:[#allocation11 + $0x260] sm:$0xff]  ;;  %v3264_v60 = vld [vmem:[#allocation11 + $0x270] sm:$0xff] }
 0x45f   :  { %13333 = vmatmul.mubr.msk.f32.vlgmr.msra.gmra.mrb[8].mxu0 %vm406_vm5, %v14012_v48  ;;  %13334 = vmatmul.mubr.msk.f32.vlgmr.msra.gmra.mrb[10].mxu1 %vm406_vm5, %v14012_v48 }
 0x460   :  { %979 = vmatpush1.msra.mxu0 %v390_v61  ;;  %1050 = vmatpush1.msra.mxu1 %v392_v62  ;;  %v3267_v61 = vld [vmem:[#allocation11 + $0x288] sm:$0xff]  ;;  %v3269_v62 = vld [vmem:[#allocation11 + $0x298] sm:$0xff] }
 0x461   :  { %1042 = vmatprep.mubr.f32.mxu0 %v13857_v1  ;;  %1113 = vmatprep.mubr.f32.mxu1 %v13857_v1 }
 0x462   :  { %1120 = vmatprep.subr.mxu0 %v395_v63  ;;  %1191 = vmatprep.subr.mxu1 %v397_v0  ;;  %v3266_v63 = vld [vmem:[#allocation11 + $0x280] sm:$0xff]  ;;  %v3268_v0 = vld [vmem:[#allocation11 + $0x290] sm:$0xff] }
 0x463   :  { %13335 = vmatmul.mubr.msk.f32.vlgmr.msra.gmra.mrb[10].mxu0 %vm406_vm5, %v14012_v48  ;;  %13336 = vmatmul.mubr.msk.f32.vlgmr.msra.gmra.mrb[12].mxu1 %vm406_vm5, %v14012_v48 }
 0x464   :  { %1121 = vmatpush1.msra.mxu0 %v394_v2  ;;  %1192 = vmatpush1.msra.mxu1 %v396_v3  ;;  %v3271_v2 = vld [vmem:[#allocation11 + $0x2a8] sm:$0xff]  ;;  %v3273_v3 = vld [vmem:[#allocation11 + $0x2b8] sm:$0xff] }
 0x465   :  { %1184 = vmatprep.mubr.f32.mxu0 %v13857_v1  ;;  %1255 = vmatprep.mubr.f32.mxu1 %v13857_v1 }
 0x466   :  { %1262 = vmatprep.subr.mxu0 %v399_v4  ;;  %1333 = vmatprep.subr.mxu1 %v401_v5  ;;  %v3270_v4 = vld [vmem:[#allocation11 + $0x2a0] sm:$0xff]  ;;  %v3272_v5 = vld [vmem:[#allocation11 + $0x2b0] sm:$0xff] }
 0x467   :  { %13337 = vmatmul.mubr.msk.f32.vlgmr.msra.gmra.mrb[12].mxu0 %vm406_vm5, %v14012_v48  ;;  %13338 = vmatmul.mubr.msk.f32.vlgmr.msra.gmra.mrb[14].mxu1 %vm406_vm5, %v14012_v48 }
 0x468   :  { %1263 = vmatpush1.msra.mxu0 %v398_v6  ;;  %1334 = vmatpush1.msra.mxu1 %v400_v7  ;;  %v3275_v6 = vld [vmem:[#allocation11 + $0x2c8] sm:$0xff]  ;;  %v3277_v7 = vld [vmem:[#allocation11 + $0x2d8] sm:$0xff] }
 0x469   :  { %1326 = vmatprep.mubr.f32.mxu0 %v13857_v1  ;;  %1397 = vmatprep.mubr.f32.mxu1 %v13857_v1 }
 0x46a   :  { %1404 = vmatprep.subr.mxu0 %v403_v8  ;;  %1475 = vmatprep.subr.mxu1 %v405_v9  ;;  %v3274_v8 = vld [vmem:[#allocation11 + $0x2c0] sm:$0xff]  ;;  %v3276_v9 = vld [vmem:[#allocation11 + $0x2d0] sm:$0xff] }
 0x46b   :  { %13339 = vmatmul.mubr.msk.f32.vlgmr.msra.gmra.mrb[14].mxu0 %vm406_vm5, %v14012_v48  ;;  %13340 = vmatmul.mubr.msk.f32.vlgmr.msra.gmra.mrb[16].mxu1 %vm406_vm5, %v14012_v48 }
 0x46c   :  { %1405 = vmatpush1.msra.mxu0 %v402_v10  ;;  %1476 = vmatpush1.msra.mxu1 %v404_v11  ;;  %v3279_v10 = vld [vmem:[#allocation11 + $0x2e8] sm:$0xff]  ;;  %v3281_v11 = vld [vmem:[#allocation11 + $0x2f8] sm:$0xff] }
 0x46d   :  { %1468 = vmatprep.mubr.f32.mxu0 %v13857_v1  ;;  %1539 = vmatprep.mubr.f32.mxu1 %v13857_v1 }
 0x46e   :  { %1846 = vmatprep.subr.mxu0 %v1815_v12  ;;  %1917 = vmatprep.subr.mxu1 %v1817_v13  ;;  %v3278_v12 = vld [vmem:[#allocation11 + $0x2e0] sm:$0xff]  ;;  %v3280_v13 = vld [vmem:[#allocation11 + $0x2f0] sm:$0xff] }
 0x46f   :  { %13341 = vmatmul.mubr.msk.f32.vlgmr.msra.gmra.mrb[16].mxu0 %vm406_vm5, %v14012_v48  ;;  %13342 = vmatmul.mubr.msk.f32.vlgmr.msra.gmra.mrb[18].mxu1 %vm406_vm5, %v14012_v48 }
 0x470   :  { %1847 = vmatpush1.msra.mxu0 %v1814_v14  ;;  %1918 = vmatpush1.msra.mxu1 %v1816_v15  ;;  %v4687_v14 = vld [vmem:[#allocation11 + $0x308] sm:$0xff]  ;;  %v4689_v15 = vld [vmem:[#allocation11 + $0x318] sm:$0xff] }
 0x471   :  { %1910 = vmatprep.mubr.f32.mxu0 %v13857_v1  ;;  %1981 = vmatprep.mubr.f32.mxu1 %v13857_v1 }
 0x472   :  { %1988 = vmatprep.subr.mxu0 %v1819_v16  ;;  %2059 = vmatprep.subr.mxu1 %v1821_v17  ;;  %v4686_v16 = vld [vmem:[#allocation11 + $0x300] sm:$0xff]  ;;  %v4688_v17 = vld [vmem:[#allocation11 + $0x310] sm:$0xff] }
 0x473   :  { %13359 = vmatmul.mubr.msk.f32.vlgmr.msra.gmra.mrb[18].mxu0 %vm406_vm5, %v14012_v48  ;;  %13360 = vmatmul.mubr.msk.f32.vlgmr.msra.gmra.mrb[20].mxu1 %vm406_vm5, %v14012_v48 }
 0x474   :  { %1989 = vmatpush1.msra.mxu0 %v1818_v18  ;;  %2060 = vmatpush1.msra.mxu1 %v1820_v19  ;;  %v4691_v18 = vld [vmem:[#allocation11 + $0x328] sm:$0xff]  ;;  %v4693_v19 = vld [vmem:[#allocation11 + $0x338] sm:$0xff] }
 0x475   :  { %2052 = vmatprep.mubr.f32.mxu0 %v13857_v1  ;;  %2123 = vmatprep.mubr.f32.mxu1 %v13857_v1 }
 0x476   :  { %2130 = vmatprep.subr.mxu0 %v1823_v20  ;;  %2201 = vmatprep.subr.mxu1 %v1825_v21  ;;  %v4690_v20 = vld [vmem:[#allocation11 + $0x320] sm:$0xff]  ;;  %v4692_v21 = vld [vmem:[#allocation11 + $0x330] sm:$0xff] }
 0x477   :  { %13361 = vmatmul.mubr.msk.f32.vlgmr.msra.gmra.mrb[20].mxu0 %vm406_vm5, %v14012_v48  ;;  %13362 = vmatmul.mubr.msk.f32.vlgmr.msra.gmra.mrb[22].mxu1 %vm406_vm5, %v14012_v48 }
 0x478   :  { %2131 = vmatpush1.msra.mxu0 %v1822_v22  ;;  %2202 = vmatpush1.msra.mxu1 %v1824_v23  ;;  %v4695_v22 = vld [vmem:[#allocation11 + $0x348] sm:$0xff]  ;;  %v4697_v23 = vld [vmem:[#allocation11 + $0x358] sm:$0xff] }
 0x479   :  { %2194 = vmatprep.mubr.f32.mxu0 %v13857_v1  ;;  %2265 = vmatprep.mubr.f32.mxu1 %v13857_v1 }
 0x47a   :  { %2272 = vmatprep.subr.mxu0 %v1827_v24  ;;  %2343 = vmatprep.subr.mxu1 %v1829_v25  ;;  %v4694_v24 = vld [vmem:[#allocation11 + $0x340] sm:$0xff]  ;;  %v4696_v25 = vld [vmem:[#allocation11 + $0x350] sm:$0xff] }
 0x47b   :  { %13363 = vmatmul.mubr.msk.f32.vlgmr.msra.gmra.mrb[22].mxu0 %vm406_vm5, %v14012_v48  ;;  %13364 = vmatmul.mubr.msk.f32.vlgmr.msra.gmra.mrb[24].mxu1 %vm406_vm5, %v14012_v48 }
 0x47c   :  { %2273 = vmatpush1.msra.mxu0 %v1826_v26  ;;  %2344 = vmatpush1.msra.mxu1 %v1828_v27  ;;  %v4699_v26 = vld [vmem:[#allocation11 + $0x368] sm:$0xff]  ;;  %v4701_v27 = vld [vmem:[#allocation11 + $0x378] sm:$0xff] }
 0x47d   :  { %2336 = vmatprep.mubr.f32.mxu0 %v13857_v1  ;;  %2407 = vmatprep.mubr.f32.mxu1 %v13857_v1 }
 0x47e   :  { %2414 = vmatprep.subr.mxu0 %v1831_v28  ;;  %2485 = vmatprep.subr.mxu1 %v1833_v29  ;;  %v4698_v28 = vld [vmem:[#allocation11 + $0x360] sm:$0xff]  ;;  %v4700_v29 = vld [vmem:[#allocation11 + $0x370] sm:$0xff] }
 0x47f   :  { %13365 = vmatmul.mubr.msk.f32.vlgmr.msra.gmra.mrb[24].mxu0 %vm406_vm5, %v14012_v48  ;;  %13366 = vmatmul.mubr.msk.f32.vlgmr.msra.gmra.mrb[26].mxu1 %vm406_vm5, %v14012_v48 }
 0x480   :  { %2415 = vmatpush1.msra.mxu0 %v1830_v30  ;;  %2486 = vmatpush1.msra.mxu1 %v1832_v31  ;;  %v4703_v30 = vld [vmem:[#allocation11 + $0x388] sm:$0xff]  ;;  %v4705_v31 = vld [vmem:[#allocation11 + $0x398] sm:$0xff] }
 0x481   :  { %2478 = vmatprep.mubr.f32.mxu0 %v13857_v1  ;;  %2549 = vmatprep.mubr.f32.mxu1 %v13857_v1 }
 0x482   :  { %2556 = vmatprep.subr.mxu0 %v1835_v32  ;;  %2627 = vmatprep.subr.mxu1 %v1837_v33  ;;  %v4702_v32 = vld [vmem:[#allocation11 + $0x380] sm:$0xff]  ;;  %v4704_v33 = vld [vmem:[#allocation11 + $0x390] sm:$0xff] }
 0x483   :  { %13367 = vmatmul.mubr.msk.f32.vlgmr.msra.gmra.mrb[26].mxu0 %vm406_vm5, %v14012_v48  ;;  %13368 = vmatmul.mubr.msk.f32.vlgmr.msra.gmra.mrb[28].mxu1 %vm406_vm5, %v14012_v48 }
 0x484   :  { %2557 = vmatpush1.msra.mxu0 %v1834_v34  ;;  %2628 = vmatpush1.msra.mxu1 %v1836_v35  ;;  %v4707_v34 = vld [vmem:[#allocation11 + $0x3a8] sm:$0xff]  ;;  %v4709_v35 = vld [vmem:[#allocation11 + $0x3b8] sm:$0xff] }
 0x485   :  { %2620 = vmatprep.mubr.f32.mxu0 %v13857_v1  ;;  %2691 = vmatprep.mubr.f32.mxu1 %v13857_v1 }
 0x486   :  { %2698 = vmatprep.subr.mxu0 %v1839_v36  ;;  %2769 = vmatprep.subr.mxu1 %v1841_v37  ;;  %v4706_v36 = vld [vmem:[#allocation11 + $0x3a0] sm:$0xff]  ;;  %v4708_v37 = vld [vmem:[#allocation11 + $0x3b0] sm:$0xff] }
 0x487   :  { %13369 = vmatmul.mubr.msk.f32.vlgmr.msra.gmra.mrb[28].mxu0 %vm406_vm5, %v14012_v48  ;;  %13370 = vmatmul.mubr.msk.f32.vlgmr.msra.gmra.mrb[30].mxu1 %vm406_vm5, %v14012_v48 }
 0x488   :  { %2699 = vmatpush1.msra.mxu0 %v1838_v38  ;;  %2770 = vmatpush1.msra.mxu1 %v1840_v39  ;;  %v4711_v38 = vld [vmem:[#allocation11 + $0x3c8] sm:$0xff]  ;;  %v4713_v39 = vld [vmem:[#allocation11 + $0x3d8] sm:$0xff] }
 0x489   :  { %2762 = vmatprep.mubr.f32.mxu0 %v13857_v1  ;;  %2833 = vmatprep.mubr.f32.mxu1 %v13857_v1 }
 0x48a   :  { %2840 = vmatprep.subr.mxu0 %v1843_v40  ;;  %2911 = vmatprep.subr.mxu1 %v1845_v41  ;;  %v4710_v40 = vld [vmem:[#allocation11 + $0x3c0] sm:$0xff]  ;;  %v4712_v41 = vld [vmem:[#allocation11 + $0x3d0] sm:$0xff] }
 0x48b   :  { %13371 = vmatmul.mubr.msk.f32.vlgmr.msra.gmra.mrb[30].mxu0 %vm406_vm5, %v14012_v48  ;;  %13372 = vmatmul.mubr.msk.f32.vlgmr.msra.gmra.mrb[32].mxu1 %vm406_vm5, %v14012_v48 }
 0x48c   :  { %2841 = vmatpush1.msra.mxu0 %v1842_v42  ;;  %2912 = vmatpush1.msra.mxu1 %v1844_v43  ;;  %v4715_v42 = vld [vmem:[#allocation11 + $0x3e8] sm:$0xff]  ;;  %v4717_v43 = vld [vmem:[#allocation11 + $0x3f8] sm:$0xff] }
 0x48d   :  { %2904 = vmatprep.mubr.f32.mxu0 %v13857_v1  ;;  %2975 = vmatprep.mubr.f32.mxu1 %v13857_v1 }
 0x48e   :  { %3282 = vmatprep.subr.mxu0 %v3251_v44  ;;  %3353 = vmatprep.subr.mxu1 %v3253_v45  ;;  %v4714_v44 = vld [vmem:[#allocation11 + $0x3e0] sm:$0xff]  ;;  %v4716_v45 = vld [vmem:[#allocation11 + $0x3f0] sm:$0xff] }
 0x48f   :  { %13373 = vmatmul.mubr.msk.f32.vlgmr.msra.gmra.mrb[32].mxu0 %vm406_vm5, %v14012_v48  ;;  %13374 = vmatmul.mubr.msk.f32.vlgmr.msra.gmra.mrb[34].mxu1 %vm406_vm5, %v14012_v48 }
 0x490   :  { %3283 = vmatpush1.msra.mxu0 %v3250_v46  ;;  %3354 = vmatpush1.msra.mxu1 %v3252_v47  ;;  %v6123_v46 = vld [vmem:[#allocation11 + $0x408] sm:$0xff]  ;;  %v6125_v47 = vld [vmem:[#allocation11 + $0x418] sm:$0xff] }
 0x491   :  { %3346 = vmatprep.mubr.f32.mxu0 %v13857_v1  ;;  %3417 = vmatprep.mubr.f32.mxu1 %v13857_v1 }
 0x492   :  { %3424 = vmatprep.subr.mxu0 %v3255_v49  ;;  %3495 = vmatprep.subr.mxu1 %v3257_v50  ;;  %v6122_v49 = vld [vmem:[#allocation11 + $0x400] sm:$0xff]  ;;  %v6124_v50 = vld [vmem:[#allocation11 + $0x410] sm:$0xff] }
 0x493   :  { %13391 = vmatmul.mubr.msk.f32.vlgmr.msra.gmra.mrb[34].mxu0 %vm406_vm5, %v14012_v48  ;;  %13392 = vmatmul.mubr.msk.f32.vlgmr.msra.gmra.mrb[36].mxu1 %vm406_vm5, %v14012_v48 }
 0x494   :  { %3425 = vmatpush1.msra.mxu0 %v3254_v51  ;;  %3496 = vmatpush1.msra.mxu1 %v3256_v52  ;;  %v6127_v51 = vld [vmem:[#allocation11 + $0x428] sm:$0xff]  ;;  %v6129_v52 = vld [vmem:[#allocation11 + $0x438] sm:$0xff] }
 0x495   :  { %3488 = vmatprep.mubr.f32.mxu0 %v13857_v1  ;;  %3559 = vmatprep.mubr.f32.mxu1 %v13857_v1 }
 0x496   :  { %3566 = vmatprep.subr.mxu0 %v3259_v53  ;;  %3637 = vmatprep.subr.mxu1 %v3261_v54  ;;  %v6126_v53 = vld [vmem:[#allocation11 + $0x420] sm:$0xff]  ;;  %v6128_v54 = vld [vmem:[#allocation11 + $0x430] sm:$0xff] }
 0x497   :  { %13393 = vmatmul.mubr.msk.f32.vlgmr.msra.gmra.mrb[36].mxu0 %vm406_vm5, %v14012_v48  ;;  %13394 = vmatmul.mubr.msk.f32.vlgmr.msra.gmra.mrb[38].mxu1 %vm406_vm5, %v14012_v48 }
 0x498   :  { %3567 = vmatpush1.msra.mxu0 %v3258_v55  ;;  %3638 = vmatpush1.msra.mxu1 %v3260_v56  ;;  %v6131_v55 = vld [vmem:[#allocation11 + $0x448] sm:$0xff]  ;;  %v6133_v56 = vld [vmem:[#allocation11 + $0x458] sm:$0xff] }
 0x499   :  { %3630 = vmatprep.mubr.f32.mxu0 %v13857_v1  ;;  %3701 = vmatprep.mubr.f32.mxu1 %v13857_v1 }
 0x49a   :  { %3708 = vmatprep.subr.mxu0 %v3263_v57  ;;  %3779 = vmatprep.subr.mxu1 %v3265_v58  ;;  %v6130_v57 = vld [vmem:[#allocation11 + $0x440] sm:$0xff]  ;;  %v6132_v58 = vld [vmem:[#allocation11 + $0x450] sm:$0xff] }
 0x49b   :  { %13395 = vmatmul.mubr.msk.f32.vlgmr.msra.gmra.mrb[38].mxu0 %vm406_vm5, %v14012_v48  ;;  %13396 = vmatmul.mubr.msk.f32.vlgmr.msra.gmra.mrb[40].mxu1 %vm406_vm5, %v14012_v48 }
 0x49c   :  { %3709 = vmatpush1.msra.mxu0 %v3262_v59  ;;  %3780 = vmatpush1.msra.mxu1 %v3264_v60  ;;  %v6135_v59 = vld [vmem:[#allocation11 + $0x468] sm:$0xff]  ;;  %v6137_v60 = vld [vmem:[#allocation11 + $0x478] sm:$0xff] }
 0x49d   :  { %3772 = vmatprep.mubr.f32.mxu0 %v13857_v1  ;;  %3843 = vmatprep.mubr.f32.mxu1 %v13857_v1 }
 0x49e   :  { %3850 = vmatprep.subr.mxu0 %v3267_v61  ;;  %3921 = vmatprep.subr.mxu1 %v3269_v62  ;;  %v6134_v61 = vld [vmem:[#allocation11 + $0x460] sm:$0xff]  ;;  %v6136_v62 = vld [vmem:[#allocation11 + $0x470] sm:$0xff] }
 0x49f   :  { %13397 = vmatmul.mubr.msk.f32.vlgmr.msra.gmra.mrb[40].mxu0 %vm406_vm5, %v14012_v48  ;;  %13398 = vmatmul.mubr.msk.f32.vlgmr.msra.gmra.mrb[42].mxu1 %vm406_vm5, %v14012_v48 }
 0x4a0   :  { %3851 = vmatpush1.msra.mxu0 %v3266_v63  ;;  %3922 = vmatpush1.msra.mxu1 %v3268_v0  ;;  %v6139_v63 = vld [vmem:[#allocation11 + $0x488] sm:$0xff]  ;;  %v6141_v0 = vld [vmem:[#allocation11 + $0x498] sm:$0xff] }
 0x4a1   :  { %3914 = vmatprep.mubr.f32.mxu0 %v13857_v1  ;;  %3985 = vmatprep.mubr.f32.mxu1 %v13857_v1 }
 0x4a2   :  { %3992 = vmatprep.subr.mxu0 %v3271_v2  ;;  %4063 = vmatprep.subr.mxu1 %v3273_v3  ;;  %v6138_v2 = vld [vmem:[#allocation11 + $0x480] sm:$0xff]  ;;  %v6140_v3 = vld [vmem:[#allocation11 + $0x490] sm:$0xff] }
 0x4a3   :  { %13399 = vmatmul.mubr.msk.f32.vlgmr.msra.gmra.mrb[42].mxu0 %vm406_vm5, %v14012_v48  ;;  %13400 = vmatmul.mubr.msk.f32.vlgmr.msra.gmra.mrb[44].mxu1 %vm406_vm5, %v14012_v48 }
 0x4a4   :  { %3993 = vmatpush1.msra.mxu0 %v3270_v4  ;;  %4064 = vmatpush1.msra.mxu1 %v3272_v5  ;;  %v6143_v4 = vld [vmem:[#allocation11 + $0x4a8] sm:$0xff]  ;;  %v6145_v5 = vld [vmem:[#allocation11 + $0x4b8] sm:$0xff] }
 0x4a5   :  { %4056 = vmatprep.mubr.f32.mxu0 %v13857_v1  ;;  %4127 = vmatprep.mubr.f32.mxu1 %v13857_v1 }
 0x4a6   :  { %4134 = vmatprep.subr.mxu0 %v3275_v6  ;;  %4205 = vmatprep.subr.mxu1 %v3277_v7  ;;  %v6142_v6 = vld [vmem:[#allocation11 + $0x4a0] sm:$0xff]  ;;  %v6144_v7 = vld [vmem:[#allocation11 + $0x4b0] sm:$0xff] }
 0x4a7   :  { %13401 = vmatmul.mubr.msk.f32.vlgmr.msra.gmra.mrb[44].mxu0 %vm406_vm5, %v14012_v48  ;;  %13402 = vmatmul.mubr.msk.f32.vlgmr.msra.gmra.mrb[46].mxu1 %vm406_vm5, %v14012_v48 }
 0x4a8   :  { %4135 = vmatpush1.msra.mxu0 %v3274_v8  ;;  %4206 = vmatpush1.msra.mxu1 %v3276_v9  ;;  %v6147_v8 = vld [vmem:[#allocation11 + $0x4c8] sm:$0xff]  ;;  %v6149_v9 = vld [vmem:[#allocation11 + $0x4d8] sm:$0xff] }
 0x4a9   :  { %4198 = vmatprep.mubr.f32.mxu0 %v13857_v1  ;;  %4269 = vmatprep.mubr.f32.mxu1 %v13857_v1 }
 0x4aa   :  { %4276 = vmatprep.subr.mxu0 %v3279_v10  ;;  %4347 = vmatprep.subr.mxu1 %v3281_v11  ;;  %v6146_v10 = vld [vmem:[#allocation11 + $0x4c0] sm:$0xff]  ;;  %v6148_v11 = vld [vmem:[#allocation11 + $0x4d0] sm:$0xff] }
 0x4ab   :  { %13403 = vmatmul.mubr.msk.f32.vlgmr.msra.gmra.mrb[46].mxu0 %vm406_vm5, %v14012_v48  ;;  %13404 = vmatmul.mubr.msk.f32.vlgmr.msra.gmra.mrb[48].mxu1 %vm406_vm5, %v14012_v48 }
 0x4ac   :  { %4277 = vmatpush1.msra.mxu0 %v3278_v12  ;;  %4348 = vmatpush1.msra.mxu1 %v3280_v13  ;;  %v6151_v12 = vld [vmem:[#allocation11 + $0x4e8] sm:$0xff]  ;;  %v6153_v13 = vld [vmem:[#allocation11 + $0x4f8] sm:$0xff] }
 0x4ad   :  { %4340 = vmatprep.mubr.f32.mxu0 %v13857_v1  ;;  %4411 = vmatprep.mubr.f32.mxu1 %v13857_v1 }
 0x4ae   :  { %4718 = vmatprep.subr.mxu0 %v4687_v14  ;;  %4789 = vmatprep.subr.mxu1 %v4689_v15  ;;  %v6150_v14 = vld [vmem:[#allocation11 + $0x4e0] sm:$0xff]  ;;  %v6152_v15 = vld [vmem:[#allocation11 + $0x4f0] sm:$0xff] }
 0x4af   :  { %13405 = vmatmul.mubr.msk.f32.vlgmr.msra.gmra.mrb[48].mxu0 %vm406_vm5, %v14012_v48  ;;  %13406 = vmatmul.mubr.msk.f32.vlgmr.msra.gmra.mrb[50].mxu1 %vm406_vm5, %v14012_v48 }
 0x4b0   :  { %4719 = vmatpush1.msra.mxu0 %v4686_v16  ;;  %4790 = vmatpush1.msra.mxu1 %v4688_v17  ;;  %v7559_v16 = vld [vmem:[#allocation11 + $0x508] sm:$0xff]  ;;  %v7561_v17 = vld [vmem:[#allocation11 + $0x518] sm:$0xff] }
 0x4b1   :  { %4782 = vmatprep.mubr.f32.mxu0 %v13857_v1  ;;  %4853 = vmatprep.mubr.f32.mxu1 %v13857_v1 }
 0x4b2   :  { %4860 = vmatprep.subr.mxu0 %v4691_v18  ;;  %4931 = vmatprep.subr.mxu1 %v4693_v19  ;;  %v7558_v18 = vld [vmem:[#allocation11 + $0x500] sm:$0xff]  ;;  %v7560_v19 = vld [vmem:[#allocation11 + $0x510] sm:$0xff] }
 0x4b3   :  { %13423 = vmatmul.mubr.msk.f32.vlgmr.msra.gmra.mrb[50].mxu0 %vm406_vm5, %v14012_v48  ;;  %13424 = vmatmul.mubr.msk.f32.vlgmr.msra.gmra.mrb[52].mxu1 %vm406_vm5, %v14012_v48 }
 0x4b4   :  { %4861 = vmatpush1.msra.mxu0 %v4690_v20  ;;  %4932 = vmatpush1.msra.mxu1 %v4692_v21  ;;  %v7563_v20 = vld [vmem:[#allocation11 + $0x528] sm:$0xff]  ;;  %v7565_v21 = vld [vmem:[#allocation11 + $0x538] sm:$0xff] }
 0x4b5   :  { %4924 = vmatprep.mubr.f32.mxu0 %v13857_v1  ;;  %4995 = vmatprep.mubr.f32.mxu1 %v13857_v1 }
 0x4b6   :  { %5002 = vmatprep.subr.mxu0 %v4695_v22  ;;  %5073 = vmatprep.subr.mxu1 %v4697_v23  ;;  %v7562_v22 = vld [vmem:[#allocation11 + $0x520] sm:$0xff]  ;;  %v7564_v23 = vld [vmem:[#allocation11 + $0x530] sm:$0xff] }
 0x4b7   :  { %13425 = vmatmul.mubr.msk.f32.vlgmr.msra.gmra.mrb[52].mxu0 %vm406_vm5, %v14012_v48  ;;  %13426 = vmatmul.mubr.msk.f32.vlgmr.msra.gmra.mrb[54].mxu1 %vm406_vm5, %v14012_v48 }
 0x4b8   :  { %5003 = vmatpush1.msra.mxu0 %v4694_v24  ;;  %5074 = vmatpush1.msra.mxu1 %v4696_v25  ;;  %v7567_v24 = vld [vmem:[#allocation11 + $0x548] sm:$0xff]  ;;  %v7569_v25 = vld [vmem:[#allocation11 + $0x558] sm:$0xff] }
 0x4b9   :  { %5066 = vmatprep.mubr.f32.mxu0 %v13857_v1  ;;  %5137 = vmatprep.mubr.f32.mxu1 %v13857_v1 }
 0x4ba   :  { %5144 = vmatprep.subr.mxu0 %v4699_v26  ;;  %5215 = vmatprep.subr.mxu1 %v4701_v27  ;;  %v7566_v26 = vld [vmem:[#allocation11 + $0x540] sm:$0xff]  ;;  %v7568_v27 = vld [vmem:[#allocation11 + $0x550] sm:$0xff] }
 0x4bb   :  { %13427 = vmatmul.mubr.msk.f32.vlgmr.msra.gmra.mrb[54].mxu0 %vm406_vm5, %v14012_v48  ;;  %13428 = vmatmul.mubr.msk.f32.vlgmr.msra.gmra.mrb[56].mxu1 %vm406_vm5, %v14012_v48 }
 0x4bc   :  { %5145 = vmatpush1.msra.mxu0 %v4698_v28  ;;  %5216 = vmatpush1.msra.mxu1 %v4700_v29  ;;  %v7571_v28 = vld [vmem:[#allocation11 + $0x568] sm:$0xff]  ;;  %v7573_v29 = vld [vmem:[#allocation11 + $0x578] sm:$0xff] }
 0x4bd   :  { %5208 = vmatprep.mubr.f32.mxu0 %v13857_v1  ;;  %5279 = vmatprep.mubr.f32.mxu1 %v13857_v1 }
 0x4be   :  { %5286 = vmatprep.subr.mxu0 %v4703_v30  ;;  %5357 = vmatprep.subr.mxu1 %v4705_v31  ;;  %v7570_v30 = vld [vmem:[#allocation11 + $0x560] sm:$0xff]  ;;  %v7572_v31 = vld [vmem:[#allocation11 + $0x570] sm:$0xff] }
 0x4bf   :  { %13429 = vmatmul.mubr.msk.f32.vlgmr.msra.gmra.mrb[56].mxu0 %vm406_vm5, %v14012_v48  ;;  %13430 = vmatmul.mubr.msk.f32.vlgmr.msra.gmra.mrb[58].mxu1 %vm406_vm5, %v14012_v48 }
 0x4c0   :  { %5287 = vmatpush1.msra.mxu0 %v4702_v32  ;;  %5358 = vmatpush1.msra.mxu1 %v4704_v33  ;;  %v7575_v32 = vld [vmem:[#allocation11 + $0x588] sm:$0xff]  ;;  %v7577_v33 = vld [vmem:[#allocation11 + $0x598] sm:$0xff] }
 0x4c1   :  { %5350 = vmatprep.mubr.f32.mxu0 %v13857_v1  ;;  %5421 = vmatprep.mubr.f32.mxu1 %v13857_v1 }
 0x4c2   :  { %5428 = vmatprep.subr.mxu0 %v4707_v34  ;;  %5499 = vmatprep.subr.mxu1 %v4709_v35  ;;  %v7574_v34 = vld [vmem:[#allocation11 + $0x580] sm:$0xff]  ;;  %v7576_v35 = vld [vmem:[#allocation11 + $0x590] sm:$0xff] }
 0x4c3   :  { %13431 = vmatmul.mubr.msk.f32.vlgmr.msra.gmra.mrb[58].mxu0 %vm406_vm5, %v14012_v48  ;;  %13432 = vmatmul.mubr.msk.f32.vlgmr.msra.gmra.mrb[60].mxu1 %vm406_vm5, %v14012_v48 }
 0x4c4   :  { %5429 = vmatpush1.msra.mxu0 %v4706_v36  ;;  %5500 = vmatpush1.msra.mxu1 %v4708_v37  ;;  %v7579_v36 = vld [vmem:[#allocation11 + $0x5a8] sm:$0xff]  ;;  %v7581_v37 = vld [vmem:[#allocation11 + $0x5b8] sm:$0xff] }
 0x4c5   :  { %5492 = vmatprep.mubr.f32.mxu0 %v13857_v1  ;;  %5563 = vmatprep.mubr.f32.mxu1 %v13857_v1 }
 0x4c6   :  { %5570 = vmatprep.subr.mxu0 %v4711_v38  ;;  %5641 = vmatprep.subr.mxu1 %v4713_v39  ;;  %v7578_v38 = vld [vmem:[#allocation11 + $0x5a0] sm:$0xff]  ;;  %v7580_v39 = vld [vmem:[#allocation11 + $0x5b0] sm:$0xff] }
 0x4c7   :  { %13433 = vmatmul.mubr.msk.f32.vlgmr.msra.gmra.mrb[60].mxu0 %vm406_vm5, %v14012_v48  ;;  %13434 = vmatmul.mubr.msk.f32.vlgmr.msra.gmra.mrb[62].mxu1 %vm406_vm5, %v14012_v48 }
 0x4c8   :  { %5571 = vmatpush1.msra.mxu0 %v4710_v40  ;;  %5642 = vmatpush1.msra.mxu1 %v4712_v41  ;;  %v7583_v40 = vld [vmem:[#allocation11 + $0x5c8] sm:$0xff]  ;;  %v7585_v41 = vld [vmem:[#allocation11 + $0x5d8] sm:$0xff] }
 0x4c9   :  { %5634 = vmatprep.mubr.f32.mxu0 %v13857_v1  ;;  %5705 = vmatprep.mubr.f32.mxu1 %v13857_v1 }
 0x4ca   :  { %5712 = vmatprep.subr.mxu0 %v4715_v42  ;;  %5783 = vmatprep.subr.mxu1 %v4717_v43  ;;  %v7582_v42 = vld [vmem:[#allocation11 + $0x5c0] sm:$0xff]  ;;  %v7584_v43 = vld [vmem:[#allocation11 + $0x5d0] sm:$0xff] }
 0x4cb   :  { %13435 = vmatmul.mubr.msk.f32.vlgmr.msra.gmra.mrb[62].mxu0 %vm406_vm5, %v14012_v48  ;;  %13436 = vmatmul.mubr.msk.f32.vlgmr.msra.gmra.mrb[64].mxu1 %vm406_vm5, %v14012_v48 }
 0x4cc   :  { %5713 = vmatpush1.msra.mxu0 %v4714_v44  ;;  %5784 = vmatpush1.msra.mxu1 %v4716_v45  ;;  %v7587_v44 = vld [vmem:[#allocation11 + $0x5e8] sm:$0xff]  ;;  %v7589_v45 = vld [vmem:[#allocation11 + $0x5f8] sm:$0xff] }
 0x4cd   :  { %5776 = vmatprep.mubr.f32.mxu0 %v13857_v1  ;;  %5847 = vmatprep.mubr.f32.mxu1 %v13857_v1 }
 0x4ce   :  { %6154 = vmatprep.subr.mxu0 %v6123_v46  ;;  %6225 = vmatprep.subr.mxu1 %v6125_v47  ;;  %v7586_v46 = vld [vmem:[#allocation11 + $0x5e0] sm:$0xff]  ;;  %v7588_v47 = vld [vmem:[#allocation11 + $0x5f0] sm:$0xff] }
 0x4cf   :  { %13437 = vmatmul.mubr.msk.f32.vlgmr.msra.gmra.mrb[64].mxu0 %vm406_vm5, %v14012_v48  ;;  %13438 = vmatmul.mubr.msk.f32.vlgmr.msra.gmra.mrb[66].mxu1 %vm406_vm5, %v14012_v48 }
 0x4d0   :  { %6155 = vmatpush1.msra.mxu0 %v6122_v49  ;;  %6226 = vmatpush1.msra.mxu1 %v6124_v50  ;;  %v8995_v49 = vld [vmem:[#allocation11 + $0x608] sm:$0xff]  ;;  %v8997_v50 = vld [vmem:[#allocation11 + $0x618] sm:$0xff] }
 0x4d1   :  { %6218 = vmatprep.mubr.f32.mxu0 %v13857_v1  ;;  %6289 = vmatprep.mubr.f32.mxu1 %v13857_v1 }
 0x4d2   :  { %6296 = vmatprep.subr.mxu0 %v6127_v51  ;;  %6367 = vmatprep.subr.mxu1 %v6129_v52  ;;  %v8994_v51 = vld [vmem:[#allocation11 + $0x600] sm:$0xff]  ;;  %v8996_v52 = vld [vmem:[#allocation11 + $0x610] sm:$0xff] }
 0x4d3   :  { %13455 = vmatmul.mubr.msk.f32.vlgmr.msra.gmra.mrb[66].mxu0 %vm406_vm5, %v14012_v48  ;;  %13456 = vmatmul.mubr.msk.f32.vlgmr.msra.gmra.mrb[68].mxu1 %vm406_vm5, %v14012_v48 }
 0x4d4   :  { %6297 = vmatpush1.msra.mxu0 %v6126_v53  ;;  %6368 = vmatpush1.msra.mxu1 %v6128_v54  ;;  %v8999_v53 = vld [vmem:[#allocation11 + $0x628] sm:$0xff]  ;;  %v9001_v54 = vld [vmem:[#allocation11 + $0x638] sm:$0xff] }
 0x4d5   :  { %6360 = vmatprep.mubr.f32.mxu0 %v13857_v1  ;;  %6431 = vmatprep.mubr.f32.mxu1 %v13857_v1 }
 0x4d6   :  { %6438 = vmatprep.subr.mxu0 %v6131_v55  ;;  %6509 = vmatprep.subr.mxu1 %v6133_v56  ;;  %v8998_v55 = vld [vmem:[#allocation11 + $0x620] sm:$0xff]  ;;  %v9000_v56 = vld [vmem:[#allocation11 + $0x630] sm:$0xff] }
 0x4d7   :  { %13457 = vmatmul.mubr.msk.f32.vlgmr.msra.gmra.mrb[68].mxu0 %vm406_vm5, %v14012_v48  ;;  %13458 = vmatmul.mubr.msk.f32.vlgmr.msra.gmra.mrb[70].mxu1 %vm406_vm5, %v14012_v48 }
 0x4d8   :  { %6439 = vmatpush1.msra.mxu0 %v6130_v57  ;;  %6510 = vmatpush1.msra.mxu1 %v6132_v58  ;;  %v9003_v57 = vld [vmem:[#allocation11 + $0x648] sm:$0xff]  ;;  %v9005_v58 = vld [vmem:[#allocation11 + $0x658] sm:$0xff] }
 0x4d9   :  { %6502 = vmatprep.mubr.f32.mxu0 %v13857_v1  ;;  %6573 = vmatprep.mubr.f32.mxu1 %v13857_v1 }
 0x4da   :  { %6580 = vmatprep.subr.mxu0 %v6135_v59  ;;  %6651 = vmatprep.subr.mxu1 %v6137_v60  ;;  %v9002_v59 = vld [vmem:[#allocation11 + $0x640] sm:$0xff]  ;;  %v9004_v60 = vld [vmem:[#allocation11 + $0x650] sm:$0xff] }
 0x4db   :  { %13459 = vmatmul.mubr.msk.f32.vlgmr.msra.gmra.mrb[70].mxu0 %vm406_vm5, %v14012_v48  ;;  %13460 = vmatmul.mubr.msk.f32.vlgmr.msra.gmra.mrb[72].mxu1 %vm406_vm5, %v14012_v48 }
 0x4dc   :  { %6581 = vmatpush1.msra.mxu0 %v6134_v61  ;;  %6652 = vmatpush1.msra.mxu1 %v6136_v62  ;;  %v9007_v61 = vld [vmem:[#allocation11 + $0x668] sm:$0xff]  ;;  %v9009_v62 = vld [vmem:[#allocation11 + $0x678] sm:$0xff] }
 0x4dd   :  { %6644 = vmatprep.mubr.f32.mxu0 %v13857_v1  ;;  %6715 = vmatprep.mubr.f32.mxu1 %v13857_v1 }
 0x4de   :  { %6722 = vmatprep.subr.mxu0 %v6139_v63  ;;  %6793 = vmatprep.subr.mxu1 %v6141_v0  ;;  %v9006_v63 = vld [vmem:[#allocation11 + $0x660] sm:$0xff]  ;;  %v9008_v0 = vld [vmem:[#allocation11 + $0x670] sm:$0xff] }
 0x4df   :  { %13461 = vmatmul.mubr.msk.f32.vlgmr.msra.gmra.mrb[72].mxu0 %vm406_vm5, %v14012_v48  ;;  %13462 = vmatmul.mubr.msk.f32.vlgmr.msra.gmra.mrb[74].mxu1 %vm406_vm5, %v14012_v48 }
 0x4e0   :  { %6723 = vmatpush1.msra.mxu0 %v6138_v2  ;;  %6794 = vmatpush1.msra.mxu1 %v6140_v3  ;;  %v9011_v2 = vld [vmem:[#allocation11 + $0x688] sm:$0xff]  ;;  %v9013_v3 = vld [vmem:[#allocation11 + $0x698] sm:$0xff] }
 0x4e1   :  { %6786 = vmatprep.mubr.f32.mxu0 %v13857_v1  ;;  %6857 = vmatprep.mubr.f32.mxu1 %v13857_v1 }
 0x4e2   :  { %6864 = vmatprep.subr.mxu0 %v6143_v4  ;;  %6935 = vmatprep.subr.mxu1 %v6145_v5  ;;  %v9010_v4 = vld [vmem:[#allocation11 + $0x680] sm:$0xff]  ;;  %v9012_v5 = vld [vmem:[#allocation11 + $0x690] sm:$0xff] }
 0x4e3   :  { %13463 = vmatmul.mubr.msk.f32.vlgmr.msra.gmra.mrb[74].mxu0 %vm406_vm5, %v14012_v48  ;;  %13464 = vmatmul.mubr.msk.f32.vlgmr.msra.gmra.mrb[76].mxu1 %vm406_vm5, %v14012_v48 }
 0x4e4   :  { %6865 = vmatpush1.msra.mxu0 %v6142_v6  ;;  %6936 = vmatpush1.msra.mxu1 %v6144_v7  ;;  %v13858_v6 = vmov 1966171168  }
 0x4e5   :  { %6928 = vmatprep.mubr.f32.mxu0 %v13857_v1  ;;  %6999 = vmatprep.mubr.f32.mxu1 %v13857_v1  ;;  %v1615_v7 = vunpack.c.l.s4 %v13858_v6 }
 0x4e6   :  { %7006 = vmatprep.subr.mxu0 %v6147_v8  ;;  %7077 = vmatprep.subr.mxu1 %v6149_v9  ;;  %v1617_v8 = vlaneseq  ;;  %v9015_v9 = vld [vmem:[#allocation11 + $0x6a8] sm:$0xff] }
 0x4e7   :  { %13465 = vmatmul.mubr.msk.f32.vlgmr.msra.gmra.mrb[76].mxu0 %vm406_vm5, %v14012_v48  ;;  %13466 = vmatmul.mubr.msk.f32.vlgmr.msra.gmra.mrb[78].mxu1 %vm406_vm5, %v14012_v48 }
 0x4e8   :  { %7007 = vmatpush1.msra.mxu0 %v6146_v10  ;;  %7078 = vmatpush1.msra.mxu1 %v6148_v11  ;;  %v9017_v10 = vld [vmem:[#allocation11 + $0x6b8] sm:$0xff]  ;;  %v9014_v11 = vld [vmem:[#allocation11 + $0x6a0] sm:$0xff] }
 0x4e9   :  { %7070 = vmatprep.mubr.f32.mxu0 %v13857_v1  ;;  %7141 = vmatprep.mubr.f32.mxu1 %v13857_v1 }
 0x4ea   :  { %7148 = vmatprep.subr.mxu0 %v6151_v12  ;;  %7219 = vmatprep.subr.mxu1 %v6153_v13  ;;  %v9016_v12 = vld [vmem:[#allocation11 + $0x6b0] sm:$0xff]  ;;  %v1616_v13 = vunpack.c.0.s8 %v1615_v7  ;;  %v10441_v7 = vld [vmem:[#allocation11 + $0x758] sm:$0xff] }
 0x4eb   :  { %13467 = vmatmul.mubr.msk.f32.vlgmr.msra.gmra.mrb[78].mxu0 %vm406_vm5, %v14012_v48  ;;  %13468 = vmatmul.mubr.msk.f32.vlgmr.msra.gmra.mrb[80].mxu1 %vm406_vm5, %v14012_v48 }
 0x4ec   :  { %7149 = vmatpush1.msra.mxu0 %v6150_v14  ;;  %7220 = vmatpush1.msra.mxu1 %v6152_v15  ;;  %v1618_v14 = vshrl.u32 %v1617_v8, 7  ;;  %v9019_v15 = vld [vmem:[#allocation11 + $0x6c8] sm:$0xff]  ;;  %v10438_v8 = vld [vmem:[#allocation11 + $0x740] sm:$0xff] }
 0x4ed   :  { %7212 = vmatprep.mubr.f32.mxu0 %v13857_v1  ;;  %7283 = vmatprep.mubr.f32.mxu1 %v13857_v1 }
 0x4ee   :  { %7590 = vmatprep.subr.mxu0 %v7559_v16  ;;  %7661 = vmatprep.subr.mxu1 %v7561_v17  ;;  %v9021_v16 = vld [vmem:[#allocation11 + $0x6d8] sm:$0xff]  ;;  %v9018_v17 = vld [vmem:[#allocation11 + $0x6c0] sm:$0xff] }
 0x4ef   :  { %13469 = vmatmul.mubr.msk.f32.vlgmr.msra.gmra.mrb[80].mxu0 %vm406_vm5, %v14012_v48  ;;  %13470 = vmatmul.mubr.msk.f32.vlgmr.msra.gmra.mrb[82].mxu1 %vm406_vm5, %v14012_v48 }
 0x4f0   :  { %7591 = vmatpush1.msra.mxu0 %v7558_v18  ;;  %7662 = vmatpush1.msra.mxu1 %v7560_v19  ;;  %v9020_v18 = vld [vmem:[#allocation11 + $0x6d0] sm:$0xff] }
 0x4f1   :  { %7654 = vmatprep.mubr.f32.mxu0 %v13857_v1  ;;  %7725 = vmatprep.mubr.f32.mxu1 %v13857_v1 }
 0x4f2   :  { %7732 = vmatprep.subr.mxu0 %v7563_v20  ;;  %7803 = vmatprep.subr.mxu1 %v7565_v21  ;;  %v14332_v21 = vsub.s32 %v1616_v13, %v1618_v14  ;;  %v10440_v13 = vld [vmem:[#allocation11 + $0x750] sm:$0xff] }
 0x4f3   :  { %13487 = vmatmul.mubr.msk.f32.vlgmr.msra.gmra.mrb[82].mxu0 %vm406_vm5, %v14012_v48  ;;  %13488 = vmatmul.mubr.msk.f32.vlgmr.msra.gmra.mrb[84].mxu1 %vm406_vm5, %v14012_v48 }
 0x4f4   :  { %7733 = vmatpush1.msra.mxu0 %v7562_v22  ;;  %7804 = vmatpush1.msra.mxu1 %v7564_v23 }
 0x4f5   :  { %7796 = vmatprep.mubr.f32.mxu0 %v13857_v1  ;;  %7867 = vmatprep.mubr.f32.mxu1 %v13857_v1 }
 0x4f6   :  { %7874 = vmatprep.subr.mxu0 %v7567_v24  ;;  %7945 = vmatprep.subr.mxu1 %v7569_v25  ;;  %v9023_v24 = vld [vmem:[#allocation11 + $0x6e8] sm:$0xff]  ;;  %v9025_v25 = vld [vmem:[#allocation11 + $0x6f8] sm:$0xff] }
 0x4f7   :  { %13489 = vmatmul.mubr.msk.f32.vlgmr.msra.gmra.mrb[84].mxu0 %vm406_vm5, %v14012_v48  ;;  %13490 = vmatmul.mubr.msk.f32.vlgmr.msra.gmra.mrb[86].mxu1 %vm406_vm5, %v14012_v48 }
 0x4f8   :  { %7875 = vmatpush1.msra.mxu0 %v7566_v26  ;;  %7946 = vmatpush1.msra.mxu1 %v7568_v27 }
 0x4f9   :  { %7938 = vmatprep.mubr.f32.mxu0 %v13857_v1  ;;  %8009 = vmatprep.mubr.f32.mxu1 %v13857_v1 }
 0x4fa   :  { %8016 = vmatprep.subr.mxu0 %v7571_v28  ;;  %8087 = vmatprep.subr.mxu1 %v7573_v29  ;;  %v9022_v28 = vld [vmem:[#allocation11 + $0x6e0] sm:$0xff]  ;;  %v9024_v29 = vld [vmem:[#allocation11 + $0x6f0] sm:$0xff] }
 0x4fb   :  { %13491 = vmatmul.mubr.msk.f32.vlgmr.msra.gmra.mrb[86].mxu0 %vm406_vm5, %v14012_v48  ;;  %13492 = vmatmul.mubr.msk.f32.vlgmr.msra.gmra.mrb[88].mxu1 %vm406_vm5, %v14012_v48 }
 0x4fc   :  { %8017 = vmatpush1.msra.mxu0 %v7570_v30  ;;  %8088 = vmatpush1.msra.mxu1 %v7572_v31 }
 0x4fd   :  { %8080 = vmatprep.mubr.f32.mxu0 %v13857_v1  ;;  %8151 = vmatprep.mubr.f32.mxu1 %v13857_v1 }
 0x4fe   :  { %8158 = vmatprep.subr.mxu0 %v7575_v32  ;;  %8229 = vmatprep.subr.mxu1 %v7577_v33 }
 0x4ff   :  { %13493 = vmatmul.mubr.msk.f32.vlgmr.msra.gmra.mrb[88].mxu0 %vm406_vm5, %v14012_v48  ;;  %13494 = vmatmul.mubr.msk.f32.vlgmr.msra.gmra.mrb[90].mxu1 %vm406_vm5, %v14012_v48 }
 0x500   :  { %8159 = vmatpush1.msra.mxu0 %v7574_v34  ;;  %8230 = vmatpush1.msra.mxu1 %v7576_v35 }
 0x501   :  { %8222 = vmatprep.mubr.f32.mxu0 %v13857_v1  ;;  %8293 = vmatprep.mubr.f32.mxu1 %v13857_v1 }
 0x502   :  { %8300 = vmatprep.subr.mxu0 %v7579_v36  ;;  %8371 = vmatprep.subr.mxu1 %v7581_v37  ;;  %v10431_v36 = vld [vmem:[#allocation11 + $0x708] sm:$0xff]  ;;  %v10433_v37 = vld [vmem:[#allocation11 + $0x718] sm:$0xff] }
 0x503   :  { %13495 = vmatmul.mubr.msk.f32.vlgmr.msra.gmra.mrb[90].mxu0 %vm406_vm5, %v14012_v48  ;;  %13496 = vmatmul.mubr.msk.f32.vlgmr.msra.gmra.mrb[92].mxu1 %vm406_vm5, %v14012_v48 }
 0x504   :  { %8301 = vmatpush1.msra.mxu0 %v7578_v38  ;;  %8372 = vmatpush1.msra.mxu1 %v7580_v39 }
 0x505   :  { %8364 = vmatprep.mubr.f32.mxu0 %v13857_v1  ;;  %8435 = vmatprep.mubr.f32.mxu1 %v13857_v1 }
 0x506   :  { %8442 = vmatprep.subr.mxu0 %v7583_v40  ;;  %8513 = vmatprep.subr.mxu1 %v7585_v41  ;;  %v10430_v41 = vld [vmem:[#allocation11 + $0x700] sm:$0xff] }
 0x507   :  { %13497 = vmatmul.mubr.msk.f32.vlgmr.msra.gmra.mrb[92].mxu0 %vm406_vm5, %v14012_v48  ;;  %13498 = vmatmul.mubr.msk.f32.vlgmr.msra.gmra.mrb[94].mxu1 %vm406_vm5, %v14012_v48 }
 0x508   :  { %8443 = vmatpush1.msra.mxu0 %v7582_v42  ;;  %8514 = vmatpush1.msra.mxu1 %v7584_v43  ;;  %v10432_v42 = vld [vmem:[#allocation11 + $0x710] sm:$0xff] }
 0x509   :  { %8506 = vmatprep.mubr.f32.mxu0 %v13857_v1  ;;  %8577 = vmatprep.mubr.f32.mxu1 %v13857_v1 }
 0x50a   :  { %8584 = vmatprep.subr.mxu0 %v7587_v44  ;;  %8655 = vmatprep.subr.mxu1 %v7589_v45 }
 0x50b   :  { %13499 = vmatmul.mubr.msk.f32.vlgmr.msra.gmra.mrb[94].mxu0 %vm406_vm5, %v14012_v48  ;;  %13500 = vmatmul.mubr.msk.f32.vlgmr.msra.gmra.mrb[96].mxu1 %vm406_vm5, %v14012_v48 }
 0x50c   :  { %8585 = vmatpush1.msra.mxu0 %v7586_v46  ;;  %8656 = vmatpush1.msra.mxu1 %v7588_v47 }
 0x50d   :  { %8648 = vmatprep.mubr.f32.mxu0 %v13857_v1  ;;  %8719 = vmatprep.mubr.f32.mxu1 %v13857_v1 }
 0x50e   :  { %9026 = vmatprep.subr.mxu0 %v8995_v49  ;;  %9097 = vmatprep.subr.mxu1 %v8997_v50  ;;  %v10435_v50 = vld [vmem:[#allocation11 + $0x728] sm:$0xff] }
 0x50f   :  { %13501 = vmatmul.mubr.msk.f32.vlgmr.msra.gmra.mrb[96].mxu0 %vm406_vm5, %v14012_v48  ;;  %13502 = vmatmul.mubr.msk.f32.vlgmr.msra.gmra.mrb[98].mxu1 %vm406_vm5, %v14012_v48 }
 0x510   :  { %9027 = vmatpush1.msra.mxu0 %v8994_v51  ;;  %9098 = vmatpush1.msra.mxu1 %v8996_v52  ;;  %v10437_v51 = vld [vmem:[#allocation11 + $0x738] sm:$0xff] }
 0x511   :  { %9090 = vmatprep.mubr.f32.mxu0 %v13857_v1  ;;  %9161 = vmatprep.mubr.f32.mxu1 %v13857_v1 }
 0x512   :  { %9168 = vmatprep.subr.mxu0 %v8999_v53  ;;  %9239 = vmatprep.subr.mxu1 %v9001_v54 }
 0x513   :  { %13519 = vmatmul.mubr.msk.f32.vlgmr.msra.gmra.mrb[98].mxu0 %vm406_vm5, %v14012_v48  ;;  %13520 = vmatmul.mubr.msk.f32.vlgmr.msra.gmra.mrb[100].mxu1 %vm406_vm5, %v14012_v48 }
 0x514   :  { %9169 = vmatpush1.msra.mxu0 %v8998_v55  ;;  %9240 = vmatpush1.msra.mxu1 %v9000_v56  ;;  %v10434_v56 = vld [vmem:[#allocation11 + $0x720] sm:$0xff] }
 0x515   :  { %9232 = vmatprep.mubr.f32.mxu0 %v13857_v1  ;;  %9303 = vmatprep.mubr.f32.mxu1 %v13857_v1 }
 0x516   :  { %9310 = vmatprep.subr.mxu0 %v9003_v57  ;;  %9381 = vmatprep.subr.mxu1 %v9005_v58 }
 0x517   :  { %13521 = vmatmul.mubr.msk.f32.vlgmr.msra.gmra.mrb[100].mxu0 %vm406_vm5, %v14012_v48  ;;  %13522 = vmatmul.mubr.msk.f32.vlgmr.msra.gmra.mrb[102].mxu1 %vm406_vm5, %v14012_v48 }
 0x518   :  { %9311 = vmatpush1.msra.mxu0 %v9002_v59  ;;  %9382 = vmatpush1.msra.mxu1 %v9004_v60 }
 0x519   :  { %9374 = vmatprep.mubr.f32.mxu0 %v13857_v1  ;;  %9445 = vmatprep.mubr.f32.mxu1 %v13857_v1 }
 0x51a   :  { %9452 = vmatprep.subr.mxu0 %v9007_v61  ;;  %9523 = vmatprep.subr.mxu1 %v9009_v62  ;;  %v10436_v62 = vld [vmem:[#allocation11 + $0x730] sm:$0xff] }
 0x51b   :  { %13523 = vmatmul.mubr.msk.f32.vlgmr.msra.gmra.mrb[102].mxu0 %vm406_vm5, %v14012_v48  ;;  %13524 = vmatmul.mubr.msk.f32.vlgmr.msra.gmra.mrb[104].mxu1 %vm406_vm5, %v14012_v48 }
 0x51c   :  { %9453 = vmatpush1.msra.mxu0 %v9006_v63  ;;  %9524 = vmatpush1.msra.mxu1 %v9008_v0 }
 0x51d   :  { %9516 = vmatprep.mubr.f32.mxu0 %v13857_v1  ;;  %9587 = vmatprep.mubr.f32.mxu1 %v13857_v1 }
 0x51e   :  { %9594 = vmatprep.subr.mxu0 %v9011_v2  ;;  %9665 = vmatprep.subr.mxu1 %v9013_v3  ;;  %v10439_v2 = vld [vmem:[#allocation11 + $0x748] sm:$0xff] }
 0x51f   :  { %13525 = vmatmul.mubr.msk.f32.vlgmr.msra.gmra.mrb[104].mxu0 %vm406_vm5, %v14012_v48  ;;  %13526 = vmatmul.mubr.msk.f32.vlgmr.msra.gmra.mrb[106].mxu1 %vm406_vm5, %v14012_v48 }
 0x520   :  { %9595 = vmatpush1.msra.mxu0 %v9010_v4  ;;  %9666 = vmatpush1.msra.mxu1 %v9012_v5 }
 0x521   :  { %9658 = vmatprep.mubr.f32.mxu0 %v13857_v1  ;;  %9729 = vmatprep.mubr.f32.mxu1 %v13857_v1 }
 0x522   :  { %9736 = vmatprep.subr.mxu0 %v9015_v9  ;;  %9807 = vmatprep.subr.mxu1 %v9017_v10 }
 0x523   :  { %13527 = vmatmul.mubr.msk.f32.vlgmr.msra.gmra.mrb[106].mxu0 %vm406_vm5, %v14012_v48  ;;  %13528 = vmatmul.mubr.msk.f32.vlgmr.msra.gmra.mrb[108].mxu1 %vm406_vm5, %v14012_v48 }
 0x524   :  { %9737 = vmatpush1.msra.mxu0 %v9014_v11  ;;  %9808 = vmatpush1.msra.mxu1 %v9016_v12 }
 0x525   :  { %9800 = vmatprep.mubr.f32.mxu0 %v13857_v1  ;;  %9871 = vmatprep.mubr.f32.mxu1 %v13857_v1 }
 0x526   :  { %v476_v19 = vpop.f32.mrb[2].mxu0  ;;  %v547_v20 = vpop.f32.mrb[4].mxu1  ;;  %9878 = vmatprep.subr.mxu0 %v9019_v15  ;;  %9949 = vmatprep.subr.mxu1 %v9021_v16  ;;  %v10443_v16 = vld [vmem:[#allocation11 + $0x768] sm:$0xff] }
 0x527   :  { %v478_v22 = vpop.f32.mrb[3].mxu0  ;;  %v549_v23 = vpop.f32.mrb[5].mxu1  ;;  %13529 = vmatmul.mubr.msk.f32.vlgmr.msra.gmra.mrb[108].mxu0 %vm406_vm5, %v14012_v48  ;;  %13530 = vmatmul.mubr.msk.f32.vlgmr.msra.gmra.mrb[110].mxu1 %vm406_vm5, %v14012_v48 }
 0x528   :  { %v13343_v26 = vpack.c.bf16 %v478_v22, %v476_v19  ;;  %v13344_v27 = vpack.c.bf16 %v549_v23, %v547_v20  ;;  %9879 = vmatpush1.msra.mxu0 %v9018_v17  ;;  %9950 = vmatpush1.msra.mxu1 %v9020_v18  ;;  %v10445_v20 = vld [vmem:[#allocation11 + $0x778] sm:$0xff] }
 0x529   :  { %9942 = vmatprep.mubr.f32.mxu0 %v13857_v1  ;;  %10013 = vmatprep.mubr.f32.mxu1 %v13857_v1 }
 0x52a   :  { %v1620_v30 = vrot.slane %v13343_v26, %v14332_v21  ;;  %v1627_v31 = vrot.slane %v13344_v27, %v14332_v21  ;;  %v618_v32 = vpop.f32.mrb[4].mxu0  ;;  %v689_v33 = vpop.f32.mrb[6].mxu1  ;;  %10020 = vmatprep.subr.mxu0 %v9023_v24  ;;  %10091 = vmatprep.subr.mxu1 %v9025_v25 }
 0x52b   :  { %v620_v34 = vpop.f32.mrb[5].mxu0  ;;  %v691_v35 = vpop.f32.mrb[7].mxu1  ;;  %13531 = vmatmul.mubr.msk.f32.vlgmr.msra.gmra.mrb[110].mxu0 %vm406_vm5, %v14012_v48  ;;  %13532 = vmatmul.mubr.msk.f32.vlgmr.msra.gmra.mrb[112].mxu1 %vm406_vm5, %v14012_v48 }
 0x52c   :  { %v1642_v38 = vcombine.low %v1620_v30, %v1627_v31  ;;  %v13345_v39 = vpack.c.bf16 %v620_v34, %v618_v32  ;;  %v13346_v40 = vpack.c.bf16 %v691_v35, %v689_v33  ;;  %10021 = vmatpush1.msra.mxu0 %v9022_v28  ;;  %10092 = vmatpush1.msra.mxu1 %v9024_v29  ;;  %v10442_v28 = vld [vmem:[#allocation11 + $0x760] sm:$0xff]  ;;  %v10444_v29 = vld [vmem:[#allocation11 + $0x770] sm:$0xff] }
 0x52d   :  { %10084 = vmatprep.mubr.f32.mxu0 %v13857_v1  ;;  %10155 = vmatprep.mubr.f32.mxu1 %v13857_v1 }
 0x52e   :  { %v1634_v43 = vrot.slane %v13345_v39, %v14332_v21  ;;  %v1641_v44 = vrot.slane %v13346_v40, %v14332_v21  ;;  %v760_v45 = vpop.f32.mrb[6].mxu0  ;;  %v831_v46 = vpop.f32.mrb[8].mxu1  ;;  %10462 = vmatprep.subr.mxu0 %v10431_v36  ;;  %10533 = vmatprep.subr.mxu1 %v10433_v37  ;;  %v1650_v55 = vrot.slane %v1642_v38, %v14332_v21  ;;  %v10447_v36 = vld [vmem:[#allocation11 + $0x788] sm:$0xff]  ;;  %v10449_v37 = vld [vmem:[#allocation11 + $0x798] sm:$0xff] }
 0x52f   :  { %v762_v47 = vpop.f32.mrb[7].mxu0  ;;  %v833_v49 = vpop.f32.mrb[9].mxu1  ;;  %13533 = vmatmul.mubr.msk.f32.vlgmr.msra.gmra.mrb[112].mxu0 %vm406_vm5, %v14012_v48  ;;  %13534 = vmatmul.mubr.msk.f32.vlgmr.msra.gmra.mrb[114].mxu1 %vm406_vm5, %v14012_v48 }
 0x530   :  { %v1643_v52 = vcombine.low %v1634_v43, %v1641_v44  ;;  %v13347_v53 = vpack.c.bf16 %v762_v47, %v760_v45  ;;  %v13348_v54 = vpack.c.bf16 %v833_v49, %v831_v46  ;;  %10463 = vmatpush1.msra.mxu0 %v10430_v41  ;;  %10534 = vmatpush1.msra.mxu1 %v10432_v42  ;;  %v10446_v42 = vld [vmem:[#allocation11 + $0x780] sm:$0xff]  ;;  %v10448_v43 = vld [vmem:[#allocation11 + $0x790] sm:$0xff] }
 0x531   :  { %10526 = vmatprep.mubr.f32.mxu0 %v13857_v1  ;;  %10597 = vmatprep.mubr.f32.mxu1 %v13857_v1 }
 0x532   :  { %v1657_v57 = vrot.slane %v1643_v52, %v14332_v21  ;;  %v1669_v58 = vrot.slane %v13347_v53, %v14332_v21  ;;  %v1676_v59 = vrot.slane %v13348_v54, %v14332_v21  ;;  %v902_v60 = vpop.f32.mrb[8].mxu0  ;;  %v973_v61 = vpop.f32.mrb[10].mxu1  ;;  %10604 = vmatprep.subr.mxu0 %v10435_v50  ;;  %10675 = vmatprep.subr.mxu1 %v10437_v51  ;;  %v10451_v50 = vld [vmem:[#allocation11 + $0x7a8] sm:$0xff]  ;;  %v10453_v51 = vld [vmem:[#allocation11 + $0x7b8] sm:$0xff] }
 0x533   :  { %v904_v63 = vpop.f32.mrb[9].mxu0  ;;  %v975_v0 = vpop.f32.mrb[11].mxu1  ;;  %13551 = vmatmul.mubr.msk.f32.vlgmr.msra.gmra.mrb[114].mxu0 %vm406_vm5, %v14012_v48  ;;  %13552 = vmatmul.mubr.msk.f32.vlgmr.msra.gmra.mrb[116].mxu1 %vm406_vm5, %v14012_v48 }
 0x534   :  { %v1658_v3 = vcombine.low %v1650_v55, %v1657_v57  ;;  %v1691_v4 = vcombine.low %v1669_v58, %v1676_v59  ;;  %v13349_v5 = vpack.c.bf16 %v904_v63, %v902_v60  ;;  %v13350_v6 = vpack.c.bf16 %v975_v0, %v973_v61  ;;  %10605 = vmatpush1.msra.mxu0 %v10434_v56  ;;  %v10450_v58 = vld [vmem:[#allocation11 + $0x7a0] sm:$0xff]  ;;  %v10452_v61 = vld [vmem:[#allocation11 + $0x7b0] sm:$0xff] }
 0x535   :  { %10676 = vmatpush1.msra.mxu1 %v10436_v62  ;;  %10668 = vmatprep.mubr.f32.mxu0 %v13857_v1 }
 0x536   :  { %1810 = vst [vmem:[#allocation13] sm:$0xff] %v1658_v3  ;;  %v1683_v9 = vrot.slane %v13349_v5, %v14332_v21  ;;  %v1690_v10 = vrot.slane %v13350_v6, %v14332_v21  ;;  %v1044_v11 = vpop.f32.mrb[10].mxu0  ;;  %v1115_v12 = vpop.f32.mrb[12].mxu1  ;;  %10739 = vmatprep.mubr.f32.mxu1 %v13857_v1  ;;  %10746 = vmatprep.subr.mxu0 %v10439_v2  ;;  %v10455_v3 = vld [vmem:[#allocation11 + $0x7c8] sm:$0xff] }
 0x537   :  { %10817 = vmatprep.subr.mxu1 %v10441_v7  ;;  %v1046_v14 = vpop.f32.mrb[11].mxu0  ;;  %v1117_v15 = vpop.f32.mrb[13].mxu1  ;;  %13553 = vmatmul.mubr.msk.f32.vlgmr.msra.gmra.mrb[116].mxu0 %vm406_vm5, %v14012_v48  ;;  %v1699_v22 = vrot.slane %v1691_v4, %v14332_v21  ;;  %v10457_v4 = vld [vmem:[#allocation11 + $0x7d8] sm:$0xff] }
 0x538   :  { %v1692_v17 = vcombine.low %v1683_v9, %v1690_v10  ;;  %v13351_v18 = vpack.c.bf16 %v1046_v14, %v1044_v11  ;;  %v13352_v19 = vpack.c.bf16 %v1117_v15, %v1115_v12  ;;  %13554 = vmatmul.mubr.msk.f32.vlgmr.msra.gmra.mrb[118].mxu1 %vm406_vm5, %v14012_v48  ;;  %10747 = vmatpush1.msra.mxu0 %v10438_v8  ;;  %v10454_v9 = vld [vmem:[#allocation11 + $0x7c0] sm:$0xff]  ;;  %v10456_v12 = vld [vmem:[#allocation11 + $0x7d0] sm:$0xff] }
 0x539   :  { %10818 = vmatpush1.msra.mxu1 %v10440_v13  ;;  %10810 = vmatprep.mubr.f32.mxu0 %v13857_v1 }
 0x53a   :  { %v1706_v23 = vrot.slane %v1692_v17, %v14332_v21  ;;  %v1718_v24 = vrot.slane %v13351_v18, %v14332_v21  ;;  %v1725_v25 = vrot.slane %v13352_v19, %v14332_v21  ;;  %v1186_v26 = vpop.f32.mrb[12].mxu0  ;;  %v1257_v27 = vpop.f32.mrb[14].mxu1  ;;  %10881 = vmatprep.mubr.f32.mxu1 %v13857_v1  ;;  %10888 = vmatprep.subr.mxu0 %v10443_v16  ;;  %v10459_v16 = vld [vmem:[#allocation11 + $0x7e8] sm:$0xff]  ;;  %v10461_v18 = vld [vmem:[#allocation11 + $0x7f8] sm:$0xff] }
 0x53b   :  { %10959 = vmatprep.subr.mxu1 %v10445_v20  ;;  %v1188_v30 = vpop.f32.mrb[13].mxu0  ;;  %v1259_v31 = vpop.f32.mrb[15].mxu1  ;;  %13555 = vmatmul.mubr.msk.f32.vlgmr.msra.gmra.mrb[118].mxu0 %vm406_vm5, %v14012_v48 }
 0x53c   :  { %v1707_v32 = vcombine.low %v1699_v22, %v1706_v23  ;;  %v1740_v33 = vcombine.low %v1718_v24, %v1725_v25  ;;  %v13353_v34 = vpack.c.bf16 %v1188_v30, %v1186_v26  ;;  %v13354_v35 = vpack.c.bf16 %v1259_v31, %v1257_v27  ;;  %13556 = vmatmul.mubr.msk.f32.vlgmr.msra.gmra.mrb[120].mxu1 %vm406_vm5, %v14012_v48  ;;  %v10458_v27 = vld [vmem:[#allocation11 + $0x7e0] sm:$0xff] }
 0x53d   :  { %10889 = vmatpush1.msra.mxu0 %v10442_v28  ;;  %10960 = vmatpush1.msra.mxu1 %v10444_v29  ;;  %v10460_v28 = vld [vmem:[#allocation11 + $0x7f0] sm:$0xff] }
 0x53e   :  { %1811 = vst [vmem:[#allocation13 + $0x8] sm:$0xff] %v1707_v32  ;;  %v1732_v38 = vrot.slane %v13353_v34, %v14332_v21  ;;  %v1739_v39 = vrot.slane %v13354_v35, %v14332_v21  ;;  %v1328_v40 = vpop.f32.mrb[14].mxu0  ;;  %v1399_v41 = vpop.f32.mrb[16].mxu1  ;;  %10952 = vmatprep.mubr.f32.mxu0 %v13857_v1  ;;  %11023 = vmatprep.mubr.f32.mxu1 %v13857_v1  ;;  %v11869_v34 = vld [vmem:[#allocation11 + $0x818] sm:$0xff] }
 0x53f   :  { %11030 = vmatprep.subr.mxu0 %v10447_v36  ;;  %11101 = vmatprep.subr.mxu1 %v10449_v37  ;;  %v1330_v44 = vpop.f32.mrb[15].mxu0  ;;  %v1401_v45 = vpop.f32.mrb[17].mxu1  ;;  %v1748_v52 = vrot.slane %v1740_v33, %v14332_v21  ;;  %v11867_v33 = vld [vmem:[#allocation11 + $0x808] sm:$0xff] }
 0x540   :  { %v1741_v46 = vcombine.low %v1732_v38, %v1739_v39  ;;  %v13355_v47 = vpack.c.bf16 %v1330_v44, %v1328_v40  ;;  %v13356_v49 = vpack.c.bf16 %v1401_v45, %v1399_v41  ;;  %13557 = vmatmul.mubr.msk.f32.vlgmr.msra.gmra.mrb[120].mxu0 %vm406_vm5, %v14012_v48  ;;  %13558 = vmatmul.mubr.msk.f32.vlgmr.msra.gmra.mrb[122].mxu1 %vm406_vm5, %v14012_v48  ;;  %v11866_v41 = vld [vmem:[#allocation11 + $0x800] sm:$0xff] }
 0x541   :  { %11031 = vmatpush1.msra.mxu0 %v10446_v42  ;;  %11102 = vmatpush1.msra.mxu1 %v10448_v43  ;;  %v11868_v42 = vld [vmem:[#allocation11 + $0x810] sm:$0xff] }
 0x542   :  { %v1755_v53 = vrot.slane %v1741_v46, %v14332_v21  ;;  %v1767_v54 = vrot.slane %v13355_v47, %v14332_v21  ;;  %v1774_v55 = vrot.slane %v13356_v49, %v14332_v21  ;;  %v1470_v56 = vpop.f32.mrb[16].mxu0  ;;  %v1541_v57 = vpop.f32.mrb[18].mxu1  ;;  %11094 = vmatprep.mubr.f32.mxu0 %v13857_v1  ;;  %11165 = vmatprep.mubr.f32.mxu1 %v13857_v1  ;;  %v11871_v47 = vld [vmem:[#allocation11 + $0x828] sm:$0xff]  ;;  %v11873_v49 = vld [vmem:[#allocation11 + $0x838] sm:$0xff] }
 0x543   :  { %11172 = vmatprep.subr.mxu0 %v10451_v50  ;;  %11243 = vmatprep.subr.mxu1 %v10453_v51  ;;  %v1472_v59 = vpop.f32.mrb[17].mxu0  ;;  %v1543_v60 = vpop.f32.mrb[19].mxu1 }
 0x544   :  { %v1756_v62 = vcombine.low %v1748_v52, %v1755_v53  ;;  %v1789_v63 = vcombine.low %v1767_v54, %v1774_v55  ;;  %v13357_v0 = vpack.c.bf16 %v1472_v59, %v1470_v56  ;;  %v13358_v2 = vpack.c.bf16 %v1543_v60, %v1541_v57  ;;  %13559 = vmatmul.mubr.msk.f32.vlgmr.msra.gmra.mrb[122].mxu0 %vm406_vm5, %v14012_v48  ;;  %v11870_v57 = vld [vmem:[#allocation11 + $0x820] sm:$0xff] }
 0x545   :  { %13560 = vmatmul.mubr.msk.f32.vlgmr.msra.gmra.mrb[124].mxu1 %vm406_vm5, %v14012_v48  ;;  %11173 = vmatpush1.msra.mxu0 %v10450_v58  ;;  %v11872_v58 = vld [vmem:[#allocation11 + $0x830] sm:$0xff] }
 0x546   :  { %1812 = vst [vmem:[#allocation13 + $0x10] sm:$0xff] %v1756_v62  ;;  %v1781_v5 = vrot.slane %v13357_v0, %v14332_v21  ;;  %v1788_v6 = vrot.slane %v13358_v2, %v14332_v21  ;;  %11244 = vmatpush1.msra.mxu1 %v10452_v61  ;;  %v1912_v7 = vpop.f32.mrb[18].mxu0  ;;  %v1983_v8 = vpop.f32.mrb[20].mxu1  ;;  %11236 = vmatprep.mubr.f32.mxu0 %v13857_v1  ;;  %v11877_v0 = vld [vmem:[#allocation11 + $0x858] sm:$0xff] }
 0x547   :  { %11307 = vmatprep.mubr.f32.mxu1 %v13857_v1  ;;  %11314 = vmatprep.subr.mxu0 %v10455_v3  ;;  %v1914_v10 = vpop.f32.mrb[19].mxu0  ;;  %v1985_v11 = vpop.f32.mrb[21].mxu1  ;;  %v1797_v17 = vrot.slane %v1789_v63, %v14332_v21  ;;  %v11875_v63 = vld [vmem:[#allocation11 + $0x848] sm:$0xff] }
 0x548   :  { %v1790_v13 = vcombine.low %v1781_v5, %v1788_v6  ;;  %11385 = vmatprep.subr.mxu1 %v10457_v4  ;;  %v13375_v14 = vpack.c.bf16 %v1914_v10, %v1912_v7  ;;  %v13376_v15 = vpack.c.bf16 %v1985_v11, %v1983_v8  ;;  %13561 = vmatmul.mubr.msk.f32.vlgmr.msra.gmra.mrb[124].mxu0 %vm406_vm5, %v14012_v48  ;;  %v11874_v8 = vld [vmem:[#allocation11 + $0x840] sm:$0xff] }
 0x549   :  { %13562 = vmatmul.mubr.msk.f32.vlgmr.msra.gmra.mrb[126].mxu1 %vm406_vm5, %v14012_v48  ;;  %11315 = vmatpush1.msra.mxu0 %v10454_v9  ;;  %v11876_v9 = vld [vmem:[#allocation11 + $0x850] sm:$0xff] }
 0x54a   :  { %v1804_v19 = vrot.slane %v1790_v13, %v14332_v21  ;;  %v3056_v20 = vrot.slane %v13375_v14, %v14332_v21  ;;  %v3063_v22 = vrot.slane %v13376_v15, %v14332_v21  ;;  %11386 = vmatpush1.msra.mxu1 %v10456_v12  ;;  %v2054_v23 = vpop.f32.mrb[20].mxu0  ;;  %v2125_v24 = vpop.f32.mrb[22].mxu1  ;;  %11378 = vmatprep.mubr.f32.mxu0 %v13857_v1  ;;  %v11879_v13 = vld [vmem:[#allocation11 + $0x868] sm:$0xff]  ;;  %v11881_v14 = vld [vmem:[#allocation11 + $0x878] sm:$0xff] }
 0x54b   :  { %11449 = vmatprep.mubr.f32.mxu1 %v13857_v1  ;;  %11456 = vmatprep.subr.mxu0 %v10459_v16  ;;  %v2056_v25 = vpop.f32.mrb[21].mxu0  ;;  %v2127_v26 = vpop.f32.mrb[23].mxu1 }
 0x54c   :  { %v1805_v29 = vcombine.low %v1797_v17, %v1804_v19  ;;  %v3078_v30 = vcombine.low %v3056_v20, %v3063_v22  ;;  %11527 = vmatprep.subr.mxu1 %v10461_v18  ;;  %v13377_v31 = vpack.c.bf16 %v2056_v25, %v2054_v23  ;;  %v13378_v32 = vpack.c.bf16 %v2127_v26, %v2125_v24  ;;  %v11878_v24 = vld [vmem:[#allocation11 + $0x860] sm:$0xff]  ;;  %v11880_v25 = vld [vmem:[#allocation11 + $0x870] sm:$0xff] }
 0x54d   :  { %13563 = vmatmul.mubr.msk.f32.vlgmr.msra.gmra.mrb[126].mxu0 %vm406_vm5, %v14012_v48  ;;  %13564 = vmatmul.mubr.msk.f32.vlgmr.msra.gmra.mrb[128].mxu1 %vm406_vm5, %v14012_v48 }
 0x54e   :  { %1813 = vst [vmem:[#allocation13 + $0x18] sm:$0xff] %v1805_v29  ;;  %v3070_v35 = vrot.slane %v13377_v31, %v14332_v21  ;;  %v3077_v36 = vrot.slane %v13378_v32, %v14332_v21  ;;  %11457 = vmatpush1.msra.mxu0 %v10458_v27  ;;  %11528 = vmatpush1.msra.mxu1 %v10460_v28  ;;  %v2196_v37 = vpop.f32.mrb[22].mxu0  ;;  %v2267_v38 = vpop.f32.mrb[24].mxu1  ;;  %v11885_v31 = vld [vmem:[#allocation11 + $0x898] sm:$0xff] }
 0x54f   :  { %11520 = vmatprep.mubr.f32.mxu0 %v13857_v1  ;;  %11591 = vmatprep.mubr.f32.mxu1 %v13857_v1  ;;  %v2198_v39 = vpop.f32.mrb[23].mxu0  ;;  %v2269_v40 = vpop.f32.mrb[25].mxu1  ;;  %v3086_v46 = vrot.slane %v3078_v30, %v14332_v21  ;;  %v11883_v30 = vld [vmem:[#allocation11 + $0x888] sm:$0xff] }
 0x550   :  { %v3079_v43 = vcombine.low %v3070_v35, %v3077_v36  ;;  %11898 = vmatprep.subr.mxu0 %v11867_v33  ;;  %11969 = vmatprep.subr.mxu1 %v11869_v34  ;;  %v13379_v44 = vpack.c.bf16 %v2198_v39, %v2196_v37  ;;  %v13380_v45 = vpack.c.bf16 %v2269_v40, %v2267_v38  ;;  %v11882_v38 = vld [vmem:[#allocation11 + $0x880] sm:$0xff]  ;;  %v11884_v39 = vld [vmem:[#allocation11 + $0x890] sm:$0xff] }
 0x551   :  { %13565 = vmatmul.mubr.msk.f32.vlgmr.msra.gmra.mrb[128].mxu0 %vm406_vm5, %v14012_v48  ;;  %13566 = vmatmul.mubr.msk.f32.vlgmr.msra.gmra.mrb[130].mxu1 %vm406_vm5, %v14012_v48 }
 0x552   :  { %v3093_v50 = vrot.slane %v3079_v43, %v14332_v21  ;;  %v3105_v51 = vrot.slane %v13379_v44, %v14332_v21  ;;  %v3112_v52 = vrot.slane %v13380_v45, %v14332_v21  ;;  %11899 = vmatpush1.msra.mxu0 %v11866_v41  ;;  %11970 = vmatpush1.msra.mxu1 %v11868_v42  ;;  %v2338_v53 = vpop.f32.mrb[24].mxu0  ;;  %v2409_v54 = vpop.f32.mrb[26].mxu1  ;;  %v11887_v44 = vld [vmem:[#allocation11 + $0x8a8] sm:$0xff]  ;;  %v11889_v45 = vld [vmem:[#allocation11 + $0x8b8] sm:$0xff] }
 0x553   :  { %11962 = vmatprep.mubr.f32.mxu0 %v13857_v1  ;;  %12033 = vmatprep.mubr.f32.mxu1 %v13857_v1  ;;  %v2340_v55 = vpop.f32.mrb[25].mxu0  ;;  %v2411_v56 = vpop.f32.mrb[27].mxu1 }
 0x554   :  { %v3094_v59 = vcombine.low %v3086_v46, %v3093_v50  ;;  %v3127_v60 = vcombine.low %v3105_v51, %v3112_v52  ;;  %12040 = vmatprep.subr.mxu0 %v11871_v47  ;;  %12111 = vmatprep.subr.mxu1 %v11873_v49  ;;  %v13381_v61 = vpack.c.bf16 %v2340_v55, %v2338_v53  ;;  %v11888_v55 = vld [vmem:[#allocation11 + $0x8b0] sm:$0xff] }
 0x555   :  { %v13382_v62 = vpack.c.bf16 %v2411_v56, %v2409_v54  ;;  %13583 = vmatmul.mubr.msk.f32.vlgmr.msra.gmra.mrb[130].mxu0 %vm406_vm5, %v14012_v48  ;;  %13584 = vmatmul.mubr.msk.f32.vlgmr.msra.gmra.mrb[132].mxu1 %vm406_vm5, %v14012_v48  ;;  %v11886_v54 = vld [vmem:[#allocation11 + $0x8a0] sm:$0xff] }
 0x556   :  { %3246 = vst [vmem:[#allocation13 + $0x20] sm:$0xff] %v3094_v59  ;;  %v3119_v2 = vrot.slane %v13381_v61, %v14332_v21  ;;  %12041 = vmatpush1.msra.mxu0 %v11870_v57  ;;  %12112 = vmatpush1.msra.mxu1 %v11872_v58  ;;  %v2480_v3 = vpop.f32.mrb[26].mxu0  ;;  %v2551_v4 = vpop.f32.mrb[28].mxu1  ;;  %v3135_v19 = vrot.slane %v3127_v60, %v14332_v21  ;;  %v11891_v60 = vld [vmem:[#allocation11 + $0x8c8] sm:$0xff]  ;;  %v11893_v61 = vld [vmem:[#allocation11 + $0x8d8] sm:$0xff] }
 0x557   :  { %v3126_v5 = vrot.slane %v13382_v62, %v14332_v21  ;;  %12104 = vmatprep.mubr.f32.mxu0 %v13857_v1  ;;  %12175 = vmatprep.mubr.f32.mxu1 %v13857_v1  ;;  %v2482_v6 = vpop.f32.mrb[27].mxu0  ;;  %v2553_v7 = vpop.f32.mrb[29].mxu1 }
 0x558   :  { %12182 = vmatprep.subr.mxu0 %v11875_v63  ;;  %12253 = vmatprep.subr.mxu1 %v11877_v0  ;;  %v13383_v10 = vpack.c.bf16 %v2482_v6, %v2480_v3  ;;  %v13384_v11 = vpack.c.bf16 %v2553_v7, %v2551_v4  ;;  %v11892_v6 = vld [vmem:[#allocation11 + $0x8d0] sm:$0xff] }
 0x559   :  { %v3128_v12 = vcombine.low %v3119_v2, %v3126_v5  ;;  %13585 = vmatmul.mubr.msk.f32.vlgmr.msra.gmra.mrb[132].mxu0 %vm406_vm5, %v14012_v48  ;;  %13586 = vmatmul.mubr.msk.f32.vlgmr.msra.gmra.mrb[134].mxu1 %vm406_vm5, %v14012_v48  ;;  %v11890_v5 = vld [vmem:[#allocation11 + $0x8c0] sm:$0xff] }
 0x55a   :  { %v3154_v15 = vrot.slane %v13383_v10, %v14332_v21  ;;  %v3161_v16 = vrot.slane %v13384_v11, %v14332_v21  ;;  %12183 = vmatpush1.msra.mxu0 %v11874_v8  ;;  %12254 = vmatpush1.msra.mxu1 %v11876_v9  ;;  %v2622_v17 = vpop.f32.mrb[28].mxu0  ;;  %v2693_v18 = vpop.f32.mrb[30].mxu1  ;;  %v11895_v10 = vld [vmem:[#allocation11 + $0x8e8] sm:$0xff]  ;;  %v11897_v11 = vld [vmem:[#allocation11 + $0x8f8] sm:$0xff] }
 0x55b   :  { %v3142_v20 = vrot.slane %v3128_v12, %v14332_v21  ;;  %12246 = vmatprep.mubr.f32.mxu0 %v13857_v1  ;;  %12317 = vmatprep.mubr.f32.mxu1 %v13857_v1  ;;  %v2624_v22 = vpop.f32.mrb[29].mxu0  ;;  %v2695_v23 = vpop.f32.mrb[31].mxu1 }
 0x55c   :  { %v3176_v26 = vcombine.low %v3154_v15, %v3161_v16  ;;  %12324 = vmatprep.subr.mxu0 %v11879_v13  ;;  %12395 = vmatprep.subr.mxu1 %v11881_v14  ;;  %v13385_v27 = vpack.c.bf16 %v2624_v22, %v2622_v17  ;;  %v13386_v28 = vpack.c.bf16 %v2695_v23, %v2693_v18  ;;  %v11896_v22 = vld [vmem:[#allocation11 + $0x8f0] sm:$0xff] }
 0x55d   :  { %v3143_v29 = vcombine.low %v3135_v19, %v3142_v20  ;;  %13587 = vmatmul.mubr.msk.f32.vlgmr.msra.gmra.mrb[134].mxu0 %vm406_vm5, %v14012_v48  ;;  %13588 = vmatmul.mubr.msk.f32.vlgmr.msra.gmra.mrb[136].mxu1 %vm406_vm5, %v14012_v48  ;;  %v11894_v20 = vld [vmem:[#allocation11 + $0x8e0] sm:$0xff] }
 0x55e   :  { %v3168_v32 = vrot.slane %v13385_v27, %v14332_v21  ;;  %v3175_v33 = vrot.slane %v13386_v28, %v14332_v21  ;;  %12325 = vmatpush1.msra.mxu0 %v11878_v24  ;;  %12396 = vmatpush1.msra.mxu1 %v11880_v25  ;;  %v2764_v34 = vpop.f32.mrb[30].mxu0  ;;  %v2835_v35 = vpop.f32.mrb[32].mxu1  ;;  %v3184_v43 = vrot.slane %v3176_v26, %v14332_v21 }
 0x55f   :  { %3247 = vst [vmem:[#allocation13 + $0x28] sm:$0xff] %v3143_v29  ;;  %12388 = vmatprep.mubr.f32.mxu0 %v13857_v1  ;;  %12459 = vmatprep.mubr.f32.mxu1 %v13857_v1  ;;  %v2766_v36 = vpop.f32.mrb[31].mxu0  ;;  %v2837_v37 = vpop.f32.mrb[33].mxu1 }
 0x560   :  { %v3177_v40 = vcombine.low %v3168_v32, %v3175_v33  ;;  %12466 = vmatprep.subr.mxu0 %v11883_v30  ;;  %12537 = vmatprep.subr.mxu1 %v11885_v31  ;;  %v13387_v41 = vpack.c.bf16 %v2766_v36, %v2764_v34  ;;  %v13388_v42 = vpack.c.bf16 %v2837_v37, %v2835_v35 }
 0x561   :  { %13589 = vmatmul.mubr.msk.f32.vlgmr.msra.gmra.mrb[136].mxu0 %vm406_vm5, %v14012_v48  ;;  %13590 = vmatmul.mubr.msk.f32.vlgmr.msra.gmra.mrb[138].mxu1 %vm406_vm5, %v14012_v48 }
 0x562   :  { %v3191_v46 = vrot.slane %v3177_v40, %v14332_v21  ;;  %v3203_v47 = vrot.slane %v13387_v41, %v14332_v21  ;;  %v3210_v49 = vrot.slane %v13388_v42, %v14332_v21  ;;  %12467 = vmatpush1.msra.mxu0 %v11882_v38  ;;  %12538 = vmatpush1.msra.mxu1 %v11884_v39  ;;  %v2906_v50 = vpop.f32.mrb[32].mxu0  ;;  %v2977_v51 = vpop.f32.mrb[34].mxu1 }
 0x563   :  { %12530 = vmatprep.mubr.f32.mxu0 %v13857_v1  ;;  %12601 = vmatprep.mubr.f32.mxu1 %v13857_v1  ;;  %v2908_v52 = vpop.f32.mrb[33].mxu0  ;;  %v2979_v53 = vpop.f32.mrb[35].mxu1 }
 0x564   :  { %v3192_v56 = vcombine.low %v3184_v43, %v3191_v46  ;;  %v3225_v57 = vcombine.low %v3203_v47, %v3210_v49  ;;  %12608 = vmatprep.subr.mxu0 %v11887_v44  ;;  %12679 = vmatprep.subr.mxu1 %v11889_v45  ;;  %v13389_v58 = vpack.c.bf16 %v2908_v52, %v2906_v50 }
 0x565   :  { %v13390_v59 = vpack.c.bf16 %v2979_v53, %v2977_v51  ;;  %13591 = vmatmul.mubr.msk.f32.vlgmr.msra.gmra.mrb[138].mxu0 %vm406_vm5, %v14012_v48  ;;  %13592 = vmatmul.mubr.msk.f32.vlgmr.msra.gmra.mrb[140].mxu1 %vm406_vm5, %v14012_v48 }
 0x566   :  { %3248 = vst [vmem:[#allocation13 + $0x30] sm:$0xff] %v3192_v56  ;;  %v3217_v62 = vrot.slane %v13389_v58, %v14332_v21  ;;  %12609 = vmatpush1.msra.mxu0 %v11886_v54  ;;  %12680 = vmatpush1.msra.mxu1 %v11888_v55  ;;  %v3348_v63 = vpop.f32.mrb[34].mxu0  ;;  %v3419_v0 = vpop.f32.mrb[36].mxu1  ;;  %v3233_v16 = vrot.slane %v3225_v57, %v14332_v21 }
 0x567   :  { %v3224_v2 = vrot.slane %v13390_v59, %v14332_v21  ;;  %12672 = vmatprep.mubr.f32.mxu0 %v13857_v1  ;;  %12743 = vmatprep.mubr.f32.mxu1 %v13857_v1  ;;  %v3350_v3 = vpop.f32.mrb[35].mxu0  ;;  %v3421_v4 = vpop.f32.mrb[37].mxu1 }
 0x568   :  { %12750 = vmatprep.subr.mxu0 %v11891_v60  ;;  %12821 = vmatprep.subr.mxu1 %v11893_v61  ;;  %v13407_v7 = vpack.c.bf16 %v3350_v3, %v3348_v63  ;;  %v13408_v8 = vpack.c.bf16 %v3421_v4, %v3419_v0 }
 0x569   :  { %v3226_v9 = vcombine.low %v3217_v62, %v3224_v2  ;;  %13593 = vmatmul.mubr.msk.f32.vlgmr.msra.gmra.mrb[140].mxu0 %vm406_vm5, %v14012_v48  ;;  %13594 = vmatmul.mubr.msk.f32.vlgmr.msra.gmra.mrb[142].mxu1 %vm406_vm5, %v14012_v48 }
 0x56a   :  { %v4492_v12 = vrot.slane %v13407_v7, %v14332_v21  ;;  %v4499_v13 = vrot.slane %v13408_v8, %v14332_v21  ;;  %12751 = vmatpush1.msra.mxu0 %v11890_v5  ;;  %12822 = vmatpush1.msra.mxu1 %v11892_v6  ;;  %v3490_v14 = vpop.f32.mrb[36].mxu0  ;;  %v3561_v15 = vpop.f32.mrb[38].mxu1 }
 0x56b   :  { %v3240_v17 = vrot.slane %v3226_v9, %v14332_v21  ;;  %12814 = vmatprep.mubr.f32.mxu0 %v13857_v1  ;;  %12885 = vmatprep.mubr.f32.mxu1 %v13857_v1  ;;  %v3492_v18 = vpop.f32.mrb[37].mxu0  ;;  %v3563_v19 = vpop.f32.mrb[39].mxu1 }
 0x56c   :  { %v4514_v23 = vcombine.low %v4492_v12, %v4499_v13  ;;  %12892 = vmatprep.subr.mxu0 %v11895_v10  ;;  %12963 = vmatprep.subr.mxu1 %v11897_v11  ;;  %v13409_v24 = vpack.c.bf16 %v3492_v18, %v3490_v14  ;;  %v13410_v25 = vpack.c.bf16 %v3563_v19, %v3561_v15 }
 0x56d   :  { %v3241_v26 = vcombine.low %v3233_v16, %v3240_v17  ;;  %13595 = vmatmul.mubr.msk.f32.vlgmr.msra.gmra.mrb[142].mxu0 %vm406_vm5, %v14012_v48  ;;  %13596 = vmatmul.mubr.msk.f32.vlgmr.msra.gmra.mrb[144].mxu1 %vm406_vm5, %v14012_v48 }
 0x56e   :  { %v4506_v27 = vrot.slane %v13409_v24, %v14332_v21  ;;  %v4513_v28 = vrot.slane %v13410_v25, %v14332_v21  ;;  %12893 = vmatpush1.msra.mxu0 %v11894_v20  ;;  %12964 = vmatpush1.msra.mxu1 %v11896_v22  ;;  %v3632_v29 = vpop.f32.mrb[38].mxu0  ;;  %v3703_v30 = vpop.f32.mrb[40].mxu1  ;;  %v4522_v36 = vrot.slane %v4514_v23, %v14332_v21 }
 0x56f   :  { %3249 = vst [vmem:[#allocation13 + $0x38] sm:$0xff] %v3241_v26  ;;  %12956 = vmatprep.mubr.f32.mxu0 %v13857_v1  ;;  %13027 = vmatprep.mubr.f32.mxu1 %v13857_v1  ;;  %v3634_v31 = vpop.f32.mrb[39].mxu0  ;;  %v3705_v32 = vpop.f32.mrb[41].mxu1 }
 0x570   :  { %v4515_v33 = vcombine.low %v4506_v27, %v4513_v28  ;;  %v13411_v34 = vpack.c.bf16 %v3634_v31, %v3632_v29  ;;  %v13412_v35 = vpack.c.bf16 %v3705_v32, %v3703_v30 }
 0x571   :  { %13597 = vmatmul.mubr.msk.f32.vlgmr.msra.gmra.mrb[144].mxu0 %vm406_vm5, %v14012_v48  ;;  %13598 = vmatmul.mubr.msk.f32.vlgmr.msra.gmra.mrb[146].mxu1 %vm406_vm5, %v14012_v48 }
 0x572   :  { %v4529_v37 = vrot.slane %v4515_v33, %v14332_v21  ;;  %v4541_v38 = vrot.slane %v13411_v34, %v14332_v21  ;;  %v4548_v39 = vrot.slane %v13412_v35, %v14332_v21  ;;  %v3774_v1 = vpop.f32.mrb[40].mxu0  ;;  %v3845_v40 = vpop.f32.mrb[42].mxu1 }
 0x573   :  { %v3776_v41 = vpop.f32.mrb[41].mxu0  ;;  %v3847_v42 = vpop.f32.mrb[43].mxu1 }
 0x574   :  { %v4530_v43 = vcombine.low %v4522_v36, %v4529_v37  ;;  %v4563_v44 = vcombine.low %v4541_v38, %v4548_v39  ;;  %v13413_v45 = vpack.c.bf16 %v3776_v41, %v3774_v1  ;;  %v13414_v46 = vpack.c.bf16 %v3847_v42, %v3845_v40 }
 0x576   :  { %4682 = vst [vmem:[#allocation13 + $0x40] sm:$0xff] %v4530_v43  ;;  %v4555_v47 = vrot.slane %v13413_v45, %v14332_v21  ;;  %v4562_v48 = vrot.slane %v13414_v46, %v14332_v21  ;;  %v3916_v49 = vpop.f32.mrb[42].mxu0  ;;  %v3987_v50 = vpop.f32.mrb[44].mxu1  ;;  %v4571_v56 = vrot.slane %v4563_v44, %v14332_v21 }
 0x577   :  { %v3918_v51 = vpop.f32.mrb[43].mxu0  ;;  %v3989_v52 = vpop.f32.mrb[45].mxu1 }
 0x578   :  { %v4564_v53 = vcombine.low %v4555_v47, %v4562_v48  ;;  %v13415_v54 = vpack.c.bf16 %v3918_v51, %v3916_v49  ;;  %v13416_v55 = vpack.c.bf16 %v3989_v52, %v3987_v50 }
 0x57a   :  { %v4578_v57 = vrot.slane %v4564_v53, %v14332_v21  ;;  %v4590_v58 = vrot.slane %v13415_v54, %v14332_v21  ;;  %v4597_v59 = vrot.slane %v13416_v55, %v14332_v21  ;;  %v4058_v60 = vpop.f32.mrb[44].mxu0  ;;  %v4129_v61 = vpop.f32.mrb[46].mxu1 }
 0x57b   :  { %v4060_v62 = vpop.f32.mrb[45].mxu0  ;;  %v4131_v63 = vpop.f32.mrb[47].mxu1 }
 0x57c   :  { %v4579_v0 = vcombine.low %v4571_v56, %v4578_v57  ;;  %v4612_v2 = vcombine.low %v4590_v58, %v4597_v59  ;;  %v13417_v3 = vpack.c.bf16 %v4060_v62, %v4058_v60  ;;  %v13418_v4 = vpack.c.bf16 %v4131_v63, %v4129_v61 }
 0x57e   :  { %4683 = vst [vmem:[#allocation13 + $0x48] sm:$0xff] %v4579_v0  ;;  %v4604_v5 = vrot.slane %v13417_v3, %v14332_v21  ;;  %v4611_v6 = vrot.slane %v13418_v4, %v14332_v21  ;;  %v4200_v7 = vpop.f32.mrb[46].mxu0  ;;  %v4271_v8 = vpop.f32.mrb[48].mxu1  ;;  %v4620_v14 = vrot.slane %v4612_v2, %v14332_v21 }
 0x57f   :  { %v4202_v9 = vpop.f32.mrb[47].mxu0  ;;  %v4273_v10 = vpop.f32.mrb[49].mxu1 }
 0x580   :  { %v4613_v11 = vcombine.low %v4604_v5, %v4611_v6  ;;  %v13419_v12 = vpack.c.bf16 %v4202_v9, %v4200_v7  ;;  %v13420_v13 = vpack.c.bf16 %v4273_v10, %v4271_v8 }
 0x582   :  { %v4627_v15 = vrot.slane %v4613_v11, %v14332_v21  ;;  %v4639_v16 = vrot.slane %v13419_v12, %v14332_v21  ;;  %v4646_v17 = vrot.slane %v13420_v13, %v14332_v21  ;;  %v4342_v18 = vpop.f32.mrb[48].mxu0  ;;  %v4413_v19 = vpop.f32.mrb[50].mxu1 }
 0x583   :  { %v4344_v20 = vpop.f32.mrb[49].mxu0  ;;  %v4415_v22 = vpop.f32.mrb[51].mxu1 }
 0x584   :  { %v4628_v23 = vcombine.low %v4620_v14, %v4627_v15  ;;  %v4661_v24 = vcombine.low %v4639_v16, %v4646_v17  ;;  %v13421_v25 = vpack.c.bf16 %v4344_v20, %v4342_v18  ;;  %v13422_v26 = vpack.c.bf16 %v4415_v22, %v4413_v19 }
 0x586   :  { %4684 = vst [vmem:[#allocation13 + $0x50] sm:$0xff] %v4628_v23  ;;  %v4653_v27 = vrot.slane %v13421_v25, %v14332_v21  ;;  %v4660_v28 = vrot.slane %v13422_v26, %v14332_v21  ;;  %v4784_v29 = vpop.f32.mrb[50].mxu0  ;;  %v4855_v30 = vpop.f32.mrb[52].mxu1  ;;  %v4669_v36 = vrot.slane %v4661_v24, %v14332_v21 }
 0x587   :  { %v4786_v31 = vpop.f32.mrb[51].mxu0  ;;  %v4857_v32 = vpop.f32.mrb[53].mxu1 }
 0x588   :  { %v4662_v33 = vcombine.low %v4653_v27, %v4660_v28  ;;  %v13439_v34 = vpack.c.bf16 %v4786_v31, %v4784_v29  ;;  %v13440_v35 = vpack.c.bf16 %v4857_v32, %v4855_v30 }
 0x58a   :  { %v4676_v37 = vrot.slane %v4662_v33, %v14332_v21  ;;  %v5928_v38 = vrot.slane %v13439_v34, %v14332_v21  ;;  %v5935_v39 = vrot.slane %v13440_v35, %v14332_v21  ;;  %v4926_v1 = vpop.f32.mrb[52].mxu0  ;;  %v4997_v40 = vpop.f32.mrb[54].mxu1 }
 0x58b   :  { %v4928_v41 = vpop.f32.mrb[53].mxu0  ;;  %v4999_v42 = vpop.f32.mrb[55].mxu1 }
 0x58c   :  { %v4677_v43 = vcombine.low %v4669_v36, %v4676_v37  ;;  %v5950_v44 = vcombine.low %v5928_v38, %v5935_v39  ;;  %v13441_v45 = vpack.c.bf16 %v4928_v41, %v4926_v1  ;;  %v13442_v46 = vpack.c.bf16 %v4999_v42, %v4997_v40 }
 0x58e   :  { %4685 = vst [vmem:[#allocation13 + $0x58] sm:$0xff] %v4677_v43  ;;  %v5942_v47 = vrot.slane %v13441_v45, %v14332_v21  ;;  %v5949_v48 = vrot.slane %v13442_v46, %v14332_v21  ;;  %v5068_v49 = vpop.f32.mrb[54].mxu0  ;;  %v5139_v50 = vpop.f32.mrb[56].mxu1  ;;  %v5958_v56 = vrot.slane %v5950_v44, %v14332_v21 }
 0x58f   :  { %v5070_v51 = vpop.f32.mrb[55].mxu0  ;;  %v5141_v52 = vpop.f32.mrb[57].mxu1 }
 0x590   :  { %v5951_v53 = vcombine.low %v5942_v47, %v5949_v48  ;;  %v13443_v54 = vpack.c.bf16 %v5070_v51, %v5068_v49  ;;  %v13444_v55 = vpack.c.bf16 %v5141_v52, %v5139_v50 }
 0x592   :  { %v5965_v57 = vrot.slane %v5951_v53, %v14332_v21  ;;  %v5977_v58 = vrot.slane %v13443_v54, %v14332_v21  ;;  %v5984_v59 = vrot.slane %v13444_v55, %v14332_v21  ;;  %v5210_v60 = vpop.f32.mrb[56].mxu0  ;;  %v5281_v61 = vpop.f32.mrb[58].mxu1 }
 0x593   :  { %v5212_v62 = vpop.f32.mrb[57].mxu0  ;;  %v5283_v63 = vpop.f32.mrb[59].mxu1 }
 0x594   :  { %v5966_v0 = vcombine.low %v5958_v56, %v5965_v57  ;;  %v5999_v2 = vcombine.low %v5977_v58, %v5984_v59  ;;  %v13445_v3 = vpack.c.bf16 %v5212_v62, %v5210_v60  ;;  %v13446_v4 = vpack.c.bf16 %v5283_v63, %v5281_v61 }
 0x596   :  { %6118 = vst [vmem:[#allocation13 + $0x60] sm:$0xff] %v5966_v0  ;;  %v5991_v5 = vrot.slane %v13445_v3, %v14332_v21  ;;  %v5998_v6 = vrot.slane %v13446_v4, %v14332_v21  ;;  %v5352_v7 = vpop.f32.mrb[58].mxu0  ;;  %v5423_v8 = vpop.f32.mrb[60].mxu1  ;;  %v6007_v14 = vrot.slane %v5999_v2, %v14332_v21 }
 0x597   :  { %v5354_v9 = vpop.f32.mrb[59].mxu0  ;;  %v5425_v10 = vpop.f32.mrb[61].mxu1 }
 0x598   :  { %v6000_v11 = vcombine.low %v5991_v5, %v5998_v6  ;;  %v13447_v12 = vpack.c.bf16 %v5354_v9, %v5352_v7  ;;  %v13448_v13 = vpack.c.bf16 %v5425_v10, %v5423_v8 }
 0x59a   :  { %v6014_v15 = vrot.slane %v6000_v11, %v14332_v21  ;;  %v6026_v16 = vrot.slane %v13447_v12, %v14332_v21  ;;  %v6033_v17 = vrot.slane %v13448_v13, %v14332_v21  ;;  %v5494_v18 = vpop.f32.mrb[60].mxu0  ;;  %v5565_v19 = vpop.f32.mrb[62].mxu1 }
 0x59b   :  { %v5496_v20 = vpop.f32.mrb[61].mxu0  ;;  %v5567_v22 = vpop.f32.mrb[63].mxu1 }
 0x59c   :  { %v6015_v23 = vcombine.low %v6007_v14, %v6014_v15  ;;  %v6048_v24 = vcombine.low %v6026_v16, %v6033_v17  ;;  %v13449_v25 = vpack.c.bf16 %v5496_v20, %v5494_v18  ;;  %v13450_v26 = vpack.c.bf16 %v5567_v22, %v5565_v19 }
 0x59e   :  { %6119 = vst [vmem:[#allocation13 + $0x68] sm:$0xff] %v6015_v23  ;;  %v6040_v27 = vrot.slane %v13449_v25, %v14332_v21  ;;  %v6047_v28 = vrot.slane %v13450_v26, %v14332_v21  ;;  %v5636_v29 = vpop.f32.mrb[62].mxu0  ;;  %v5707_v30 = vpop.f32.mrb[64].mxu1  ;;  %v6056_v36 = vrot.slane %v6048_v24, %v14332_v21 }
 0x59f   :  { %v5638_v31 = vpop.f32.mrb[63].mxu0  ;;  %v5709_v32 = vpop.f32.mrb[65].mxu1 }
 0x5a0   :  { %v6049_v33 = vcombine.low %v6040_v27, %v6047_v28  ;;  %v13451_v34 = vpack.c.bf16 %v5638_v31, %v5636_v29  ;;  %v13452_v35 = vpack.c.bf16 %v5709_v32, %v5707_v30 }
 0x5a2   :  { %v6063_v37 = vrot.slane %v6049_v33, %v14332_v21  ;;  %v6075_v38 = vrot.slane %v13451_v34, %v14332_v21  ;;  %v6082_v39 = vrot.slane %v13452_v35, %v14332_v21  ;;  %v5778_v1 = vpop.f32.mrb[64].mxu0  ;;  %v5849_v40 = vpop.f32.mrb[66].mxu1 }
 0x5a3   :  { %v5780_v41 = vpop.f32.mrb[65].mxu0  ;;  %v5851_v42 = vpop.f32.mrb[67].mxu1 }
 0x5a4   :  { %v6064_v43 = vcombine.low %v6056_v36, %v6063_v37  ;;  %v6097_v44 = vcombine.low %v6075_v38, %v6082_v39  ;;  %v13453_v45 = vpack.c.bf16 %v5780_v41, %v5778_v1  ;;  %v13454_v46 = vpack.c.bf16 %v5851_v42, %v5849_v40 }
 0x5a6   :  { %6120 = vst [vmem:[#allocation13 + $0x70] sm:$0xff] %v6064_v43  ;;  %v6089_v47 = vrot.slane %v13453_v45, %v14332_v21  ;;  %v6096_v48 = vrot.slane %v13454_v46, %v14332_v21  ;;  %v6220_v49 = vpop.f32.mrb[66].mxu0  ;;  %v6291_v50 = vpop.f32.mrb[68].mxu1  ;;  %v6105_v56 = vrot.slane %v6097_v44, %v14332_v21 }
 0x5a7   :  { %v6222_v51 = vpop.f32.mrb[67].mxu0  ;;  %v6293_v52 = vpop.f32.mrb[69].mxu1 }
 0x5a8   :  { %v6098_v53 = vcombine.low %v6089_v47, %v6096_v48  ;;  %v13471_v54 = vpack.c.bf16 %v6222_v51, %v6220_v49  ;;  %v13472_v55 = vpack.c.bf16 %v6293_v52, %v6291_v50 }
 0x5aa   :  { %v6112_v57 = vrot.slane %v6098_v53, %v14332_v21  ;;  %v7364_v58 = vrot.slane %v13471_v54, %v14332_v21  ;;  %v7371_v59 = vrot.slane %v13472_v55, %v14332_v21  ;;  %v6362_v60 = vpop.f32.mrb[68].mxu0  ;;  %v6433_v61 = vpop.f32.mrb[70].mxu1 }
 0x5ab   :  { %v6364_v62 = vpop.f32.mrb[69].mxu0  ;;  %v6435_v63 = vpop.f32.mrb[71].mxu1 }
 0x5ac   :  { %v6113_v0 = vcombine.low %v6105_v56, %v6112_v57  ;;  %v7386_v2 = vcombine.low %v7364_v58, %v7371_v59  ;;  %v13473_v3 = vpack.c.bf16 %v6364_v62, %v6362_v60  ;;  %v13474_v4 = vpack.c.bf16 %v6435_v63, %v6433_v61 }
 0x5ae   :  { %6121 = vst [vmem:[#allocation13 + $0x78] sm:$0xff] %v6113_v0  ;;  %v7378_v5 = vrot.slane %v13473_v3, %v14332_v21  ;;  %v7385_v6 = vrot.slane %v13474_v4, %v14332_v21  ;;  %v6504_v7 = vpop.f32.mrb[70].mxu0  ;;  %v6575_v8 = vpop.f32.mrb[72].mxu1  ;;  %v7394_v14 = vrot.slane %v7386_v2, %v14332_v21 }
 0x5af   :  { %v6506_v9 = vpop.f32.mrb[71].mxu0  ;;  %v6577_v10 = vpop.f32.mrb[73].mxu1 }
 0x5b0   :  { %v7387_v11 = vcombine.low %v7378_v5, %v7385_v6  ;;  %v13475_v12 = vpack.c.bf16 %v6506_v9, %v6504_v7  ;;  %v13476_v13 = vpack.c.bf16 %v6577_v10, %v6575_v8 }
 0x5b2   :  { %v7401_v15 = vrot.slane %v7387_v11, %v14332_v21  ;;  %v7413_v16 = vrot.slane %v13475_v12, %v14332_v21  ;;  %v7420_v17 = vrot.slane %v13476_v13, %v14332_v21  ;;  %v6646_v18 = vpop.f32.mrb[72].mxu0  ;;  %v6717_v19 = vpop.f32.mrb[74].mxu1 }
 0x5b3   :  { %v6648_v20 = vpop.f32.mrb[73].mxu0  ;;  %v6719_v22 = vpop.f32.mrb[75].mxu1 }
 0x5b4   :  { %v7402_v23 = vcombine.low %v7394_v14, %v7401_v15  ;;  %v7435_v24 = vcombine.low %v7413_v16, %v7420_v17  ;;  %v13477_v25 = vpack.c.bf16 %v6648_v20, %v6646_v18  ;;  %v13478_v26 = vpack.c.bf16 %v6719_v22, %v6717_v19 }
 0x5b6   :  { %7554 = vst [vmem:[#allocation13 + $0x80] sm:$0xff] %v7402_v23  ;;  %v7427_v27 = vrot.slane %v13477_v25, %v14332_v21  ;;  %v7434_v28 = vrot.slane %v13478_v26, %v14332_v21  ;;  %v6788_v29 = vpop.f32.mrb[74].mxu0  ;;  %v6859_v30 = vpop.f32.mrb[76].mxu1  ;;  %v7443_v36 = vrot.slane %v7435_v24, %v14332_v21 }
 0x5b7   :  { %v6790_v31 = vpop.f32.mrb[75].mxu0  ;;  %v6861_v32 = vpop.f32.mrb[77].mxu1 }
 0x5b8   :  { %v7436_v33 = vcombine.low %v7427_v27, %v7434_v28  ;;  %v13479_v34 = vpack.c.bf16 %v6790_v31, %v6788_v29  ;;  %v13480_v35 = vpack.c.bf16 %v6861_v32, %v6859_v30 }
 0x5ba   :  { %v7450_v37 = vrot.slane %v7436_v33, %v14332_v21  ;;  %v7462_v38 = vrot.slane %v13479_v34, %v14332_v21  ;;  %v7469_v39 = vrot.slane %v13480_v35, %v14332_v21  ;;  %v6930_v1 = vpop.f32.mrb[76].mxu0  ;;  %v7001_v40 = vpop.f32.mrb[78].mxu1 }
 0x5bb   :  { %v6932_v41 = vpop.f32.mrb[77].mxu0  ;;  %v7003_v42 = vpop.f32.mrb[79].mxu1 }
 0x5bc   :  { %v7451_v43 = vcombine.low %v7443_v36, %v7450_v37  ;;  %v7484_v44 = vcombine.low %v7462_v38, %v7469_v39  ;;  %v13481_v45 = vpack.c.bf16 %v6932_v41, %v6930_v1  ;;  %v13482_v46 = vpack.c.bf16 %v7003_v42, %v7001_v40 }
 0x5be   :  { %7555 = vst [vmem:[#allocation13 + $0x88] sm:$0xff] %v7451_v43  ;;  %v7476_v47 = vrot.slane %v13481_v45, %v14332_v21  ;;  %v7483_v48 = vrot.slane %v13482_v46, %v14332_v21  ;;  %v7072_v49 = vpop.f32.mrb[78].mxu0  ;;  %v7143_v50 = vpop.f32.mrb[80].mxu1  ;;  %v7492_v56 = vrot.slane %v7484_v44, %v14332_v21 }
 0x5bf   :  { %v7074_v51 = vpop.f32.mrb[79].mxu0  ;;  %v7145_v52 = vpop.f32.mrb[81].mxu1 }
 0x5c0   :  { %v7485_v53 = vcombine.low %v7476_v47, %v7483_v48  ;;  %v13483_v54 = vpack.c.bf16 %v7074_v51, %v7072_v49  ;;  %v13484_v55 = vpack.c.bf16 %v7145_v52, %v7143_v50 }
 0x5c2   :  { %v7499_v57 = vrot.slane %v7485_v53, %v14332_v21  ;;  %v7511_v58 = vrot.slane %v13483_v54, %v14332_v21  ;;  %v7518_v59 = vrot.slane %v13484_v55, %v14332_v21  ;;  %v7214_v60 = vpop.f32.mrb[80].mxu0  ;;  %v7285_v61 = vpop.f32.mrb[82].mxu1 }
 0x5c3   :  { %v7216_v62 = vpop.f32.mrb[81].mxu0  ;;  %v7287_v63 = vpop.f32.mrb[83].mxu1 }
 0x5c4   :  { %v7500_v0 = vcombine.low %v7492_v56, %v7499_v57  ;;  %v7533_v2 = vcombine.low %v7511_v58, %v7518_v59  ;;  %v13485_v3 = vpack.c.bf16 %v7216_v62, %v7214_v60  ;;  %v13486_v4 = vpack.c.bf16 %v7287_v63, %v7285_v61 }
 0x5c6   :  { %7556 = vst [vmem:[#allocation13 + $0x90] sm:$0xff] %v7500_v0  ;;  %v7525_v5 = vrot.slane %v13485_v3, %v14332_v21  ;;  %v7532_v6 = vrot.slane %v13486_v4, %v14332_v21  ;;  %v7656_v7 = vpop.f32.mrb[82].mxu0  ;;  %v7727_v8 = vpop.f32.mrb[84].mxu1  ;;  %v7541_v14 = vrot.slane %v7533_v2, %v14332_v21 }
 0x5c7   :  { %v7658_v9 = vpop.f32.mrb[83].mxu0  ;;  %v7729_v10 = vpop.f32.mrb[85].mxu1 }
 0x5c8   :  { %v7534_v11 = vcombine.low %v7525_v5, %v7532_v6  ;;  %v13503_v12 = vpack.c.bf16 %v7658_v9, %v7656_v7  ;;  %v13504_v13 = vpack.c.bf16 %v7729_v10, %v7727_v8 }
 0x5ca   :  { %v7548_v15 = vrot.slane %v7534_v11, %v14332_v21  ;;  %v8800_v16 = vrot.slane %v13503_v12, %v14332_v21  ;;  %v8807_v17 = vrot.slane %v13504_v13, %v14332_v21  ;;  %v7798_v18 = vpop.f32.mrb[84].mxu0  ;;  %v7869_v19 = vpop.f32.mrb[86].mxu1 }
 0x5cb   :  { %v7800_v20 = vpop.f32.mrb[85].mxu0  ;;  %v7871_v22 = vpop.f32.mrb[87].mxu1 }
 0x5cc   :  { %v7549_v23 = vcombine.low %v7541_v14, %v7548_v15  ;;  %v8822_v24 = vcombine.low %v8800_v16, %v8807_v17  ;;  %v13505_v25 = vpack.c.bf16 %v7800_v20, %v7798_v18  ;;  %v13506_v26 = vpack.c.bf16 %v7871_v22, %v7869_v19 }
 0x5ce   :  { %7557 = vst [vmem:[#allocation13 + $0x98] sm:$0xff] %v7549_v23  ;;  %v8814_v27 = vrot.slane %v13505_v25, %v14332_v21  ;;  %v8821_v28 = vrot.slane %v13506_v26, %v14332_v21  ;;  %v7940_v29 = vpop.f32.mrb[86].mxu0  ;;  %v8011_v30 = vpop.f32.mrb[88].mxu1  ;;  %v8830_v36 = vrot.slane %v8822_v24, %v14332_v21 }
 0x5cf   :  { %v7942_v31 = vpop.f32.mrb[87].mxu0  ;;  %v8013_v32 = vpop.f32.mrb[89].mxu1 }
 0x5d0   :  { %v8823_v33 = vcombine.low %v8814_v27, %v8821_v28  ;;  %v13507_v34 = vpack.c.bf16 %v7942_v31, %v7940_v29  ;;  %v13508_v35 = vpack.c.bf16 %v8013_v32, %v8011_v30 }
 0x5d2   :  { %v8837_v37 = vrot.slane %v8823_v33, %v14332_v21  ;;  %v8849_v38 = vrot.slane %v13507_v34, %v14332_v21  ;;  %v8856_v39 = vrot.slane %v13508_v35, %v14332_v21  ;;  %v8082_v1 = vpop.f32.mrb[88].mxu0  ;;  %v8153_v40 = vpop.f32.mrb[90].mxu1 }
 0x5d3   :  { %v8084_v41 = vpop.f32.mrb[89].mxu0  ;;  %v8155_v42 = vpop.f32.mrb[91].mxu1 }
 0x5d4   :  { %v8838_v43 = vcombine.low %v8830_v36, %v8837_v37  ;;  %v8871_v44 = vcombine.low %v8849_v38, %v8856_v39  ;;  %v13509_v45 = vpack.c.bf16 %v8084_v41, %v8082_v1  ;;  %v13510_v46 = vpack.c.bf16 %v8155_v42, %v8153_v40 }
 0x5d6   :  { %8990 = vst [vmem:[#allocation13 + $0xa0] sm:$0xff] %v8838_v43  ;;  %v8863_v47 = vrot.slane %v13509_v45, %v14332_v21  ;;  %v8870_v48 = vrot.slane %v13510_v46, %v14332_v21  ;;  %v8224_v49 = vpop.f32.mrb[90].mxu0  ;;  %v8295_v50 = vpop.f32.mrb[92].mxu1  ;;  %v8879_v56 = vrot.slane %v8871_v44, %v14332_v21 }
 0x5d7   :  { %v8226_v51 = vpop.f32.mrb[91].mxu0  ;;  %v8297_v52 = vpop.f32.mrb[93].mxu1 }
 0x5d8   :  { %v8872_v53 = vcombine.low %v8863_v47, %v8870_v48  ;;  %v13511_v54 = vpack.c.bf16 %v8226_v51, %v8224_v49  ;;  %v13512_v55 = vpack.c.bf16 %v8297_v52, %v8295_v50 }
 0x5da   :  { %v8886_v57 = vrot.slane %v8872_v53, %v14332_v21  ;;  %v8898_v58 = vrot.slane %v13511_v54, %v14332_v21  ;;  %v8905_v59 = vrot.slane %v13512_v55, %v14332_v21  ;;  %v8366_v60 = vpop.f32.mrb[92].mxu0  ;;  %v8437_v61 = vpop.f32.mrb[94].mxu1 }
 0x5db   :  { %v8368_v62 = vpop.f32.mrb[93].mxu0  ;;  %v8439_v63 = vpop.f32.mrb[95].mxu1 }
 0x5dc   :  { %v8887_v0 = vcombine.low %v8879_v56, %v8886_v57  ;;  %v8920_v2 = vcombine.low %v8898_v58, %v8905_v59  ;;  %v13513_v3 = vpack.c.bf16 %v8368_v62, %v8366_v60  ;;  %v13514_v4 = vpack.c.bf16 %v8439_v63, %v8437_v61 }
 0x5de   :  { %8991 = vst [vmem:[#allocation13 + $0xa8] sm:$0xff] %v8887_v0  ;;  %v8912_v5 = vrot.slane %v13513_v3, %v14332_v21  ;;  %v8919_v6 = vrot.slane %v13514_v4, %v14332_v21  ;;  %v8508_v7 = vpop.f32.mrb[94].mxu0  ;;  %v8579_v8 = vpop.f32.mrb[96].mxu1  ;;  %v8928_v14 = vrot.slane %v8920_v2, %v14332_v21 }
 0x5df   :  { %v8510_v9 = vpop.f32.mrb[95].mxu0  ;;  %v8581_v10 = vpop.f32.mrb[97].mxu1 }
 0x5e0   :  { %v8921_v11 = vcombine.low %v8912_v5, %v8919_v6  ;;  %v13515_v12 = vpack.c.bf16 %v8510_v9, %v8508_v7  ;;  %v13516_v13 = vpack.c.bf16 %v8581_v10, %v8579_v8 }
 0x5e2   :  { %v8935_v15 = vrot.slane %v8921_v11, %v14332_v21  ;;  %v8947_v16 = vrot.slane %v13515_v12, %v14332_v21  ;;  %v8954_v17 = vrot.slane %v13516_v13, %v14332_v21  ;;  %v8650_v18 = vpop.f32.mrb[96].mxu0  ;;  %v8721_v19 = vpop.f32.mrb[98].mxu1 }
 0x5e3   :  { %v8652_v20 = vpop.f32.mrb[97].mxu0  ;;  %v8723_v22 = vpop.f32.mrb[99].mxu1 }
 0x5e4   :  { %v8936_v23 = vcombine.low %v8928_v14, %v8935_v15  ;;  %v8969_v24 = vcombine.low %v8947_v16, %v8954_v17  ;;  %v13517_v25 = vpack.c.bf16 %v8652_v20, %v8650_v18  ;;  %v13518_v26 = vpack.c.bf16 %v8723_v22, %v8721_v19 }
 0x5e6   :  { %8992 = vst [vmem:[#allocation13 + $0xb0] sm:$0xff] %v8936_v23  ;;  %v8961_v27 = vrot.slane %v13517_v25, %v14332_v21  ;;  %v8968_v28 = vrot.slane %v13518_v26, %v14332_v21  ;;  %v9092_v29 = vpop.f32.mrb[98].mxu0  ;;  %v9163_v30 = vpop.f32.mrb[100].mxu1  ;;  %v8977_v36 = vrot.slane %v8969_v24, %v14332_v21 }
 0x5e7   :  { %v9094_v31 = vpop.f32.mrb[99].mxu0  ;;  %v9165_v32 = vpop.f32.mrb[101].mxu1 }
 0x5e8   :  { %v8970_v33 = vcombine.low %v8961_v27, %v8968_v28  ;;  %v13535_v34 = vpack.c.bf16 %v9094_v31, %v9092_v29  ;;  %v13536_v35 = vpack.c.bf16 %v9165_v32, %v9163_v30 }
 0x5ea   :  { %v8984_v37 = vrot.slane %v8970_v33, %v14332_v21  ;;  %v10236_v38 = vrot.slane %v13535_v34, %v14332_v21  ;;  %v10243_v39 = vrot.slane %v13536_v35, %v14332_v21  ;;  %v9234_v1 = vpop.f32.mrb[100].mxu0  ;;  %v9305_v40 = vpop.f32.mrb[102].mxu1 }
 0x5eb   :  { %v9236_v41 = vpop.f32.mrb[101].mxu0  ;;  %v9307_v42 = vpop.f32.mrb[103].mxu1 }
 0x5ec   :  { %v8985_v43 = vcombine.low %v8977_v36, %v8984_v37  ;;  %v10258_v44 = vcombine.low %v10236_v38, %v10243_v39  ;;  %v13537_v45 = vpack.c.bf16 %v9236_v41, %v9234_v1  ;;  %v13538_v46 = vpack.c.bf16 %v9307_v42, %v9305_v40 }
 0x5ee   :  { %8993 = vst [vmem:[#allocation13 + $0xb8] sm:$0xff] %v8985_v43  ;;  %v10250_v47 = vrot.slane %v13537_v45, %v14332_v21  ;;  %v10257_v48 = vrot.slane %v13538_v46, %v14332_v21  ;;  %v9376_v49 = vpop.f32.mrb[102].mxu0  ;;  %v9447_v50 = vpop.f32.mrb[104].mxu1  ;;  %v10266_v56 = vrot.slane %v10258_v44, %v14332_v21 }
 0x5ef   :  { %v9378_v51 = vpop.f32.mrb[103].mxu0  ;;  %v9449_v52 = vpop.f32.mrb[105].mxu1 }
 0x5f0   :  { %v10259_v53 = vcombine.low %v10250_v47, %v10257_v48  ;;  %v13539_v54 = vpack.c.bf16 %v9378_v51, %v9376_v49  ;;  %v13540_v55 = vpack.c.bf16 %v9449_v52, %v9447_v50 }
 0x5f2   :  { %v10273_v57 = vrot.slane %v10259_v53, %v14332_v21  ;;  %v10285_v58 = vrot.slane %v13539_v54, %v14332_v21  ;;  %v10292_v59 = vrot.slane %v13540_v55, %v14332_v21  ;;  %v9518_v60 = vpop.f32.mrb[104].mxu0  ;;  %v9589_v61 = vpop.f32.mrb[106].mxu1 }
 0x5f3   :  { %v9520_v62 = vpop.f32.mrb[105].mxu0  ;;  %v9591_v63 = vpop.f32.mrb[107].mxu1 }
 0x5f4   :  { %v10274_v0 = vcombine.low %v10266_v56, %v10273_v57  ;;  %v10307_v2 = vcombine.low %v10285_v58, %v10292_v59  ;;  %v13541_v3 = vpack.c.bf16 %v9520_v62, %v9518_v60  ;;  %v13542_v4 = vpack.c.bf16 %v9591_v63, %v9589_v61 }
 0x5f6   :  { %10426 = vst [vmem:[#allocation13 + $0xc0] sm:$0xff] %v10274_v0  ;;  %v10299_v5 = vrot.slane %v13541_v3, %v14332_v21  ;;  %v10306_v6 = vrot.slane %v13542_v4, %v14332_v21  ;;  %v9660_v7 = vpop.f32.mrb[106].mxu0  ;;  %v9731_v8 = vpop.f32.mrb[108].mxu1  ;;  %v10315_v14 = vrot.slane %v10307_v2, %v14332_v21 }
 0x5f7   :  { %v9662_v9 = vpop.f32.mrb[107].mxu0  ;;  %v9733_v10 = vpop.f32.mrb[109].mxu1 }
 0x5f8   :  { %v10308_v11 = vcombine.low %v10299_v5, %v10306_v6  ;;  %v13543_v12 = vpack.c.bf16 %v9662_v9, %v9660_v7  ;;  %v13544_v13 = vpack.c.bf16 %v9733_v10, %v9731_v8 }
 0x5fa   :  { %v10322_v15 = vrot.slane %v10308_v11, %v14332_v21  ;;  %v10334_v16 = vrot.slane %v13543_v12, %v14332_v21  ;;  %v10341_v17 = vrot.slane %v13544_v13, %v14332_v21  ;;  %v9802_v18 = vpop.f32.mrb[108].mxu0  ;;  %v9873_v19 = vpop.f32.mrb[110].mxu1 }
 0x5fb   :  { %v9804_v20 = vpop.f32.mrb[109].mxu0  ;;  %v9875_v22 = vpop.f32.mrb[111].mxu1 }
 0x5fc   :  { %v10323_v23 = vcombine.low %v10315_v14, %v10322_v15  ;;  %v10356_v24 = vcombine.low %v10334_v16, %v10341_v17  ;;  %v13545_v25 = vpack.c.bf16 %v9804_v20, %v9802_v18  ;;  %v13546_v26 = vpack.c.bf16 %v9875_v22, %v9873_v19 }
 0x5fe   :  { %10427 = vst [vmem:[#allocation13 + $0xc8] sm:$0xff] %v10323_v23  ;;  %v10348_v27 = vrot.slane %v13545_v25, %v14332_v21  ;;  %v10355_v28 = vrot.slane %v13546_v26, %v14332_v21  ;;  %v9944_v29 = vpop.f32.mrb[110].mxu0  ;;  %v10015_v30 = vpop.f32.mrb[112].mxu1  ;;  %v10364_v36 = vrot.slane %v10356_v24, %v14332_v21 }
 0x5ff   :  { %v9946_v31 = vpop.f32.mrb[111].mxu0  ;;  %v10017_v32 = vpop.f32.mrb[113].mxu1 }
 0x600   :  { %v10357_v33 = vcombine.low %v10348_v27, %v10355_v28  ;;  %v13547_v34 = vpack.c.bf16 %v9946_v31, %v9944_v29  ;;  %v13548_v35 = vpack.c.bf16 %v10017_v32, %v10015_v30 }
 0x602   :  { %v10371_v37 = vrot.slane %v10357_v33, %v14332_v21  ;;  %v10383_v38 = vrot.slane %v13547_v34, %v14332_v21  ;;  %v10390_v39 = vrot.slane %v13548_v35, %v14332_v21  ;;  %v10086_v1 = vpop.f32.mrb[112].mxu0  ;;  %v10157_v40 = vpop.f32.mrb[114].mxu1 }
 0x603   :  { %v10088_v41 = vpop.f32.mrb[113].mxu0  ;;  %v10159_v42 = vpop.f32.mrb[115].mxu1 }
 0x604   :  { %v10372_v43 = vcombine.low %v10364_v36, %v10371_v37  ;;  %v10405_v44 = vcombine.low %v10383_v38, %v10390_v39  ;;  %v13549_v45 = vpack.c.bf16 %v10088_v41, %v10086_v1  ;;  %v13550_v46 = vpack.c.bf16 %v10159_v42, %v10157_v40 }
 0x606   :  { %10428 = vst [vmem:[#allocation13 + $0xd0] sm:$0xff] %v10372_v43  ;;  %v10397_v47 = vrot.slane %v13549_v45, %v14332_v21  ;;  %v10404_v48 = vrot.slane %v13550_v46, %v14332_v21  ;;  %v10528_v49 = vpop.f32.mrb[114].mxu0  ;;  %v10599_v50 = vpop.f32.mrb[116].mxu1  ;;  %v10413_v56 = vrot.slane %v10405_v44, %v14332_v21 }
 0x607   :  { %v10530_v51 = vpop.f32.mrb[115].mxu0  ;;  %v10601_v52 = vpop.f32.mrb[117].mxu1 }
 0x608   :  { %v10406_v53 = vcombine.low %v10397_v47, %v10404_v48  ;;  %v13567_v54 = vpack.c.bf16 %v10530_v51, %v10528_v49  ;;  %v13568_v55 = vpack.c.bf16 %v10601_v52, %v10599_v50 }
 0x60a   :  { %v10420_v57 = vrot.slane %v10406_v53, %v14332_v21  ;;  %v11672_v58 = vrot.slane %v13567_v54, %v14332_v21  ;;  %v11679_v59 = vrot.slane %v13568_v55, %v14332_v21  ;;  %v10670_v60 = vpop.f32.mrb[116].mxu0 }
 0x60b   :  { %v10741_v61 = vpop.f32.mrb[118].mxu1  ;;  %v10672_v62 = vpop.f32.mrb[117].mxu0 }
 0x60c   :  { %v10421_v63 = vcombine.low %v10413_v56, %v10420_v57  ;;  %v11694_v0 = vcombine.low %v11672_v58, %v11679_v59  ;;  %v13569_v2 = vpack.c.bf16 %v10672_v62, %v10670_v60  ;;  %v10743_v3 = vpop.f32.mrb[119].mxu1 }
 0x60d   :  { %v13570_v4 = vpack.c.bf16 %v10743_v3, %v10741_v61 }
 0x60e   :  { %10429 = vst [vmem:[#allocation13 + $0xd8] sm:$0xff] %v10421_v63  ;;  %v11686_v5 = vrot.slane %v13569_v2, %v14332_v21  ;;  %v10812_v6 = vpop.f32.mrb[118].mxu0  ;;  %v11702_v15 = vrot.slane %v11694_v0, %v14332_v21 }
 0x60f   :  { %v11693_v7 = vrot.slane %v13570_v4, %v14332_v21  ;;  %v10883_v8 = vpop.f32.mrb[120].mxu1  ;;  %v10814_v9 = vpop.f32.mrb[119].mxu0 }
 0x610   :  { %v13571_v10 = vpack.c.bf16 %v10814_v9, %v10812_v6  ;;  %v10885_v11 = vpop.f32.mrb[121].mxu1 }
 0x611   :  { %v11695_v12 = vcombine.low %v11686_v5, %v11693_v7  ;;  %v13572_v13 = vpack.c.bf16 %v10885_v11, %v10883_v8 }
 0x612   :  { %v11721_v14 = vrot.slane %v13571_v10, %v14332_v21 }
 0x613   :  { %v11709_v16 = vrot.slane %v11695_v12, %v14332_v21  ;;  %v11728_v17 = vrot.slane %v13572_v13, %v14332_v21  ;;  %v10954_v18 = vpop.f32.mrb[120].mxu0  ;;  %v11025_v19 = vpop.f32.mrb[122].mxu1 }
 0x614   :  { %v10956_v20 = vpop.f32.mrb[121].mxu0  ;;  %v11027_v22 = vpop.f32.mrb[123].mxu1 }
 0x615   :  { %v11710_v23 = vcombine.low %v11702_v15, %v11709_v16  ;;  %v11743_v24 = vcombine.low %v11721_v14, %v11728_v17  ;;  %v13573_v25 = vpack.c.bf16 %v10956_v20, %v10954_v18  ;;  %v13574_v26 = vpack.c.bf16 %v11027_v22, %v11025_v19 }
 0x617   :  { %11862 = vst [vmem:[#allocation13 + $0xe0] sm:$0xff] %v11710_v23  ;;  %v11735_v27 = vrot.slane %v13573_v25, %v14332_v21  ;;  %v11742_v28 = vrot.slane %v13574_v26, %v14332_v21  ;;  %v11096_v29 = vpop.f32.mrb[122].mxu0  ;;  %v11751_v36 = vrot.slane %v11743_v24, %v14332_v21 }
 0x618   :  { %v11167_v30 = vpop.f32.mrb[124].mxu1  ;;  %v11098_v31 = vpop.f32.mrb[123].mxu0 }
 0x619   :  { %v11744_v32 = vcombine.low %v11735_v27, %v11742_v28  ;;  %v13575_v33 = vpack.c.bf16 %v11098_v31, %v11096_v29  ;;  %v11169_v34 = vpop.f32.mrb[125].mxu1 }
 0x61a   :  { %v13576_v35 = vpack.c.bf16 %v11169_v34, %v11167_v30 }
 0x61b   :  { %v11758_v37 = vrot.slane %v11744_v32, %v14332_v21  ;;  %v11770_v38 = vrot.slane %v13575_v33, %v14332_v21  ;;  %v11238_v39 = vpop.f32.mrb[124].mxu0 }
 0x61c   :  { %v11777_v1 = vrot.slane %v13576_v35, %v14332_v21  ;;  %v11309_v40 = vpop.f32.mrb[126].mxu1  ;;  %v11240_v41 = vpop.f32.mrb[125].mxu0 }
 0x61d   :  { %v11759_v42 = vcombine.low %v11751_v36, %v11758_v37  ;;  %v13577_v43 = vpack.c.bf16 %v11240_v41, %v11238_v39  ;;  %v11311_v44 = vpop.f32.mrb[127].mxu1 }
 0x61e   :  { %v11792_v45 = vcombine.low %v11770_v38, %v11777_v1  ;;  %v13578_v46 = vpack.c.bf16 %v11311_v44, %v11309_v40 }
 0x61f   :  { %11863 = vst [vmem:[#allocation13 + $0xe8] sm:$0xff] %v11759_v42  ;;  %v11784_v47 = vrot.slane %v13577_v43, %v14332_v21 }
 0x620   :  { %v11791_v48 = vrot.slane %v13578_v46, %v14332_v21  ;;  %v11380_v49 = vpop.f32.mrb[126].mxu0  ;;  %v11451_v50 = vpop.f32.mrb[128].mxu1  ;;  %v11800_v56 = vrot.slane %v11792_v45, %v14332_v21 }
 0x621   :  { %v11382_v51 = vpop.f32.mrb[127].mxu0  ;;  %v11453_v52 = vpop.f32.mrb[129].mxu1 }
 0x622   :  { %v11793_v53 = vcombine.low %v11784_v47, %v11791_v48  ;;  %v13579_v54 = vpack.c.bf16 %v11382_v51, %v11380_v49  ;;  %v13580_v55 = vpack.c.bf16 %v11453_v52, %v11451_v50 }
 0x624   :  { %v11807_v57 = vrot.slane %v11793_v53, %v14332_v21  ;;  %v11819_v58 = vrot.slane %v13579_v54, %v14332_v21  ;;  %v11826_v59 = vrot.slane %v13580_v55, %v14332_v21  ;;  %v11522_v60 = vpop.f32.mrb[128].mxu0  ;;  %v11593_v61 = vpop.f32.mrb[130].mxu1 }
 0x625   :  { %v11524_v62 = vpop.f32.mrb[129].mxu0  ;;  %v11595_v63 = vpop.f32.mrb[131].mxu1 }
 0x626   :  { %v11808_v0 = vcombine.low %v11800_v56, %v11807_v57  ;;  %v11841_v2 = vcombine.low %v11819_v58, %v11826_v59  ;;  %v13581_v3 = vpack.c.bf16 %v11524_v62, %v11522_v60  ;;  %v13582_v4 = vpack.c.bf16 %v11595_v63, %v11593_v61 }
 0x628   :  { %11864 = vst [vmem:[#allocation13 + $0xf0] sm:$0xff] %v11808_v0  ;;  %v11833_v5 = vrot.slane %v13581_v3, %v14332_v21  ;;  %v11840_v6 = vrot.slane %v13582_v4, %v14332_v21  ;;  %v11964_v7 = vpop.f32.mrb[130].mxu0  ;;  %v12035_v8 = vpop.f32.mrb[132].mxu1  ;;  %v11849_v14 = vrot.slane %v11841_v2, %v14332_v21 }
 0x629   :  { %v11966_v9 = vpop.f32.mrb[131].mxu0  ;;  %v12037_v10 = vpop.f32.mrb[133].mxu1 }
 0x62a   :  { %v11842_v11 = vcombine.low %v11833_v5, %v11840_v6  ;;  %v13599_v12 = vpack.c.bf16 %v11966_v9, %v11964_v7  ;;  %v13600_v13 = vpack.c.bf16 %v12037_v10, %v12035_v8 }
 0x62c   :  { %v11856_v15 = vrot.slane %v11842_v11, %v14332_v21  ;;  %v13108_v16 = vrot.slane %v13599_v12, %v14332_v21  ;;  %v13115_v17 = vrot.slane %v13600_v13, %v14332_v21  ;;  %v12106_v18 = vpop.f32.mrb[132].mxu0  ;;  %v12177_v19 = vpop.f32.mrb[134].mxu1 }
 0x62d   :  { %v12108_v20 = vpop.f32.mrb[133].mxu0  ;;  %v12179_v22 = vpop.f32.mrb[135].mxu1 }
 0x62e   :  { %v11857_v23 = vcombine.low %v11849_v14, %v11856_v15  ;;  %v13130_v24 = vcombine.low %v13108_v16, %v13115_v17  ;;  %v13601_v25 = vpack.c.bf16 %v12108_v20, %v12106_v18  ;;  %v13602_v26 = vpack.c.bf16 %v12179_v22, %v12177_v19 }
 0x630   :  { %11865 = vst [vmem:[#allocation13 + $0xf8] sm:$0xff] %v11857_v23  ;;  %v13122_v27 = vrot.slane %v13601_v25, %v14332_v21  ;;  %v13129_v28 = vrot.slane %v13602_v26, %v14332_v21  ;;  %v12248_v29 = vpop.f32.mrb[134].mxu0  ;;  %v12319_v30 = vpop.f32.mrb[136].mxu1  ;;  %v13138_v36 = vrot.slane %v13130_v24, %v14332_v21 }
 0x631   :  { %v12250_v31 = vpop.f32.mrb[135].mxu0  ;;  %v12321_v32 = vpop.f32.mrb[137].mxu1 }
 0x632   :  { %v13131_v33 = vcombine.low %v13122_v27, %v13129_v28  ;;  %v13603_v34 = vpack.c.bf16 %v12250_v31, %v12248_v29  ;;  %v13604_v35 = vpack.c.bf16 %v12321_v32, %v12319_v30 }
 0x634   :  { %v13145_v37 = vrot.slane %v13131_v33, %v14332_v21  ;;  %v13157_v38 = vrot.slane %v13603_v34, %v14332_v21  ;;  %v13164_v39 = vrot.slane %v13604_v35, %v14332_v21  ;;  %v12390_v1 = vpop.f32.mrb[136].mxu0  ;;  %v12461_v40 = vpop.f32.mrb[138].mxu1 }
 0x635   :  { %v12392_v41 = vpop.f32.mrb[137].mxu0  ;;  %v12463_v42 = vpop.f32.mrb[139].mxu1 }
 0x636   :  { %v13146_v43 = vcombine.low %v13138_v36, %v13145_v37  ;;  %v13179_v44 = vcombine.low %v13157_v38, %v13164_v39  ;;  %v13605_v45 = vpack.c.bf16 %v12392_v41, %v12390_v1  ;;  %v13606_v46 = vpack.c.bf16 %v12463_v42, %v12461_v40 }
 0x638   :  { %13298 = vst [vmem:[#allocation13 + $0x100] sm:$0xff] %v13146_v43  ;;  %v13171_v47 = vrot.slane %v13605_v45, %v14332_v21  ;;  %v13178_v48 = vrot.slane %v13606_v46, %v14332_v21  ;;  %v12532_v49 = vpop.f32.mrb[138].mxu0  ;;  %v12603_v50 = vpop.f32.mrb[140].mxu1  ;;  %v13187_v56 = vrot.slane %v13179_v44, %v14332_v21 }
 0x639   :  { %v12534_v51 = vpop.f32.mrb[139].mxu0  ;;  %v12605_v52 = vpop.f32.mrb[141].mxu1 }
 0x63a   :  { %v13180_v53 = vcombine.low %v13171_v47, %v13178_v48  ;;  %v13607_v54 = vpack.c.bf16 %v12534_v51, %v12532_v49  ;;  %v13608_v55 = vpack.c.bf16 %v12605_v52, %v12603_v50 }
 0x63c   :  { %v13194_v57 = vrot.slane %v13180_v53, %v14332_v21  ;;  %v13206_v58 = vrot.slane %v13607_v54, %v14332_v21  ;;  %v13213_v59 = vrot.slane %v13608_v55, %v14332_v21  ;;  %v12674_v60 = vpop.f32.mrb[140].mxu0  ;;  %v12745_v61 = vpop.f32.mrb[142].mxu1 }
 0x63d   :  { %v12676_v62 = vpop.f32.mrb[141].mxu0  ;;  %v12747_v63 = vpop.f32.mrb[143].mxu1 }
 0x63e   :  { %v13195_v0 = vcombine.low %v13187_v56, %v13194_v57  ;;  %v13228_v2 = vcombine.low %v13206_v58, %v13213_v59  ;;  %v13609_v3 = vpack.c.bf16 %v12676_v62, %v12674_v60  ;;  %v13610_v4 = vpack.c.bf16 %v12747_v63, %v12745_v61 }
 0x640   :  { %13299 = vst [vmem:[#allocation13 + $0x108] sm:$0xff] %v13195_v0  ;;  %v13220_v5 = vrot.slane %v13609_v3, %v14332_v21  ;;  %v13227_v6 = vrot.slane %v13610_v4, %v14332_v21  ;;  %v12816_v7 = vpop.f32.mrb[142].mxu0  ;;  %v12887_v8 = vpop.f32.mrb[144].mxu1  ;;  %v13236_v14 = vrot.slane %v13228_v2, %v14332_v21 }
 0x641   :  { %v12818_v9 = vpop.f32.mrb[143].mxu0  ;;  %v12889_v10 = vpop.f32.mrb[145].mxu1 }
 0x642   :  { %v13229_v11 = vcombine.low %v13220_v5, %v13227_v6  ;;  %v13611_v12 = vpack.c.bf16 %v12818_v9, %v12816_v7  ;;  %v13612_v13 = vpack.c.bf16 %v12889_v10, %v12887_v8 }
 0x644   :  { %v13243_v15 = vrot.slane %v13229_v11, %v14332_v21  ;;  %v13255_v16 = vrot.slane %v13611_v12, %v14332_v21  ;;  %v13262_v17 = vrot.slane %v13612_v13, %v14332_v21  ;;  %v12958_v18 = vpop.f32.mrb[144].mxu0  ;;  %v13029_v19 = vpop.f32.mrb[146].mxu1 }
 0x645   :  { %v12960_v20 = vpop.f32.mrb[145].mxu0  ;;  %v13031_v22 = vpop.f32.mrb[147].mxu1 }
 0x646   :  { %v13244_v23 = vcombine.low %v13236_v14, %v13243_v15  ;;  %v13277_v24 = vcombine.low %v13255_v16, %v13262_v17  ;;  %v13613_v25 = vpack.c.bf16 %v12960_v20, %v12958_v18  ;;  %v13614_v26 = vpack.c.bf16 %v13031_v22, %v13029_v19 }
 0x648   :  { %13300 = vst [vmem:[#allocation13 + $0x110] sm:$0xff] %v13244_v23  ;;  %v13269_v27 = vrot.slane %v13613_v25, %v14332_v21  ;;  %v13276_v28 = vrot.slane %v13614_v26, %v14332_v21  ;;  %v13285_v30 = vrot.slane %v13277_v24, %v14332_v21 }
 0x64a   :  { %v13278_v29 = vcombine.low %v13269_v27, %v13276_v28 }
 0x64c   :  { %v13292_v31 = vrot.slane %v13278_v29, %v14332_v21 }
 0x64e   :  { %v13293_v32 = vcombine.low %v13285_v30, %v13292_v31 }
 0x650   :  { %13301 = vst [vmem:[#allocation13 + $0x118] sm:$0xff] %v13293_v32 }
 0x651   :  { %13828 = shalt.err (!%p13825_p10)
}
 0x652   :  { %s13829_s21 = scalar_lea.hbm %s14682_s8, 4608 }
 0x653   :  { %p13830_p11 = scmp.ne.s32.totalorder %s14682_s8, %s13829_s21  ;;  %p13833_p12 = scmp.lt.u32.totalorder %s13829_s21, %s14682_s8 }
 0x655   :  { %p13835_p13 = pnand %p13833_p12, %p13830_p11 }
 0x657   :  { %13838 = shalt.err (!%p13835_p13)
}
 0x658   :  { %13311 = dma.vmem_to_hbm [thread:$0]  %s13309_s12, 4608, %s14682_s8, [#allocation4]  }
 0x659   :  { %13847 = dma.done.wait [#allocation4], 4608  }
 0x65a   :  { %13848 = vsyncadd [#allocation4], 4294962688 }
 0x65b   :  { %13315 = vsyncpa [#allocation3], 1 }
 0x65c   :  { %13316 = vsyncpa [#allocation6], 1 }
 0x65d   :  { %13317 = vsyncpa [#allocation9], 1 }
 0x65e   :  { %13318 = vsyncpa [#allocation12], 1 }
 0x65f   :  { %13319 = vsyncpa [#allocation4], 1 }

</bundles_post_ra>
